<compile_context>
chip_gen: v7x
topology: tpu7x:2x2x1
jax: 0.10.0
libtpu: 0.0.40
codegen_flags: <defaults>
</compile_context>

<pallas_src>
import jax
import jax.numpy as jnp
from jax import lax
from jax.experimental import pallas as pl
from jax.experimental.pallas import tpu as pltpu

IN_CHANNELS = 28
HIDDEN = 256
N_ACTIONS = 4
H = W = 4                      # spatial size implied by fc1.in_features == 1184
COMPUTE_DTYPE = jnp.float32    # jnp.bfloat16 on v6e/v7x (tolerance loosens below)
MAX_BATCH_TILE = 256           # MXU-friendly M tile; keeps VMEM use small on v7x
LANE = 128
SUBLANE = 8


def _round_up(x, m):
    return (x + m - 1) // m * m


# ----------------------------------------------------------------------------
# Fused Pallas kernel: the whole Network forward = 3 matmuls, VMEM resident.
# ----------------------------------------------------------------------------
def _network_kernel(x_ref, wc_ref, bc_ref, wf_ref, bf_ref, wo_ref, bo_ref, o_ref):
    # x_ref  : (bt, 448)    flattened NCHW input tile
    # wc_ref : (448, 1280)  unrolled conv weights (convR | convC | conv1∘conv2)
    # wf_ref : (1280, 256)  fc1 weight (rows zero-padded 1184 -> 1280)
    # wo_ref : (256, 128)   out weight (cols zero-padded 4 -> 128)
    # b*_ref : (1, N)       f32 biases
    # o_ref  : (bt, 128)
    x = x_ref[...]
    h0 = jnp.dot(x, wc_ref[...], preferred_element_type=jnp.float32) + bc_ref[...]
    h0 = jnp.maximum(h0, 0.0).astype(wf_ref.dtype)           # relu(conv features)
    h1 = jnp.dot(h0, wf_ref[...], preferred_element_type=jnp.float32) + bf_ref[...]
    h1 = jnp.maximum(h1, 0.0).astype(wo_ref.dtype)           # relu(fc1(.))
    y = jnp.dot(h1, wo_ref[...], preferred_element_type=jnp.float32) + bo_ref[...]
    o_ref[...] = y.astype(o_ref.dtype)


# ----------------------------------------------------------------------------
# Pure-JAX conv helper (used by the reference and the offline weight unroll).
# ----------------------------------------------------------------------------
def _conv_ref(x, w, b):
    dn = lax.conv_dimension_numbers(x.shape, w.shape, ("NCHW", "OIHW", "NCHW"))
    y = lax.conv_general_dilated(x, w, (1, 1), "VALID", dimension_numbers=dn,
                                 precision=lax.Precision.HIGHEST)
    return y + b.reshape(1, -1, 1, 1)


# ----------------------------------------------------------------------------
# One-time weight re-layout (run once, outside jit / the hot path).
# Builds the unrolled ("Toeplitz") conv matrix by pushing the identity basis
# through each (linear) conv branch, and the bias vector by pushing zeros
# through with biases enabled.  Feature order matches torch's
# .view(B,1,-1) flatten + cat([xR, xC, x], dim=2), so fc1_w.T applies directly.
# ----------------------------------------------------------------------------
def prepare_params(params):
    cd = COMPUTE_DTYPE
    n_in = IN_CHANNELS * H * W                                   # 448
    eye = jnp.eye(n_in, dtype=jnp.float32).reshape(n_in, IN_CHANNELS, H, W)
    zero = jnp.zeros((1, IN_CHANNELS, H, W), jnp.float32)

    def lin_cols(layers):                     # linear part of the conv chain
        y = eye
        for w, b in layers:
            y = _conv_ref(y, w, jnp.zeros_like(b))
        return y.reshape(n_in, -1)            # (448, Cout*Ho*Wo) torch order

    def bias_cols(layers):                    # affine offset of the conv chain
        y = zero
        for w, b in layers:
            y = _conv_ref(y, w, b)
        return y.reshape(-1)                  # (Cout*Ho*Wo,)

    layR = [(params["convR_w"], params["convR_b"])]
    layC = [(params["convC_w"], params["convC_b"])]
    layX = [(params["conv1_w"], params["conv1_b"]),
            (params["conv2_w"], params["conv2_b"])]              # conv1 ∘ conv2

    w_conv = jnp.concatenate([lin_cols(layR), lin_cols(layC), lin_cols(layX)],
                             axis=1)                             # (448, 1184)
    b_conv = jnp.concatenate([bias_cols(layR), bias_cols(layC), bias_cols(layX)])

    # Pad feature dim 1184 -> 1280 (lane-dense).  Padded features are exactly
    # zero after relu and meet zero fc1 rows, so the result is unchanged.
    feat = w_conv.shape[1]
    feat_pad = _round_up(feat, LANE)                             # 1280
    w_conv = jnp.pad(w_conv, ((0, 0), (0, feat_pad - feat)))
    b_conv = jnp.pad(b_conv, (0, feat_pad - feat))

    w_fc1 = jnp.pad(params["fc1_w"].T, ((0, feat_pad - feat), (0, 0)))  # (1280,256)
    b_fc1 = params["fc1_b"]

    n_actions = params["out_w"].shape[0]
    out_pad = _round_up(n_actions, LANE)                         # 128
    w_out = jnp.pad(params["out_w"].T, ((0, 0), (0, out_pad - n_actions)))
    b_out = jnp.pad(params["out_b"], (0, out_pad - n_actions))

    return dict(
        w_conv=w_conv.astype(cd), b_conv=b_conv.reshape(1, -1).astype(jnp.float32),
        w_fc1=w_fc1.astype(cd),   b_fc1=b_fc1.reshape(1, -1).astype(jnp.float32),
        w_out=w_out.astype(cd),   b_out=b_out.reshape(1, -1).astype(jnp.float32),
    )


# ----------------------------------------------------------------------------
# Fused forward: state (B, 28, H, W) -> (B, 1, n_actions)
# ----------------------------------------------------------------------------
def network_forward(prep, state, *, n_actions=N_ACTIONS):
    B = state.shape[0]
    x = state.reshape(B, -1).astype(COMPUTE_DTYPE)               # (B, 448)

    bt = min(MAX_BATCH_TILE, _round_up(B, SUBLANE))              # batch tile
    b_pad = _round_up(B, bt)
    if b_pad != B:
        x = jnp.pad(x, ((0, b_pad - B), (0, 0)))                 # zero rows: harmless

    k = x.shape[1]                                               # 448
    fp = prep["w_conv"].shape[1]                                 # 1280
    hh = prep["w_fc1"].shape[1]                                  # 256
    op = prep["w_out"].shape[1]                                  # 128

    y = pl.pallas_call(
        _network_kernel,
        out_shape=jax.ShapeDtypeStruct((b_pad, op), jnp.float32),
        grid_spec=pltpu.PrefetchScalarGridSpec(
            num_scalar_prefetch=0,
            grid=(b_pad // bt,),
            in_specs=[
                pl.BlockSpec((bt, k), lambda i: (i, 0)),         # batch tile
                pl.BlockSpec((k, fp), lambda i: (0, 0)),         # weights resident
                pl.BlockSpec((1, fp), lambda i: (0, 0)),
                pl.BlockSpec((fp, hh), lambda i: (0, 0)),
                pl.BlockSpec((1, hh), lambda i: (0, 0)),
                pl.BlockSpec((hh, op), lambda i: (0, 0)),
                pl.BlockSpec((1, op), lambda i: (0, 0)),
            ],
            out_specs=pl.BlockSpec((bt, op), lambda i: (i, 0)),
        ),
        compiler_params=pltpu.CompilerParams(
            dimension_semantics=("parallel",),
            vmem_limit_bytes=32 * 1024 * 1024),
    )(x, prep["w_conv"], prep["b_conv"], prep["w_fc1"], prep["b_fc1"],
      prep["w_out"], prep["b_out"])

    return y[:B, :n_actions][:, None, :]                         # (B, 1, n_actions)


# ----------------------------------------------------------------------------
# Pure-JAX reference (mirrors the PyTorch module exactly).
# ----------------------------------------------------------------------------
def network_forward_ref(params, state):
    B = state.shape[0]
    xR = jnp.maximum(_conv_ref(state, params["convR_w"], params["convR_b"]), 0.0
                     ).reshape(B, 1, -1)
    xC = jnp.maximum(_conv_ref(state, params["convC_w"], params["convC_b"]), 0.0
                     ).reshape(B, 1, -1)
    h1 = _conv_ref(state, params["conv1_w"], params["conv1_b"])
    x2 = jnp.maximum(_conv_ref(h1, params["conv2_w"], params["conv2_b"]), 0.0
                     ).reshape(B, 1, -1)
    feats = jnp.concatenate([xR, xC, x2], axis=2)                # (B,1,1184)
    h = jnp.maximum(jnp.einsum("bif,hf->bih", feats, params["fc1_w"],
                               precision=lax.Precision.HIGHEST)
                    + params["fc1_b"], 0.0)                      # (B,1,256)
    return jnp.einsum("bih,ah->bia", h, params["out_w"],
                      precision=lax.Precision.HIGHEST) + params["out_b"]


# ----------------------------------------------------------------------------
# Deterministic parameters (PyTorch-layout shapes).
# ----------------------------------------------------------------------------
def init_params(key):
    ks = jax.random.split(key, 12)
    s = 0.1

    def rn(k, shape):
        return jax.random.normal(k, shape, jnp.float32) * s

    p_r = (H - 1) * W
    p_c = H * (W - 1)
    p_x = (H - 2) * (W - 2)
    feat = IN_CHANNELS * p_r + IN_CHANNELS * p_c + 128 * p_x     # 1184
    return dict(
        convR_w=rn(ks[0], (IN_CHANNELS, IN_CHANNELS, 2, 1)), convR_b=rn(ks[1], (IN_CHANNELS,)),
        convC_w=rn(ks[2], (IN_CHANNELS, IN_CHANNELS, 1, 2)), convC_b=rn(ks[3], (IN_CHANNELS,)),
        conv1_w=rn(ks[4], (64, IN_CHANNELS, 2, 2)), conv1_b=rn(ks[5], (64,)),
        conv2_w=rn(ks[6], (128, 64, 2, 2)), conv2_b=rn(ks[7], (128,)),
        fc1_w=rn(ks[8], (HIDDEN, feat)), fc1_b=rn(ks[9], (HIDDEN,)),
        out_w=rn(ks[10], (N_ACTIONS, HIDDEN)), out_b=rn(ks[11], (N_ACTIONS,)),
    )


if __name__ == "__main__":
    key = jax.random.PRNGKey(0)
    k_param, k_in = jax.random.split(key)
    params = init_params(k_param)

    B = 2
    state = jax.random.normal(k_in, (B, IN_CHANNELS, H, W), jnp.float32)

    prep = prepare_params(params)                  # one-time weight re-layout
    fwd = jax.jit(network_forward)
    out = jax.block_until_ready(fwd(prep, state))
    assert out.shape == (B, 1, N_ACTIONS), out.shape

    ref = jax.block_until_ready(jax.jit(network_forward_ref)(params, state))
    tol = 1e-3 if COMPUTE_DTYPE == jnp.float32 else 5e-2
    max_err = float(jnp.max(jnp.abs(out - ref)))
    assert jnp.allclose(out, ref, rtol=tol, atol=tol), max_err

    print("KERNEL_OK")
</pallas_src>

<mosaic_0001>
module attributes {stable_mosaic.version = 11 : i64} {
  func.func @_network_kernel(%arg0: i32, %arg1: memref<8x448xf32, #tpu.memory_space<vmem>>, %arg2: memref<448x1280xf32, #tpu.memory_space<vmem>>, %arg3: memref<1x1280xf32, #tpu.memory_space<vmem>>, %arg4: memref<1280x256xf32, #tpu.memory_space<vmem>>, %arg5: memref<1x256xf32, #tpu.memory_space<vmem>>, %arg6: memref<256x128xf32, #tpu.memory_space<vmem>>, %arg7: memref<1x128xf32, #tpu.memory_space<vmem>>, %arg8: memref<8x128xf32, #tpu.memory_space<vmem>>) attributes {dimension_semantics = [#tpu.dimension_semantics<parallel>], iteration_bounds = array<i64: 1>, scalar_prefetch = 0 : i64, scratch_operands = 0 : i64, tpu.core_type = #tpu.core_type<tc>, window_params = [{transform_indices = @transform_0, window_bounds = array<i64: 8, 448>}, {pipeline_mode = #tpu.pipeline_mode<synchronous>, transform_indices = @transform_1, window_bounds = array<i64: 448, 1280>}, {pipeline_mode = #tpu.pipeline_mode<synchronous>, transform_indices = @transform_2, window_bounds = array<i64: 1, 1280>}, {pipeline_mode = #tpu.pipeline_mode<synchronous>, transform_indices = @transform_3, window_bounds = array<i64: 1280, 256>}, {pipeline_mode = #tpu.pipeline_mode<synchronous>, transform_indices = @transform_4, window_bounds = array<i64: 1, 256>}, {pipeline_mode = #tpu.pipeline_mode<synchronous>, transform_indices = @transform_5, window_bounds = array<i64: 256, 128>}, {pipeline_mode = #tpu.pipeline_mode<synchronous>, transform_indices = @transform_6, window_bounds = array<i64: 1, 128>}, {transform_indices = @transform_7, window_bounds = array<i64: 8, 128>}]} {
    %c0 = arith.constant 0 : index
    %c0_0 = arith.constant 0 : index
    %0 = vector.load %arg1[%c0, %c0_0] : memref<8x448xf32, #tpu.memory_space<vmem>>, vector<8x448xf32>
    %c0_1 = arith.constant 0 : index
    %c0_2 = arith.constant 0 : index
    %1 = vector.load %arg2[%c0_1, %c0_2] : memref<448x1280xf32, #tpu.memory_space<vmem>>, vector<448x1280xf32>
    %cst = arith.constant dense<0.000000e+00> : vector<8x1280xf32>
    %2 = tpu.matmul %0, %1, %cst {dimension_numbers = #tpu.dot_dimension_numbers<[1], [0], [0], [1], [0, 0, 1, 1], [], []>} : vector<8x448xf32>, vector<448x1280xf32>, vector<8x1280xf32> -> vector<8x1280xf32>
    %c0_3 = arith.constant 0 : index
    %c0_4 = arith.constant 0 : index
    %3 = vector.load %arg3[%c0_3, %c0_4] : memref<1x1280xf32, #tpu.memory_space<vmem>>, vector<1x1280xf32>
    %4 = vector.broadcast %3 : vector<1x1280xf32> to vector<8x1280xf32>
    %5 = arith.addf %2, %4 : vector<8x1280xf32>
    %cst_5 = arith.constant 0.000000e+00 : f32
    %6 = vector.broadcast %cst_5 : f32 to vector<8x1280xf32>
    %7 = arith.maximumf %5, %6 : vector<8x1280xf32>
    %c0_6 = arith.constant 0 : index
    %c0_7 = arith.constant 0 : index
    %8 = vector.load %arg4[%c0_6, %c0_7] : memref<1280x256xf32, #tpu.memory_space<vmem>>, vector<1280x256xf32>
    %cst_8 = arith.constant dense<0.000000e+00> : vector<8x256xf32>
    %9 = tpu.matmul %7, %8, %cst_8 {dimension_numbers = #tpu.dot_dimension_numbers<[1], [0], [0], [1], [0, 0, 1, 1], [], []>} : vector<8x1280xf32>, vector<1280x256xf32>, vector<8x256xf32> -> vector<8x256xf32>
    %c0_9 = arith.constant 0 : index
    %c0_10 = arith.constant 0 : index
    %10 = vector.load %arg5[%c0_9, %c0_10] : memref<1x256xf32, #tpu.memory_space<vmem>>, vector<1x256xf32>
    %11 = vector.broadcast %10 : vector<1x256xf32> to vector<8x256xf32>
    %12 = arith.addf %9, %11 : vector<8x256xf32>
    %cst_11 = arith.constant 0.000000e+00 : f32
    %13 = vector.broadcast %cst_11 : f32 to vector<8x256xf32>
    %14 = arith.maximumf %12, %13 : vector<8x256xf32>
    %c0_12 = arith.constant 0 : index
    %c0_13 = arith.constant 0 : index
    %15 = vector.load %arg6[%c0_12, %c0_13] : memref<256x128xf32, #tpu.memory_space<vmem>>, vector<256x128xf32>
    %cst_14 = arith.constant dense<0.000000e+00> : vector<8x128xf32>
    %16 = tpu.matmul %14, %15, %cst_14 {dimension_numbers = #tpu.dot_dimension_numbers<[1], [0], [0], [1], [0, 0, 1, 1], [], []>} : vector<8x256xf32>, vector<256x128xf32>, vector<8x128xf32> -> vector<8x128xf32>
    %c0_15 = arith.constant 0 : index
    %c0_16 = arith.constant 0 : index
    %17 = vector.load %arg7[%c0_15, %c0_16] : memref<1x128xf32, #tpu.memory_space<vmem>>, vector<1x128xf32>
    %18 = vector.broadcast %17 : vector<1x128xf32> to vector<8x128xf32>
    %19 = arith.addf %16, %18 : vector<8x128xf32>
    %c0_17 = arith.constant 0 : index
    %c0_18 = arith.constant 0 : index
    %20 = vector.load %arg8[%c0_17, %c0_18] : memref<8x128xf32, #tpu.memory_space<vmem>>, vector<8x128xf32>
    tpu.vector_store %arg8[%c0_17, %c0_18], %19 {strides = array<i32>} : memref<8x128xf32, #tpu.memory_space<vmem>>, vector<8x128xf32>,
    return
  }
  func.func @transform_0(%arg0: i32) -> (i32, i32) {
    %c0_i32 = arith.constant 0 : i32
    %c0_i32_0 = arith.constant 0 : i32
    return %arg0, %c0_i32 : i32, i32
  }
  func.func @transform_1(%arg0: i32) -> (i32, i32) {
    %c0_i32 = arith.constant 0 : i32
    %c0_i32_0 = arith.constant 0 : i32
    %c0_i32_1 = arith.constant 0 : i32
    return %c0_i32, %c0_i32_0 : i32, i32
  }
  func.func @transform_2(%arg0: i32) -> (i32, i32) {
    %c0_i32 = arith.constant 0 : i32
    %c0_i32_0 = arith.constant 0 : i32
    %c0_i32_1 = arith.constant 0 : i32
    return %c0_i32, %c0_i32_0 : i32, i32
  }
  func.func @transform_3(%arg0: i32) -> (i32, i32) {
    %c0_i32 = arith.constant 0 : i32
    %c0_i32_0 = arith.constant 0 : i32
    %c0_i32_1 = arith.constant 0 : i32
    return %c0_i32, %c0_i32_0 : i32, i32
  }
  func.func @transform_4(%arg0: i32) -> (i32, i32) {
    %c0_i32 = arith.constant 0 : i32
    %c0_i32_0 = arith.constant 0 : i32
    %c0_i32_1 = arith.constant 0 : i32
    return %c0_i32, %c0_i32_0 : i32, i32
  }
  func.func @transform_5(%arg0: i32) -> (i32, i32) {
    %c0_i32 = arith.constant 0 : i32
    %c0_i32_0 = arith.constant 0 : i32
    %c0_i32_1 = arith.constant 0 : i32
    return %c0_i32, %c0_i32_0 : i32, i32
  }
  func.func @transform_6(%arg0: i32) -> (i32, i32) {
    %c0_i32 = arith.constant 0 : i32
    %c0_i32_0 = arith.constant 0 : i32
    %c0_i32_1 = arith.constant 0 : i32
    return %c0_i32, %c0_i32_0 : i32, i32
  }
  func.func @transform_7(%arg0: i32) -> (i32, i32) {
    %c0_i32 = arith.constant 0 : i32
    %c0_i32_0 = arith.constant 0 : i32
    return %arg0, %c0_i32 : i32, i32
  }
}

</mosaic_0001>

<bundles_post_ra>
// kernel: network_forward.1
= control target key start
LH: loop header
LB: loop body
LE: loop exit
PB: predicated region body
PF: predicated region fallthrough
CT: control target
= control target key end

     0   :  { %12 = vsyncpa [#allocation3], 0  ;;  %s3624_s0 = inlined_call_operand.vmem [shape: f32[8,448], index: 0, kind: input, shape index: {}]   ;;  %s3625_s1 = inlined_call_operand.hbm [shape: f32[448,1280], index: 1, kind: input, shape index: {}]   ;;  %s3626_s2 = inlined_call_operand.hbm [shape: f32[1,1280], index: 2, kind: input, shape index: {}]   ;;  %s3627_s3 = inlined_call_operand.hbm [shape: f32[1280,256], index: 3, kind: input, shape index: {}]   ;;  %s3628_s4 = inlined_call_operand.hbm [shape: f32[1,256], index: 4, kind: input, shape index: {}]   ;;  %s3629_s5 = inlined_call_operand.hbm [shape: f32[256,128], index: 5, kind: input, shape index: {}]   ;;  %s3630_s6 = inlined_call_operand.hbm [shape: f32[1,128], index: 6, kind: input, shape index: {}]   ;;  %s3631_s7 = inlined_call_operand.vmem [shape: f32[8,128], index: 7, kind: output, shape index: {}]  }
   0x1   :  { %13 = vsyncpa [#allocation5], 0 }
   0x2   :  { %14 = vsyncpa [#allocation8], 0 }
   0x3   :  { %15 = vsyncpa [#allocation11], 0  ;;  %s3391_s24 = smov [#allocation4]   ;;  %s3392_s26 = smov [#allocation7]  }
   0x4   :  { %s36_s25 = sshll.u32 %s3391_s24, 4  ;;  %s58_s27 = sshll.u32 %s3392_s26, 4  ;;  %s37_s25 = int_to_ptr.vmem [resolvable:$true] %s36_s25  ;;  %s59_s27 = int_to_ptr.vmem [resolvable:$true] %s58_s27 }
   0x5   :  { %s3251_s30 = scalar_lea.hbm %s3626_s2, 160 }
   0x6   :  { %p3252_p0 = scmp.ne.s32.totalorder %s3626_s2, %s3251_s30  ;;  %p3255_p1 = scmp.lt.u32.totalorder %s3251_s30, %s3626_s2 }
   0x8   :  { %p3257_p2 = pnand %p3255_p1, %p3252_p0 }
   0xa   :  { %3260 = shalt.err (!%p3257_p2)
}
   0xb   :  { %s3261_s12 = scalar_lea.vmem %s37_s25, 160  ;;  %p3266_p4 = scmp.lt.s32.totalorder %s37_s25, %s37_s25 }
   0xc   :  { %p3262_p3 = scmp.ne.s32.totalorder %s37_s25, %s3261_s12  ;;  %p3267_p5 = scmp.lt.s32.totalorder %s3261_s12, %s3261_s12 }
   0xe   :  { %p3268_p6 = por %p3267_p5, %p3266_p4 }
  0x10   :  { %p3269_p7 = pnand %p3268_p6, %p3262_p3 }
  0x12   :  { %3272 = shalt.err (!%p3269_p7)
}
  0x13   :  { %39 = dma.hbm_to_vmem [thread:$0]  %s3626_s2, 160, %s37_s25, [#allocation5]  }
  0x14   :  { %s3273_s17 = scalar_lea.hbm %s3628_s4, 32 }
  0x15   :  { %p3274_p8 = scmp.ne.s32.totalorder %s3628_s4, %s3273_s17  ;;  %p3277_p9 = scmp.lt.u32.totalorder %s3273_s17, %s3628_s4 }
  0x17   :  { %p3279_p10 = pnand %p3277_p9, %p3274_p8 }
  0x19   :  { %3282 = shalt.err (!%p3279_p10)
}
  0x1a   :  { %s3283_s22 = scalar_lea.vmem %s59_s27, 32  ;;  %p3288_p12 = scmp.lt.s32.totalorder %s59_s27, %s59_s27 }
  0x1b   :  { %p3284_p11 = scmp.ne.s32.totalorder %s59_s27, %s3283_s22  ;;  %p3289_p13 = scmp.lt.s32.totalorder %s3283_s22, %s3283_s22 }
  0x1d   :  { %p3290_p0 = por %p3289_p13, %p3288_p12 }
  0x1f   :  { %p3291_p1 = pnand %p3290_p0, %p3284_p11 }
  0x21   :  { %3294 = shalt.err (!%p3291_p1)
}
  0x22   :  { %61 = dma.hbm_to_vmem [thread:$0]  %s3628_s4, 32, %s59_s27, [#allocation8]  }
  0x23   :  { %s3393_s24 = smov [#allocation2]   ;;  %s3295_s29 = scalar_lea.hbm %s3625_s1, 71680 }
  0x24   :  { %s23_s25 = sshll.u32 %s3393_s24, 4  ;;  %p3296_p2 = scmp.ne.s32.totalorder %s3625_s1, %s3295_s29  ;;  %s24_s25 = int_to_ptr.vmem [resolvable:$true] %s23_s25 }
  0x25   :  { %p3299_p3 = scmp.lt.u32.totalorder %s3295_s29, %s3625_s1 }
  0x27   :  { %p3301_p4 = pnand %p3299_p3, %p3296_p2 }
  0x29   :  { %3304 = shalt.err (!%p3301_p4)
}
  0x2a   :  { %s3305_s11 = scalar_lea.vmem %s24_s25, 71680  ;;  %p3310_p6 = scmp.lt.s32.totalorder %s24_s25, %s24_s25 }
  0x2b   :  { %p3306_p5 = scmp.ne.s32.totalorder %s24_s25, %s3305_s11  ;;  %p3311_p7 = scmp.lt.s32.totalorder %s3305_s11, %s3305_s11 }
  0x2d   :  { %p3312_p8 = por %p3311_p7, %p3310_p6 }
  0x2f   :  { %p3313_p9 = pnand %p3312_p8, %p3306_p5 }
  0x31   :  { %3316 = shalt.err (!%p3313_p9)
}
  0x32   :  { %s3394_s4 = smov 1280   ;;  %s3395_s27 = smov 80  }
  0x33   :  { %29 = dma.hbm_to_vmem [thread:$0]  %s3625_s1, 71680, %s24_s25, [#allocation3], %s3394_s4, %s3394_s4, %s3395_s27  }
  0x34   :  { %s3396_s14 = smov [#allocation6]   ;;  %s3317_s18 = scalar_lea.hbm %s3627_s3, 40960 }
  0x35   :  { %s45_s15 = sshll.u32 %s3396_s14, 4  ;;  %p3318_p10 = scmp.ne.s32.totalorder %s3627_s3, %s3317_s18  ;;  %s46_s15 = int_to_ptr.vmem [resolvable:$true] %s45_s15 }
  0x36   :  { %p3321_p11 = scmp.lt.u32.totalorder %s3317_s18, %s3627_s3 }
  0x38   :  { %p3323_p12 = pnand %p3321_p11, %p3318_p10 }
  0x3a   :  { %3326 = shalt.err (!%p3323_p12)
}
  0x3b   :  { %s3327_s2 = scalar_lea.vmem %s46_s15, 40960  ;;  %p3332_p0 = scmp.lt.s32.totalorder %s46_s15, %s46_s15 }
  0x3c   :  { %p3328_p13 = scmp.ne.s32.totalorder %s46_s15, %s3327_s2  ;;  %p3333_p1 = scmp.lt.s32.totalorder %s3327_s2, %s3327_s2 }
  0x3e   :  { %p3334_p2 = por %p3333_p1, %p3332_p0 }
  0x40   :  { %p3335_p3 = pnand %p3334_p2, %p3328_p13 }
  0x42   :  { %3338 = shalt.err (!%p3335_p3)
}
  0x43   :  { %s3397_s1 = smov 256   ;;  %s3398_s23 = smov 16  }
  0x44   :  { %51 = dma.hbm_to_vmem [thread:$0]  %s3627_s3, 40960, %s46_s15, [#allocation5], %s3397_s1, %s3397_s1, %s3398_s23  }
  0x45   :  { %s3399_s26 = smov [#allocation9]   ;;  %s3339_s8 = scalar_lea.hbm %s3629_s5, 4096 }
  0x46   :  { %s67_s28 = sshll.u32 %s3399_s26, 4  ;;  %p3340_p4 = scmp.ne.s32.totalorder %s3629_s5, %s3339_s8  ;;  %s68_s28 = int_to_ptr.vmem [resolvable:$true] %s67_s28 }
  0x47   :  { %p3343_p5 = scmp.lt.u32.totalorder %s3339_s8, %s3629_s5 }
  0x49   :  { %p3345_p6 = pnand %p3343_p5, %p3340_p4 }
  0x4b   :  { %3348 = shalt.err (!%p3345_p6)
}
  0x4c   :  { %s3349_s27 = scalar_lea.vmem %s68_s28, 4096  ;;  %p3354_p8 = scmp.lt.s32.totalorder %s68_s28, %s68_s28 }
  0x4d   :  { %p3350_p7 = scmp.ne.s32.totalorder %s68_s28, %s3349_s27  ;;  %p3355_p9 = scmp.lt.s32.totalorder %s3349_s27, %s3349_s27 }
  0x4f   :  { %p3356_p10 = por %p3355_p9, %p3354_p8 }
  0x51   :  { %p3357_p11 = pnand %p3356_p10, %p3350_p7 }
  0x53   :  { %3360 = shalt.err (!%p3357_p11)
}
  0x54   :  { %s3400_s3 = smov 128   ;;  %s3401_s12 = smov 8  }
  0x55   :  { %73 = dma.hbm_to_vmem [thread:$0]  %s3629_s5, 4096, %s68_s28, [#allocation8], %s3400_s3, %s3400_s3, %s3401_s12  }
  0x56   :  { %s3402_s15 = smov [#allocation10]   ;;  %s3361_s19 = scalar_lea.hbm %s3630_s6, 16 }
  0x57   :  { %s80_s16 = sshll.u32 %s3402_s15, 4  ;;  %p3362_p12 = scmp.ne.s32.totalorder %s3630_s6, %s3361_s19  ;;  %s81_s16 = int_to_ptr.vmem [resolvable:$true] %s80_s16 }
  0x58   :  { %p3365_p13 = scmp.lt.u32.totalorder %s3361_s19, %s3630_s6 }
  0x5a   :  { %p3367_p0 = pnand %p3365_p13, %p3362_p12 }
  0x5c   :  { %3370 = shalt.err (!%p3367_p0)
}
  0x5d   :  { %s3371_s1 = scalar_lea.vmem %s81_s16, 16  ;;  %s3375_s5 = scalar_lea.vmem %s81_s16, 32 }
  0x5e   :  { %p3372_p1 = scmp.ne.s32.totalorder %s81_s16, %s3371_s1  ;;  %p3376_p2 = scmp.lt.s32.totalorder %s81_s16, %s81_s16 }
  0x5f   :  { %p3377_p3 = scmp.lt.s32.totalorder %s3375_s5, %s3371_s1 }
  0x61   :  { %p3378_p4 = por %p3377_p3, %p3376_p2 }
  0x63   :  { %p3379_p5 = pnand %p3378_p4, %p3372_p1 }
  0x65   :  { %3382 = shalt.err (!%p3379_p5)
}
  0x66   :  { %83 = dma.hbm_to_vmem [thread:$0]  %s3630_s6, 16, %s81_s16, [#allocation11]  }
  0x67   :  { %3383 = dma.done.wait [#allocation3], 71680  }
  0x68   :  { %3384 = vsyncadd [#allocation3], 4294895616 }
  0x69   :  { %3385 = dma.done.wait [#allocation5], 41120  }
  0x6a   :  { %3386 = vsyncadd [#allocation5], 4294926176 }
  0x6b   :  { %3387 = dma.done.wait [#allocation8], 4128  }
  0x6c   :  { %3388 = vsyncadd [#allocation8], 4294963168 }
  0x6d   :  { %3389 = dma.done.wait [#allocation11], 16  }
  0x6e   :  { %3390 = vsyncadd [#allocation11], 4294967280  ;;  %v107_v0 = vld [vmem:[#allocation2 + $0x8] sm:$0xff]  ;;  %v117_v1 = vld [vmem:[#allocation2 + $0x58] sm:$0xff]  ;;  %vm720_vm0 = vcmask 523264  }
  0x6f   :  { %v106_v2 = vld [vmem:[#allocation2] sm:$0xff]  ;;  %v2292_v3 = vpack.c.bf16 %v117_v1, %v107_v0  ;;  %v116_v4 = vld [vmem:[#allocation2 + $0x50] sm:$0xff]  ;;  %v127_v5 = vld [vmem:[#allocation2 + $0xa8] sm:$0xff] }
  0x70   :  { %v137_v6 = vld [vmem:[#allocation2 + $0xf8] sm:$0xff]  ;;  %v2294_v7 = vpack.c.bf16 %v116_v4, %v106_v2  ;;  %v126_v9 = vld [vmem:[#allocation2 + $0xa0] sm:$0xff]  ;;  %v136_v10 = vld [vmem:[#allocation2 + $0xf0] sm:$0xff] }
  0x71   :  { %v2296_v8 = vpack.c.bf16 %v137_v6, %v127_v5  ;;  %v147_v11 = vld [vmem:[#allocation2 + $0x148] sm:$0xff]  ;;  %2293 = vmatprep.subr.bf16.mxu0 %v2292_v3  ;;  %v157_v12 = vld [vmem:[#allocation2 + $0x198] sm:$0xff]  ;;  %v2298_v13 = vpack.c.bf16 %v136_v10, %v126_v9  ;;  %v146_v15 = vld [vmem:[#allocation2 + $0x140] sm:$0xff] }
  0x72   :  { %2295 = vmatpush1.bf16.msra.mxu0 %v2294_v7  ;;  %v2300_v14 = vpack.c.bf16 %v157_v12, %v147_v11  ;;  %v156_v16 = vld [vmem:[#allocation2 + $0x190] sm:$0xff]  ;;  %v167_v17 = vld [vmem:[#allocation2 + $0x1e8] sm:$0xff]  ;;  %v177_v18 = vld [vmem:[#allocation2 + $0x238] sm:$0xff] }
  0x73   :  { %2297 = vmatprep.subr.bf16.mxu0 %v2296_v8  ;;  %v2302_v19 = vpack.c.bf16 %v156_v16, %v146_v15  ;;  %v2304_v20 = vpack.c.bf16 %v177_v18, %v167_v17  ;;  %v166_v21 = vld [vmem:[#allocation2 + $0x1e0] sm:$0xff]  ;;  %v176_v22 = vld [vmem:[#allocation2 + $0x230] sm:$0xff]  ;;  %v187_v23 = vld [vmem:[#allocation2 + $0x288] sm:$0xff] }
  0x74   :  { %v197_v24 = vld [vmem:[#allocation2 + $0x2d8] sm:$0xff]  ;;  %v2306_v25 = vpack.c.bf16 %v176_v22, %v166_v21  ;;  %v186_v27 = vld [vmem:[#allocation2 + $0x280] sm:$0xff]  ;;  %v196_v28 = vld [vmem:[#allocation2 + $0x2d0] sm:$0xff] }
  0x75   :  { %v2308_v26 = vpack.c.bf16 %v197_v24, %v187_v23  ;;  %v207_v29 = vld [vmem:[#allocation2 + $0x328] sm:$0xff]  ;;  %v217_v30 = vld [vmem:[#allocation2 + $0x378] sm:$0xff]  ;;  %v2310_v31 = vpack.c.bf16 %v196_v28, %v186_v27  ;;  %v206_v33 = vld [vmem:[#allocation2 + $0x320] sm:$0xff] }
  0x76   :  { %2299 = vmatpush1.bf16.msra.mxu0 %v2298_v13  ;;  %v2312_v32 = vpack.c.bf16 %v217_v30, %v207_v29  ;;  %v216_v34 = vld [vmem:[#allocation2 + $0x370] sm:$0xff]  ;;  %v227_v35 = vld [vmem:[#allocation2 + $0x3c8] sm:$0xff]  ;;  %v237_v36 = vld [vmem:[#allocation2 + $0x418] sm:$0xff] }
  0x77   :  { %2301 = vmatprep.subr.bf16.mxu0 %v2300_v14  ;;  %v2314_v37 = vpack.c.bf16 %v216_v34, %v206_v33  ;;  %v2316_v38 = vpack.c.bf16 %v237_v36, %v227_v35  ;;  %v226_v39 = vld [vmem:[#allocation2 + $0x3c0] sm:$0xff]  ;;  %v236_v40 = vld [vmem:[#allocation2 + $0x410] sm:$0xff]  ;;  %v3518_v41 = vld [vmem:[%s3624_s0 + $0x8] sm:$0xff] }
  0x78   :  { %v247_v42 = vld [vmem:[#allocation2 + $0x468] sm:$0xff]  ;;  %v257_v43 = vld [vmem:[#allocation2 + $0x4b8] sm:$0xff]  ;;  %788 = vmatprep.mubr.f32.mxu0 %v3518_v41  ;;  %v2318_v44 = vpack.c.bf16 %v236_v40, %v226_v39  ;;  %v246_v46 = vld [vmem:[#allocation2 + $0x460] sm:$0xff] }
  0x79   :  { %v2320_v45 = vpack.c.bf16 %v257_v43, %v247_v42  ;;  %v256_v47 = vld [vmem:[#allocation2 + $0x4b0] sm:$0xff]  ;;  %v267_v48 = vld [vmem:[#allocation2 + $0x508] sm:$0xff]  ;;  %v277_v49 = vld [vmem:[#allocation2 + $0x558] sm:$0xff] }
  0x7a   :  { %2303 = vmatpush1.bf16.msra.mxu0 %v2302_v19  ;;  %v2322_v50 = vpack.c.bf16 %v256_v47, %v246_v46  ;;  %v2324_v51 = vpack.c.bf16 %v277_v49, %v267_v48  ;;  %v266_v52 = vld [vmem:[#allocation2 + $0x500] sm:$0xff]  ;;  %v276_v53 = vld [vmem:[#allocation2 + $0x550] sm:$0xff]  ;;  %v287_v54 = vld [vmem:[#allocation2 + $0x5a8] sm:$0xff] }
  0x7b   :  { %2305 = vmatprep.subr.bf16.mxu0 %v2304_v20  ;;  %v297_v55 = vld [vmem:[#allocation2 + $0x5f8] sm:$0xff]  ;;  %v2326_v56 = vpack.c.bf16 %v276_v53, %v266_v52  ;;  %v286_v58 = vld [vmem:[#allocation2 + $0x5a0] sm:$0xff]  ;;  %v296_v59 = vld [vmem:[#allocation2 + $0x5f0] sm:$0xff] }
  0x7c   :  { %v2328_v57 = vpack.c.bf16 %v297_v55, %v287_v54  ;;  %v307_v60 = vld [vmem:[#allocation2 + $0x648] sm:$0xff]  ;;  %v317_v61 = vld [vmem:[#allocation2 + $0x698] sm:$0xff]  ;;  %v2330_v62 = vpack.c.bf16 %v296_v59, %v286_v58  ;;  %v306_v63 = vld [vmem:[#allocation2 + $0x640] sm:$0xff] }
  0x7d   :  { %v316_v0 = vld [vmem:[#allocation2 + $0x690] sm:$0xff]  ;;  %v429_v1 = vld [vmem:[#allocation2 + $0xa18] sm:$0xff]  ;;  %v2332_v2 = vpack.c.bf16 %v317_v61, %v307_v60  ;;  %v439_v3 = vld [vmem:[#allocation2 + $0xa68] sm:$0xff] }
  0x7e   :  { %2307 = vmatpush1.bf16.msra.mxu0 %v2306_v25  ;;  %v428_v4 = vld [vmem:[#allocation2 + $0xa10] sm:$0xff]  ;;  %v438_v5 = vld [vmem:[#allocation2 + $0xa60] sm:$0xff]  ;;  %v327_v6 = vld [vmem:[#allocation2 + $0x6e8] sm:$0xff]  ;;  %v2468_v8 = vpack.c.bf16 %v439_v3, %v429_v1  ;;  %v2334_v12 = vpack.c.bf16 %v316_v0, %v306_v63 }
  0x7f   :  { %2309 = vmatprep.subr.bf16.mxu0 %v2308_v26  ;;  %v337_v7 = vld [vmem:[#allocation2 + $0x738] sm:$0xff]  ;;  %v2470_v9 = vpack.c.bf16 %v438_v5, %v428_v4  ;;  %v459_v11 = vld [vmem:[#allocation2 + $0xb08] sm:$0xff]  ;;  %v448_v14 = vld [vmem:[#allocation2 + $0xab0] sm:$0xff] }
  0x80   :  { %v449_v10 = vld [vmem:[#allocation2 + $0xab8] sm:$0xff]  ;;  %2469 = vmatprep.subr.bf16.mxu1 %v2468_v8  ;;  %v458_v15 = vld [vmem:[#allocation2 + $0xb00] sm:$0xff]  ;;  %v2336_v16 = vpack.c.bf16 %v337_v7, %v327_v6  ;;  %v336_v18 = vld [vmem:[#allocation2 + $0x730] sm:$0xff] }
  0x81   :  { %v2472_v13 = vpack.c.bf16 %v459_v11, %v449_v10  ;;  %v326_v17 = vld [vmem:[#allocation2 + $0x6e0] sm:$0xff]  ;;  %2471 = vmatpush1.bf16.msra.mxu1 %v2470_v9  ;;  %v2474_v19 = vpack.c.bf16 %v458_v15, %v448_v14  ;;  %v3524_v20 = vld [vmem:[%s3624_s0 + $0x18] sm:$0xff]  ;;  %v347_v21 = vld [vmem:[#allocation2 + $0x788] sm:$0xff] }
  0x82   :  { %2311 = vmatpush1.bf16.msra.mxu0 %v2310_v31  ;;  %v357_v22 = vld [vmem:[#allocation2 + $0x7d8] sm:$0xff]  ;;  %2252 = vmatprep.mubr.msk.f32.mxu1 %vm720_vm0, %v3524_v20  ;;  %v479_v24 = vld [vmem:[#allocation2 + $0xba8] sm:$0xff]  ;;  %v468_v25 = vld [vmem:[#allocation2 + $0xb50] sm:$0xff]  ;;  %v2338_v27 = vpack.c.bf16 %v336_v18, %v326_v17 }
  0x83   :  { %2313 = vmatprep.subr.bf16.mxu0 %v2312_v32  ;;  %2473 = vmatprep.subr.bf16.mxu1 %v2472_v13  ;;  %v469_v23 = vld [vmem:[#allocation2 + $0xb58] sm:$0xff]  ;;  %v478_v26 = vld [vmem:[#allocation2 + $0xba0] sm:$0xff]  ;;  %v356_v29 = vld [vmem:[#allocation2 + $0x7d0] sm:$0xff]  ;;  %v2340_v31 = vpack.c.bf16 %v357_v22, %v347_v21 }
  0x84   :  { %v346_v28 = vld [vmem:[#allocation2 + $0x780] sm:$0xff]  ;;  %v2476_v30 = vpack.c.bf16 %v479_v24, %v469_v23  ;;  %v367_v32 = vld [vmem:[#allocation2 + $0x828] sm:$0xff]  ;;  %v2478_v33 = vpack.c.bf16 %v478_v26, %v468_v25  ;;  %v489_v34 = vld [vmem:[#allocation2 + $0xbf8] sm:$0xff] }
  0x85   :  { %2475 = vmatpush1.bf16.msra.mxu1 %v2474_v19  ;;  %v499_v35 = vld [vmem:[#allocation2 + $0xc48] sm:$0xff]  ;;  %v377_v36 = vld [vmem:[#allocation2 + $0x878] sm:$0xff]  ;;  %v498_v39 = vld [vmem:[#allocation2 + $0xc40] sm:$0xff]  ;;  %v2342_v40 = vpack.c.bf16 %v356_v29, %v346_v28 }
  0x86   :  { %2315 = vmatpush1.bf16.msra.mxu0 %v2314_v37  ;;  %2477 = vmatprep.subr.bf16.mxu1 %v2476_v30  ;;  %v2480_v37 = vpack.c.bf16 %v499_v35, %v489_v34  ;;  %v509_v42 = vld [vmem:[#allocation2 + $0xc98] sm:$0xff]  ;;  %v519_v43 = vld [vmem:[#allocation2 + $0xce8] sm:$0xff]  ;;  %v376_v46 = vld [vmem:[#allocation2 + $0x870] sm:$0xff] }
  0x87   :  { %2317 = vmatprep.subr.bf16.mxu0 %v2316_v38  ;;  %v488_v38 = vld [vmem:[#allocation2 + $0xbf0] sm:$0xff]  ;;  %v387_v47 = vld [vmem:[#allocation2 + $0x8c8] sm:$0xff]  ;;  %v397_v49 = vld [vmem:[#allocation2 + $0x918] sm:$0xff] }
  0x88   :  { %v2482_v48 = vpack.c.bf16 %v498_v39, %v488_v38  ;;  %v518_v52 = vld [vmem:[#allocation2 + $0xce0] sm:$0xff]  ;;  %v529_v53 = vld [vmem:[#allocation2 + $0xd38] sm:$0xff]  ;;  %v539_v54 = vld [vmem:[#allocation2 + $0xd88] sm:$0xff] }
  0x89   :  { %2479 = vmatpush1.bf16.msra.mxu1 %v2478_v33  ;;  %v396_v58 = vld [vmem:[#allocation2 + $0x910] sm:$0xff]  ;;  %v407_v59 = vld [vmem:[#allocation2 + $0x968] sm:$0xff]  ;;  %v417_v61 = vld [vmem:[#allocation2 + $0x9b8] sm:$0xff] }
  0x8a   :  { %2319 = vmatpush1.bf16.msra.mxu0 %v2318_v44  ;;  %v2344_v44 = vpack.c.bf16 %v377_v36, %v367_v32  ;;  %2481 = vmatprep.subr.bf16.mxu1 %v2480_v37  ;;  %v528_v63 = vld [vmem:[#allocation2 + $0xd30] sm:$0xff]  ;;  %v538_v0 = vld [vmem:[#allocation2 + $0xd80] sm:$0xff]  ;;  %v549_v1 = vld [vmem:[#allocation2 + $0xdd8] sm:$0xff]  ;;  %v2352_v4 = vpack.c.bf16 %v417_v61, %v407_v59 }
  0x8b   :  { %2321 = vmatprep.subr.bf16.mxu0 %v2320_v45  ;;  %v366_v45 = vld [vmem:[#allocation2 + $0x820] sm:$0xff]  ;;  %v416_v6 = vld [vmem:[#allocation2 + $0x9b0] sm:$0xff]  ;;  %v427_v7 = vld [vmem:[#allocation2 + $0xa08] sm:$0xff]  ;;  %v2490_v8 = vpack.c.bf16 %v538_v0, %v528_v63 }
  0x8c   :  { %v2346_v55 = vpack.c.bf16 %v376_v46, %v366_v45  ;;  %v406_v5 = vld [vmem:[#allocation2 + $0x960] sm:$0xff]  ;;  %v437_v9 = vld [vmem:[#allocation2 + $0xa58] sm:$0xff]  ;;  %v548_v11 = vld [vmem:[#allocation2 + $0xdd0] sm:$0xff] }
  0x8d   :  { %2483 = vmatpush1.bf16.msra.mxu1 %v2482_v48  ;;  %v569_v13 = vld [vmem:[#allocation2 + $0xe78] sm:$0xff]  ;;  %v579_v14 = vld [vmem:[#allocation2 + $0xec8] sm:$0xff]  ;;  %v2354_v15 = vpack.c.bf16 %v416_v6, %v406_v5  ;;  %v426_v17 = vld [vmem:[#allocation2 + $0xa00] sm:$0xff] }
  0x8e   :  { %2323 = vmatpush1.bf16.msra.mxu0 %v2322_v50  ;;  %v2484_v50 = vpack.c.bf16 %v519_v43, %v509_v42  ;;  %v436_v18 = vld [vmem:[#allocation2 + $0xa50] sm:$0xff]  ;;  %v447_v19 = vld [vmem:[#allocation2 + $0xaa8] sm:$0xff]  ;;  %v457_v22 = vld [vmem:[#allocation2 + $0xaf8] sm:$0xff]  ;;  %v2496_v23 = vpack.c.bf16 %v579_v14, %v569_v13 }
  0x8f   :  { %2325 = vmatprep.subr.bf16.mxu0 %v2324_v51  ;;  %v508_v51 = vld [vmem:[#allocation2 + $0xc90] sm:$0xff]  ;;  %v578_v25 = vld [vmem:[#allocation2 + $0xec0] sm:$0xff]  ;;  %v589_v26 = vld [vmem:[#allocation2 + $0xf18] sm:$0xff]  ;;  %v2358_v29 = vpack.c.bf16 %v436_v18, %v426_v17  ;;  %v2360_v30 = vpack.c.bf16 %v457_v22, %v447_v19 }
  0x90   :  { %v2486_v60 = vpack.c.bf16 %v518_v52, %v508_v51  ;;  %2485 = vmatprep.subr.bf16.mxu1 %v2484_v50  ;;  %v568_v24 = vld [vmem:[#allocation2 + $0xe70] sm:$0xff]  ;;  %v3531_v28 = vld [vmem:[%s3624_s0] sm:$0xff]  ;;  %v467_v33 = vld [vmem:[#allocation2 + $0xb48] sm:$0xff] }
  0x91   :  { %v456_v32 = vld [vmem:[#allocation2 + $0xaf0] sm:$0xff]  ;;  %v2498_v34 = vpack.c.bf16 %v578_v25, %v568_v24  ;;  %v477_v35 = vld [vmem:[#allocation2 + $0xb98] sm:$0xff]  ;;  %v598_v38 = vld [vmem:[#allocation2 + $0xf60] sm:$0xff] }
  0x92   :  { %2327 = vmatpush1.bf16.msra.mxu0 %v2326_v56  ;;  %v2348_v56 = vpack.c.bf16 %v397_v49, %v387_v47  ;;  %2487 = vmatpush1.bf16.msra.mxu1 %v2486_v60  ;;  %v588_v37 = vld [vmem:[#allocation2 + $0xf10] sm:$0xff]  ;;  %v609_v39 = vld [vmem:[#allocation2 + $0xfb8] sm:$0xff]  ;;  %v2364_v43 = vpack.c.bf16 %v477_v35, %v467_v33  ;;  %v487_v46 = vld [vmem:[#allocation2 + $0xbe8] sm:$0xff] }
  0x93   :  { %2329 = vmatprep.subr.bf16.mxu0 %v2328_v57  ;;  %v386_v57 = vld [vmem:[#allocation2 + $0x8c0] sm:$0xff]  ;;  %v476_v45 = vld [vmem:[#allocation2 + $0xb90] sm:$0xff]  ;;  %v2502_v47 = vpack.c.bf16 %v598_v38, %v588_v37  ;;  %v497_v48 = vld [vmem:[#allocation2 + $0xc38] sm:$0xff] }
  0x94   :  { %v2350_v3 = vpack.c.bf16 %v396_v58, %v386_v57  ;;  %v608_v50 = vld [vmem:[#allocation2 + $0xfb0] sm:$0xff]  ;;  %v618_v51 = vld [vmem:[#allocation2 + $0x1000] sm:$0xff]  ;;  %v629_v52 = vld [vmem:[#allocation2 + $0x1058] sm:$0xff] }
  0x95   :  { %v496_v57 = vld [vmem:[#allocation2 + $0xc30] sm:$0xff]  ;;  %v507_v58 = vld [vmem:[#allocation2 + $0xc88] sm:$0xff]  ;;  %v2506_v59 = vpack.c.bf16 %v618_v51, %v608_v50  ;;  %v517_v60 = vld [vmem:[#allocation2 + $0xcd8] sm:$0xff] }
  0x96   :  { %2331 = vmatpush1.bf16.msra.mxu0 %v2330_v62  ;;  %v2488_v62 = vpack.c.bf16 %v539_v54, %v529_v53  ;;  %v639_v53 = vld [vmem:[#allocation2 + $0x10a8] sm:$0xff]  ;;  %v638_v63 = vld [vmem:[#allocation2 + $0x10a0] sm:$0xff]  ;;  %v649_v0 = vld [vmem:[#allocation2 + $0x10f8] sm:$0xff] }
  0x97   :  { %2333 = vmatprep.subr.bf16.mxu0 %v2332_v2  ;;  %v559_v2 = vld [vmem:[#allocation2 + $0xe28] sm:$0xff]  ;;  %v2508_v61 = vpack.c.bf16 %v639_v53, %v629_v52  ;;  %v516_v5 = vld [vmem:[#allocation2 + $0xcd0] sm:$0xff]  ;;  %v122_v24 = vld [vmem:[#allocation2 + $0x80] sm:$0xff] }
  0x98   :  { %2489 = vmatprep.subr.bf16.mxu1 %v2488_v62  ;;  %v2492_v10 = vpack.c.bf16 %v559_v2, %v549_v1  ;;  %v628_v62 = vld [vmem:[#allocation2 + $0x1050] sm:$0xff]  ;;  %v659_v1 = vld [vmem:[#allocation2 + $0x1148] sm:$0xff]  ;;  %v133_v25 = vld [vmem:[#allocation2 + $0xd8] sm:$0xff] }
  0x99   :  { %2491 = vmatpush1.bf16.msra.mxu1 %v2490_v8  ;;  %v527_v6 = vld [vmem:[#allocation2 + $0xd28] sm:$0xff]  ;;  %v537_v8 = vld [vmem:[#allocation2 + $0xd78] sm:$0xff]  ;;  %v536_v17 = vld [vmem:[#allocation2 + $0xd70] sm:$0xff] }
  0x9a   :  { %2335 = vmatpush1.bf16.msra.mxu0 %v2334_v12  ;;  %v558_v12 = vld [vmem:[#allocation2 + $0xe20] sm:$0xff]  ;;  %2493 = vmatprep.subr.bf16.mxu1 %v2492_v10  ;;  %v648_v10 = vld [vmem:[#allocation2 + $0x10f0] sm:$0xff]  ;;  %v123_v13 = vld [vmem:[#allocation2 + $0x88] sm:$0xff] }
  0x9b   :  { %2337 = vmatprep.subr.bf16.mxu0 %v2336_v16  ;;  %v2356_v16 = vpack.c.bf16 %v437_v9, %v427_v7  ;;  %v2494_v21 = vpack.c.bf16 %v558_v12, %v548_v11  ;;  %v2510_v7 = vpack.c.bf16 %v638_v63, %v628_v62  ;;  %v2512_v9 = vpack.c.bf16 %v659_v1, %v649_v0  ;;  %v658_v11 = vld [vmem:[#allocation2 + $0x1140] sm:$0xff]  ;;  %v113_v12 = vld [vmem:[#allocation2 + $0x38] sm:$0xff]  ;;  %v547_v18 = vld [vmem:[#allocation2 + $0xdc8] sm:$0xff] }
  0x9c   :  { %v2514_v19 = vpack.c.bf16 %v658_v11, %v648_v10  ;;  %v2628_v22 = vpack.c.bf16 %v123_v13, %v113_v12  ;;  %v142_v37 = vld [vmem:[#allocation2 + $0x120] sm:$0xff]  ;;  %v3539_v38 = vld [vmem:[%s3624_s0 + $0x10] sm:$0xff]  ;;  %v173_v52 = vld [vmem:[#allocation2 + $0x218] sm:$0xff] }
  0x9d   :  { %2495 = vmatpush1.bf16.msra.mxu1 %v2494_v21  ;;  %v557_v21 = vld [vmem:[#allocation2 + $0xe18] sm:$0xff]  ;;  %v152_v50 = vld [vmem:[#allocation2 + $0x170] sm:$0xff]  ;;  %v162_v51 = vld [vmem:[#allocation2 + $0x1c0] sm:$0xff] }
  0x9e   :  { %2339 = vmatpush1.bf16.msra.mxu0 %v2338_v27  ;;  %v599_v27 = vld [vmem:[#allocation2 + $0xf68] sm:$0xff]  ;;  %2497 = vmatprep.subr.bf16.mxu1 %v2496_v23  ;;  %v112_v23 = vld [vmem:[#allocation2 + $0x30] sm:$0xff]  ;;  %v182_v63 = vld [vmem:[#allocation2 + $0x260] sm:$0xff] }
  0x9f   :  { %2341 = vmatprep.subr.bf16.mxu0 %v2340_v31  ;;  %v446_v31 = vld [vmem:[#allocation2 + $0xaa0] sm:$0xff]  ;;  %v2500_v36 = vpack.c.bf16 %v599_v27, %v589_v26  ;;  %v143_v26 = vld [vmem:[#allocation2 + $0x128] sm:$0xff]  ;;  %v2630_v33 = vpack.c.bf16 %v122_v24, %v112_v23  ;;  %v172_v62 = vld [vmem:[#allocation2 + $0x210] sm:$0xff] }
  0xa0   :  { %v2362_v42 = vpack.c.bf16 %v456_v32, %v446_v31  ;;  %v556_v31 = vld [vmem:[#allocation2 + $0xe10] sm:$0xff]  ;;  %v567_v32 = vld [vmem:[#allocation2 + $0xe68] sm:$0xff]  ;;  %v2632_v35 = vpack.c.bf16 %v143_v26, %v133_v25  ;;  %v193_v0 = vld [vmem:[#allocation2 + $0x2b8] sm:$0xff] }
  0xa1   :  { %2499 = vmatpush1.bf16.msra.mxu1 %v2498_v34  ;;  %v577_v34 = vld [vmem:[#allocation2 + $0xeb8] sm:$0xff]  ;;  %v183_v53 = vld [vmem:[#allocation2 + $0x268] sm:$0xff]  ;;  %v192_v10 = vld [vmem:[#allocation2 + $0x2b0] sm:$0xff] }
  0xa2   :  { %2343 = vmatpush1.bf16.msra.mxu0 %v2342_v40  ;;  %v619_v40 = vld [vmem:[#allocation2 + $0x1008] sm:$0xff]  ;;  %2501 = vmatprep.subr.bf16.mxu1 %v2500_v36  ;;  %v132_v36 = vld [vmem:[#allocation2 + $0xd0] sm:$0xff]  ;;  %v202_v11 = vld [vmem:[#allocation2 + $0x300] sm:$0xff] }
  0xa3   :  { %2345 = vmatprep.subr.bf16.mxu0 %v2344_v44  ;;  %v466_v44 = vld [vmem:[#allocation2 + $0xb40] sm:$0xff]  ;;  %v2504_v49 = vpack.c.bf16 %v619_v40, %v609_v39  ;;  %v153_v39 = vld [vmem:[#allocation2 + $0x178] sm:$0xff]  ;;  %v163_v40 = vld [vmem:[#allocation2 + $0x1c8] sm:$0xff] }
  0xa4   :  { %v2366_v54 = vpack.c.bf16 %v476_v45, %v466_v44  ;;  %v566_v44 = vld [vmem:[#allocation2 + $0xe60] sm:$0xff]  ;;  %v576_v45 = vld [vmem:[#allocation2 + $0xeb0] sm:$0xff]  ;;  %v203_v1 = vld [vmem:[#allocation2 + $0x308] sm:$0xff] }
  0xa5   :  { %2503 = vmatpush1.bf16.msra.mxu1 %v2502_v47  ;;  %v2634_v47 = vpack.c.bf16 %v142_v37, %v132_v36  ;;  %v213_v12 = vld [vmem:[#allocation2 + $0x358] sm:$0xff]  ;;  %v223_v13 = vld [vmem:[#allocation2 + $0x3a8] sm:$0xff]  ;;  %v212_v23 = vld [vmem:[#allocation2 + $0x350] sm:$0xff] }
  0xa6   :  { %2347 = vmatpush1.bf16.msra.mxu0 %v2346_v55  ;;  %v2368_v55 = vpack.c.bf16 %v497_v48, %v487_v46  ;;  %2505 = vmatprep.subr.bf16.mxu1 %v2504_v49  ;;  %v587_v46 = vld [vmem:[#allocation2 + $0xf08] sm:$0xff]  ;;  %v597_v48 = vld [vmem:[#allocation2 + $0xf58] sm:$0xff]  ;;  %v2636_v49 = vpack.c.bf16 %v163_v40, %v153_v39  ;;  %v222_v24 = vld [vmem:[#allocation2 + $0x3a0] sm:$0xff] }
  0xa7   :  { %2349 = vmatprep.subr.bf16.mxu0 %v2348_v56  ;;  %v486_v56 = vld [vmem:[#allocation2 + $0xbe0] sm:$0xff]  ;;  %v233_v25 = vld [vmem:[#allocation2 + $0x3f8] sm:$0xff]  ;;  %v243_v26 = vld [vmem:[#allocation2 + $0x448] sm:$0xff] }
  0xa8   :  { %v2370_v2 = vpack.c.bf16 %v496_v57, %v486_v56  ;;  %v586_v56 = vld [vmem:[#allocation2 + $0xf00] sm:$0xff]  ;;  %v596_v57 = vld [vmem:[#allocation2 + $0xf50] sm:$0xff]  ;;  %v253_v39 = vld [vmem:[#allocation2 + $0x498] sm:$0xff] }
  0xa9   :  { %2507 = vmatpush1.bf16.msra.mxu1 %v2506_v59  ;;  %v2638_v59 = vpack.c.bf16 %v162_v51, %v152_v50  ;;  %v232_v36 = vld [vmem:[#allocation2 + $0x3f0] sm:$0xff]  ;;  %v242_v37 = vld [vmem:[#allocation2 + $0x440] sm:$0xff]  ;;  %v263_v40 = vld [vmem:[#allocation2 + $0x4e8] sm:$0xff] }
  0xaa   :  { %2351 = vmatpush1.bf16.msra.mxu0 %v2350_v3  ;;  %v2372_v3 = vpack.c.bf16 %v517_v60, %v507_v58  ;;  %2509 = vmatprep.subr.bf16.mxu1 %v2508_v61  ;;  %v607_v58 = vld [vmem:[#allocation2 + $0xfa8] sm:$0xff]  ;;  %v617_v60 = vld [vmem:[#allocation2 + $0xff8] sm:$0xff]  ;;  %v2640_v61 = vpack.c.bf16 %v183_v53, %v173_v52  ;;  %v252_v50 = vld [vmem:[#allocation2 + $0x490] sm:$0xff] }
  0xab   :  { %2353 = vmatprep.subr.bf16.mxu0 %v2352_v4  ;;  %v506_v4 = vld [vmem:[#allocation2 + $0xc80] sm:$0xff]  ;;  %v273_v52 = vld [vmem:[#allocation2 + $0x538] sm:$0xff]  ;;  %v283_v53 = vld [vmem:[#allocation2 + $0x588] sm:$0xff] }
  0xac   :  { %v2374_v14 = vpack.c.bf16 %v516_v5, %v506_v4  ;;  %v606_v4 = vld [vmem:[#allocation2 + $0xfa0] sm:$0xff]  ;;  %v616_v5 = vld [vmem:[#allocation2 + $0xff0] sm:$0xff] }
  0xad   :  { %2511 = vmatpush1.bf16.msra.mxu1 %v2510_v7  ;;  %v2642_v7 = vpack.c.bf16 %v182_v63, %v172_v62  ;;  %v262_v51 = vld [vmem:[#allocation2 + $0x4e0] sm:$0xff]  ;;  %v272_v62 = vld [vmem:[#allocation2 + $0x530] sm:$0xff] }
  0xae   :  { %2355 = vmatpush1.bf16.msra.mxu0 %v2354_v15  ;;  %v2376_v15 = vpack.c.bf16 %v537_v8, %v527_v6  ;;  %2513 = vmatprep.subr.bf16.mxu1 %v2512_v9  ;;  %v627_v6 = vld [vmem:[#allocation2 + $0x1048] sm:$0xff]  ;;  %v637_v8 = vld [vmem:[#allocation2 + $0x1098] sm:$0xff]  ;;  %v2644_v9 = vpack.c.bf16 %v203_v1, %v193_v0  ;;  %v282_v63 = vld [vmem:[#allocation2 + $0x580] sm:$0xff] }
  0xaf   :  { %2357 = vmatprep.subr.bf16.mxu0 %v2356_v16  ;;  %v526_v16 = vld [vmem:[#allocation2 + $0xd20] sm:$0xff]  ;;  %v293_v0 = vld [vmem:[#allocation2 + $0x5d8] sm:$0xff]  ;;  %v303_v1 = vld [vmem:[#allocation2 + $0x628] sm:$0xff] }
  0xb0   :  { %v2378_v27 = vpack.c.bf16 %v536_v17, %v526_v16  ;;  %v626_v16 = vld [vmem:[#allocation2 + $0x1040] sm:$0xff]  ;;  %v636_v17 = vld [vmem:[#allocation2 + $0x1090] sm:$0xff] }
  0xb1   :  { %789 = vmatmul.mubr.f32.vlgmr.msra.gmra.mrb[0].mxu0 %v3531_v28  ;;  %2515 = vmatpush1.bf16.msra.mxu1 %v2514_v19  ;;  %v2646_v19 = vpack.c.bf16 %v202_v11, %v192_v10  ;;  %v292_v10 = vld [vmem:[#allocation2 + $0x5d0] sm:$0xff]  ;;  %v302_v11 = vld [vmem:[#allocation2 + $0x620] sm:$0xff] }
  0xb2   :  { %2359 = vmatpush1.bf16.msra.mxu0 %v2358_v29  ;;  %2251 = vmatprep.mubr.msk.f32.mxu0 %vm720_vm0, %v3524_v20  ;;  %v2380_v29 = vpack.c.bf16 %v557_v21, %v547_v18  ;;  %v647_v18 = vld [vmem:[#allocation2 + $0x10e8] sm:$0xff]  ;;  %v657_v21 = vld [vmem:[#allocation2 + $0x1138] sm:$0xff] }
  0xb3   :  { %2361 = vmatprep.subr.bf16.mxu0 %v2360_v30  ;;  %v546_v30 = vld [vmem:[#allocation2 + $0xdc0] sm:$0xff]  ;;  %2629 = vmatprep.subr.bf16.mxu1 %v2628_v22  ;;  %v2648_v22 = vpack.c.bf16 %v223_v13, %v213_v12  ;;  %v313_v12 = vld [vmem:[#allocation2 + $0x678] sm:$0xff]  ;;  %v323_v13 = vld [vmem:[#allocation2 + $0x6c8] sm:$0xff] }
  0xb4   :  { %1002 = vmatmul.mubr.f32.vlgmr.msra.gmra.mrb[0].mxu1 %v3539_v38 }
  0xb5   :  { %2631 = vmatpush1.bf16.msra.mxu1 %v2630_v33  ;;  %1214 = vmatprep.mubr.f32.mxu1 %v3518_v41  ;;  %v2650_v33 = vpack.c.bf16 %v222_v24, %v212_v23  ;;  %v322_v23 = vld [vmem:[#allocation2 + $0x6c0] sm:$0xff]  ;;  %v333_v24 = vld [vmem:[#allocation2 + $0x718] sm:$0xff] }
  0xb6   :  { %2363 = vmatpush1.bf16.msra.mxu0 %v2362_v42  ;;  %v2382_v42 = vpack.c.bf16 %v556_v31, %v546_v30  ;;  %2633 = vmatprep.subr.bf16.mxu1 %v2632_v35  ;;  %v646_v30 = vld [vmem:[#allocation2 + $0x10e0] sm:$0xff]  ;;  %v656_v31 = vld [vmem:[#allocation2 + $0x1130] sm:$0xff]  ;;  %v2652_v35 = vpack.c.bf16 %v243_v26, %v233_v25  ;;  %v343_v25 = vld [vmem:[#allocation2 + $0x768] sm:$0xff] }
  0xb7   :  { %2365 = vmatprep.subr.bf16.mxu0 %v2364_v43  ;;  %v2384_v43 = vpack.c.bf16 %v577_v34, %v567_v32  ;;  %v109_v32 = vld [vmem:[#allocation2 + $0x18] sm:$0xff]  ;;  %v119_v34 = vld [vmem:[#allocation2 + $0x68] sm:$0xff] }
  0xb9   :  { %2635 = vmatpush1.bf16.msra.mxu1 %v2634_v47  ;;  %v2654_v47 = vpack.c.bf16 %v242_v37, %v232_v36  ;;  %v342_v36 = vld [vmem:[#allocation2 + $0x760] sm:$0xff]  ;;  %v353_v37 = vld [vmem:[#allocation2 + $0x7b8] sm:$0xff] }
  0xba   :  { %2367 = vmatpush1.bf16.msra.mxu0 %v2366_v54  ;;  %v2386_v54 = vpack.c.bf16 %v576_v45, %v566_v44  ;;  %2637 = vmatprep.subr.bf16.mxu1 %v2636_v49  ;;  %v108_v44 = vld [vmem:[#allocation2 + $0x10] sm:$0xff]  ;;  %v118_v45 = vld [vmem:[#allocation2 + $0x60] sm:$0xff]  ;;  %v2656_v49 = vpack.c.bf16 %v263_v40, %v253_v39  ;;  %v363_v39 = vld [vmem:[#allocation2 + $0x808] sm:$0xff] }
  0xbb   :  { %2369 = vmatprep.subr.bf16.mxu0 %v2368_v55  ;;  %v2388_v55 = vpack.c.bf16 %v597_v48, %v587_v46  ;;  %v129_v46 = vld [vmem:[#allocation2 + $0xb8] sm:$0xff]  ;;  %v139_v48 = vld [vmem:[#allocation2 + $0x108] sm:$0xff] }
  0xbd   :  { %2639 = vmatpush1.bf16.msra.mxu1 %v2638_v59  ;;  %v2658_v59 = vpack.c.bf16 %v262_v51, %v252_v50  ;;  %v362_v50 = vld [vmem:[#allocation2 + $0x800] sm:$0xff]  ;;  %v373_v51 = vld [vmem:[#allocation2 + $0x858] sm:$0xff] }
  0xbe   :  { %2371 = vmatpush1.bf16.msra.mxu0 %v2370_v2  ;;  %v2390_v2 = vpack.c.bf16 %v596_v57, %v586_v56  ;;  %2641 = vmatprep.subr.bf16.mxu1 %v2640_v61  ;;  %v128_v56 = vld [vmem:[#allocation2 + $0xb0] sm:$0xff]  ;;  %v138_v57 = vld [vmem:[#allocation2 + $0x100] sm:$0xff]  ;;  %v2660_v61 = vpack.c.bf16 %v283_v53, %v273_v52  ;;  %v383_v52 = vld [vmem:[#allocation2 + $0x8a8] sm:$0xff] }
  0xbf   :  { %2373 = vmatprep.subr.bf16.mxu0 %v2372_v3  ;;  %v2392_v3 = vpack.c.bf16 %v617_v60, %v607_v58  ;;  %v149_v58 = vld [vmem:[#allocation2 + $0x158] sm:$0xff]  ;;  %v159_v60 = vld [vmem:[#allocation2 + $0x1a8] sm:$0xff] }
  0xc1   :  { %2643 = vmatpush1.bf16.msra.mxu1 %v2642_v7  ;;  %v2662_v7 = vpack.c.bf16 %v282_v63, %v272_v62  ;;  %v382_v62 = vld [vmem:[#allocation2 + $0x8a0] sm:$0xff]  ;;  %v393_v63 = vld [vmem:[#allocation2 + $0x8f8] sm:$0xff] }
  0xc2   :  { %2375 = vmatpush1.bf16.msra.mxu0 %v2374_v14  ;;  %v2394_v14 = vpack.c.bf16 %v616_v5, %v606_v4  ;;  %2645 = vmatprep.subr.bf16.mxu1 %v2644_v9  ;;  %v148_v4 = vld [vmem:[#allocation2 + $0x150] sm:$0xff]  ;;  %v158_v5 = vld [vmem:[#allocation2 + $0x1a0] sm:$0xff]  ;;  %v2664_v9 = vpack.c.bf16 %v303_v1, %v293_v0  ;;  %v403_v0 = vld [vmem:[#allocation2 + $0x948] sm:$0xff] }
  0xc3   :  { %2377 = vmatprep.subr.bf16.mxu0 %v2376_v15  ;;  %v2396_v15 = vpack.c.bf16 %v637_v8, %v627_v6  ;;  %v169_v6 = vld [vmem:[#allocation2 + $0x1f8] sm:$0xff]  ;;  %v179_v8 = vld [vmem:[#allocation2 + $0x248] sm:$0xff] }
  0xc5   :  { %2647 = vmatpush1.bf16.msra.mxu1 %v2646_v19  ;;  %v199_v19 = vld [vmem:[#allocation2 + $0x2e8] sm:$0xff] }
  0xc6   :  { %2379 = vmatpush1.bf16.msra.mxu0 %v2378_v27  ;;  %v2398_v27 = vpack.c.bf16 %v636_v17, %v626_v16  ;;  %2649 = vmatprep.subr.bf16.mxu1 %v2648_v22  ;;  %v168_v16 = vld [vmem:[#allocation2 + $0x1f0] sm:$0xff]  ;;  %v189_v17 = vld [vmem:[#allocation2 + $0x298] sm:$0xff] }
  0xc7   :  { %2381 = vmatprep.subr.bf16.mxu0 %v2380_v29  ;;  %v2400_v29 = vpack.c.bf16 %v657_v21, %v647_v18  ;;  %v2666_v18 = vpack.c.bf16 %v302_v11, %v292_v10  ;;  %v2668_v21 = vpack.c.bf16 %v323_v13, %v313_v12  ;;  %v312_v22 = vld [vmem:[#allocation2 + $0x670] sm:$0xff]  ;;  %v402_v10 = vld [vmem:[#allocation2 + $0x940] sm:$0xff]  ;;  %v413_v11 = vld [vmem:[#allocation2 + $0x998] sm:$0xff] }
  0xc8   :  { %v423_v12 = vld [vmem:[#allocation2 + $0x9e8] sm:$0xff] }
  0xc9   :  { %2651 = vmatpush1.bf16.msra.mxu1 %v2650_v33  ;;  %v219_v33 = vld [vmem:[#allocation2 + $0x388] sm:$0xff] }
  0xca   :  { %2383 = vmatpush1.bf16.msra.mxu0 %v2382_v42  ;;  %v2402_v42 = vpack.c.bf16 %v656_v31, %v646_v30  ;;  %2653 = vmatprep.subr.bf16.mxu1 %v2652_v35  ;;  %v198_v30 = vld [vmem:[#allocation2 + $0x2e0] sm:$0xff]  ;;  %v209_v31 = vld [vmem:[#allocation2 + $0x338] sm:$0xff]  ;;  %v332_v35 = vld [vmem:[#allocation2 + $0x710] sm:$0xff] }
  0xcb   :  { %2385 = vmatprep.subr.bf16.mxu0 %v2384_v43  ;;  %v2404_v43 = vpack.c.bf16 %v119_v34, %v109_v32  ;;  %v2670_v32 = vpack.c.bf16 %v322_v23, %v312_v22  ;;  %v2672_v34 = vpack.c.bf16 %v343_v25, %v333_v24  ;;  %v422_v22 = vld [vmem:[#allocation2 + $0x9e0] sm:$0xff]  ;;  %v433_v23 = vld [vmem:[#allocation2 + $0xa38] sm:$0xff]  ;;  %v443_v24 = vld [vmem:[#allocation2 + $0xa88] sm:$0xff] }
  0xcd   :  { %2655 = vmatpush1.bf16.msra.mxu1 %v2654_v47  ;;  %v239_v47 = vld [vmem:[#allocation2 + $0x428] sm:$0xff] }
  0xce   :  { %2387 = vmatpush1.bf16.msra.mxu0 %v2386_v54  ;;  %v2406_v54 = vpack.c.bf16 %v118_v45, %v108_v44  ;;  %2657 = vmatprep.subr.bf16.mxu1 %v2656_v49  ;;  %v218_v44 = vld [vmem:[#allocation2 + $0x380] sm:$0xff]  ;;  %v229_v45 = vld [vmem:[#allocation2 + $0x3d8] sm:$0xff]  ;;  %v352_v49 = vld [vmem:[#allocation2 + $0x7b0] sm:$0xff] }
  0xcf   :  { %2389 = vmatprep.subr.bf16.mxu0 %v2388_v55  ;;  %v2408_v55 = vpack.c.bf16 %v139_v48, %v129_v46  ;;  %v2674_v46 = vpack.c.bf16 %v342_v36, %v332_v35  ;;  %v2676_v48 = vpack.c.bf16 %v363_v39, %v353_v37  ;;  %v442_v35 = vld [vmem:[#allocation2 + $0xa80] sm:$0xff]  ;;  %v453_v36 = vld [vmem:[#allocation2 + $0xad8] sm:$0xff]  ;;  %v463_v37 = vld [vmem:[#allocation2 + $0xb28] sm:$0xff] }
  0xd1   :  { %2659 = vmatpush1.bf16.msra.mxu1 %v2658_v59  ;;  %v259_v59 = vld [vmem:[#allocation2 + $0x4c8] sm:$0xff] }
  0xd2   :  { %2391 = vmatpush1.bf16.msra.mxu0 %v2390_v2  ;;  %v2410_v2 = vpack.c.bf16 %v138_v57, %v128_v56  ;;  %2661 = vmatprep.subr.bf16.mxu1 %v2660_v61  ;;  %v238_v56 = vld [vmem:[#allocation2 + $0x420] sm:$0xff]  ;;  %v249_v57 = vld [vmem:[#allocation2 + $0x478] sm:$0xff]  ;;  %v372_v61 = vld [vmem:[#allocation2 + $0x850] sm:$0xff] }
  0xd3   :  { %2393 = vmatprep.subr.bf16.mxu0 %v2392_v3  ;;  %v2412_v3 = vpack.c.bf16 %v159_v60, %v149_v58  ;;  %v2678_v58 = vpack.c.bf16 %v362_v50, %v352_v49  ;;  %v2680_v60 = vpack.c.bf16 %v383_v52, %v373_v51  ;;  %v462_v49 = vld [vmem:[#allocation2 + $0xb20] sm:$0xff]  ;;  %v473_v50 = vld [vmem:[#allocation2 + $0xb78] sm:$0xff]  ;;  %v483_v51 = vld [vmem:[#allocation2 + $0xbc8] sm:$0xff] }
  0xd5   :  { %2663 = vmatpush1.bf16.msra.mxu1 %v2662_v7  ;;  %v279_v7 = vld [vmem:[#allocation2 + $0x568] sm:$0xff] }
  0xd6   :  { %2395 = vmatpush1.bf16.msra.mxu0 %v2394_v14  ;;  %v2414_v14 = vpack.c.bf16 %v158_v5, %v148_v4  ;;  %2665 = vmatprep.subr.bf16.mxu1 %v2664_v9  ;;  %v258_v4 = vld [vmem:[#allocation2 + $0x4c0] sm:$0xff]  ;;  %v269_v5 = vld [vmem:[#allocation2 + $0x518] sm:$0xff]  ;;  %v392_v9 = vld [vmem:[#allocation2 + $0x8f0] sm:$0xff] }
  0xd7   :  { %2397 = vmatprep.subr.bf16.mxu0 %v2396_v15  ;;  %v2416_v15 = vpack.c.bf16 %v179_v8, %v169_v6  ;;  %v2682_v6 = vpack.c.bf16 %v382_v62, %v372_v61  ;;  %v2684_v8 = vpack.c.bf16 %v403_v0, %v393_v63  ;;  %v482_v61 = vld [vmem:[#allocation2 + $0xbc0] sm:$0xff]  ;;  %v493_v62 = vld [vmem:[#allocation2 + $0xc18] sm:$0xff]  ;;  %v503_v63 = vld [vmem:[#allocation2 + $0xc68] sm:$0xff] }
  0xd9   :  { %2667 = vmatpush1.bf16.msra.mxu1 %v2666_v18  ;;  %v299_v18 = vld [vmem:[#allocation2 + $0x608] sm:$0xff] }
  0xda   :  { %2399 = vmatpush1.bf16.msra.mxu0 %v2398_v27  ;;  %v2420_v27 = vpack.c.bf16 %v199_v19, %v189_v17  ;;  %2669 = vmatprep.subr.bf16.mxu1 %v2668_v21  ;;  %v2686_v17 = vpack.c.bf16 %v402_v10, %v392_v9  ;;  %v2688_v19 = vpack.c.bf16 %v423_v12, %v413_v11  ;;  %v412_v21 = vld [vmem:[#allocation2 + $0x990] sm:$0xff]  ;;  %v502_v9 = vld [vmem:[#allocation2 + $0xc60] sm:$0xff]  ;;  %v513_v10 = vld [vmem:[#allocation2 + $0xcb8] sm:$0xff] }
  0xdb   :  { %2401 = vmatprep.subr.bf16.mxu0 %v2400_v29  ;;  %v188_v29 = vld [vmem:[#allocation2 + $0x290] sm:$0xff]  ;;  %v523_v11 = vld [vmem:[#allocation2 + $0xd08] sm:$0xff] }
  0xdc   :  { %v2422_v40 = vpack.c.bf16 %v198_v30, %v188_v29  ;;  %v298_v29 = vld [vmem:[#allocation2 + $0x600] sm:$0xff]  ;;  %v309_v30 = vld [vmem:[#allocation2 + $0x658] sm:$0xff] }
  0xdd   :  { %2671 = vmatpush1.bf16.msra.mxu1 %v2670_v32  ;;  %v319_v32 = vld [vmem:[#allocation2 + $0x6a8] sm:$0xff] }
  0xde   :  { %2403 = vmatpush1.bf16.msra.mxu0 %v2402_v42  ;;  %v2424_v42 = vpack.c.bf16 %v219_v33, %v209_v31  ;;  %2673 = vmatprep.subr.bf16.mxu1 %v2672_v34  ;;  %v2690_v31 = vpack.c.bf16 %v422_v22, %v412_v21  ;;  %v2692_v33 = vpack.c.bf16 %v443_v24, %v433_v23  ;;  %v432_v34 = vld [vmem:[#allocation2 + $0xa30] sm:$0xff]  ;;  %v533_v21 = vld [vmem:[#allocation2 + $0xd58] sm:$0xff]  ;;  %v543_v22 = vld [vmem:[#allocation2 + $0xda8] sm:$0xff] }
  0xdf   :  { %2405 = vmatprep.subr.bf16.mxu0 %v2404_v43  ;;  %v208_v43 = vld [vmem:[#allocation2 + $0x330] sm:$0xff] }
  0xe0   :  { %v2426_v53 = vpack.c.bf16 %v218_v44, %v208_v43  ;;  %v318_v43 = vld [vmem:[#allocation2 + $0x6a0] sm:$0xff]  ;;  %v329_v44 = vld [vmem:[#allocation2 + $0x6f8] sm:$0xff] }
  0xe1   :  { %860 = vmatmul.mubr.f32.vlgmr.msra.gmra.mrb[0].mxu0 %v3539_v38  ;;  %2675 = vmatpush1.bf16.msra.mxu1 %v2674_v46  ;;  %v339_v46 = vld [vmem:[#allocation2 + $0x748] sm:$0xff] }
  0xe2   :  { %2407 = vmatpush1.bf16.msra.mxu0 %v2406_v54  ;;  %930 = vmatprep.mubr.f32.mxu0 %v3518_v41  ;;  %v178_v41 = vld [vmem:[#allocation2 + $0x240] sm:$0xff]  ;;  %v2428_v54 = vpack.c.bf16 %v239_v47, %v229_v45  ;;  %v2694_v45 = vpack.c.bf16 %v442_v35, %v432_v34  ;;  %v2696_v47 = vpack.c.bf16 %v463_v37, %v453_v36  ;;  %v553_v34 = vld [vmem:[#allocation2 + $0xdf8] sm:$0xff]  ;;  %v563_v35 = vld [vmem:[#allocation2 + $0xe48] sm:$0xff] }
  0xe3   :  { %2409 = vmatprep.subr.bf16.mxu0 %v2408_v55  ;;  %v2418_v26 = vpack.c.bf16 %v178_v41, %v168_v16  ;;  %v228_v55 = vld [vmem:[#allocation2 + $0x3d0] sm:$0xff]  ;;  %2677 = vmatprep.subr.bf16.mxu1 %v2676_v48  ;;  %v278_v16 = vld [vmem:[#allocation2 + $0x560] sm:$0xff]  ;;  %v289_v41 = vld [vmem:[#allocation2 + $0x5b8] sm:$0xff] }
  0xe4   :  { %v2430_v1 = vpack.c.bf16 %v238_v56, %v228_v55  ;;  %v452_v48 = vld [vmem:[#allocation2 + $0xad0] sm:$0xff]  ;;  %v338_v55 = vld [vmem:[#allocation2 + $0x740] sm:$0xff]  ;;  %v349_v56 = vld [vmem:[#allocation2 + $0x798] sm:$0xff] }
  0xe5   :  { %2679 = vmatpush1.bf16.msra.mxu1 %v2678_v58  ;;  %v359_v58 = vld [vmem:[#allocation2 + $0x7e8] sm:$0xff] }
  0xe6   :  { %2411 = vmatpush1.bf16.msra.mxu0 %v2410_v2  ;;  %v2432_v2 = vpack.c.bf16 %v259_v59, %v249_v57  ;;  %2681 = vmatprep.subr.bf16.mxu1 %v2680_v60  ;;  %v2698_v57 = vpack.c.bf16 %v462_v49, %v452_v48  ;;  %v2700_v59 = vpack.c.bf16 %v483_v51, %v473_v50  ;;  %v472_v60 = vld [vmem:[#allocation2 + $0xb70] sm:$0xff]  ;;  %v573_v48 = vld [vmem:[#allocation2 + $0xe98] sm:$0xff]  ;;  %v583_v49 = vld [vmem:[#allocation2 + $0xee8] sm:$0xff] }
  0xe7   :  { %2413 = vmatprep.subr.bf16.mxu0 %v2412_v3  ;;  %v248_v3 = vld [vmem:[#allocation2 + $0x470] sm:$0xff] }
  0xe8   :  { %v2434_v13 = vpack.c.bf16 %v258_v4, %v248_v3  ;;  %v358_v3 = vld [vmem:[#allocation2 + $0x7e0] sm:$0xff]  ;;  %v369_v4 = vld [vmem:[#allocation2 + $0x838] sm:$0xff] }
  0xe9   :  { %2683 = vmatpush1.bf16.msra.mxu1 %v2682_v6  ;;  %v379_v6 = vld [vmem:[#allocation2 + $0x888] sm:$0xff] }
  0xea   :  { %2415 = vmatpush1.bf16.msra.mxu0 %v2414_v14  ;;  %v2436_v14 = vpack.c.bf16 %v279_v7, %v269_v5  ;;  %2685 = vmatprep.subr.bf16.mxu1 %v2684_v8  ;;  %v2702_v5 = vpack.c.bf16 %v482_v61, %v472_v60  ;;  %v2704_v7 = vpack.c.bf16 %v503_v63, %v493_v62  ;;  %v492_v8 = vld [vmem:[#allocation2 + $0xc10] sm:$0xff]  ;;  %v593_v60 = vld [vmem:[#allocation2 + $0xf38] sm:$0xff]  ;;  %v603_v61 = vld [vmem:[#allocation2 + $0xf88] sm:$0xff] }
  0xeb   :  { %2417 = vmatprep.subr.bf16.mxu0 %v2416_v15  ;;  %v268_v15 = vld [vmem:[#allocation2 + $0x510] sm:$0xff]  ;;  %v2456_v12 = vpack.c.bf16 %v379_v6, %v369_v4  ;;  %v161_v4 = vld [vmem:[#allocation2 + $0x1b8] sm:$0xff] }
  0xec   :  { %v2438_v25 = vpack.c.bf16 %v278_v16, %v268_v15  ;;  %v389_v15 = vld [vmem:[#allocation2 + $0x8d8] sm:$0xff]  ;;  %v2706_v16 = vpack.c.bf16 %v502_v9, %v492_v8  ;;  %v592_v6 = vld [vmem:[#allocation2 + $0xf30] sm:$0xff]  ;;  %v623_v9 = vld [vmem:[#allocation2 + $0x1028] sm:$0xff] }
  0xed   :  { %2687 = vmatpush1.bf16.msra.mxu1 %v2686_v17  ;;  %v2708_v17 = vpack.c.bf16 %v523_v11, %v513_v10  ;;  %v613_v8 = vld [vmem:[#allocation2 + $0xfd8] sm:$0xff]  ;;  %v3552_v11 = vld [vmem:[%s3624_s0 + $0x8] sm:$0xff] }
  0xee   :  { %2419 = vmatpush1.bf16.msra.mxu0 %v2418_v26  ;;  %v2440_v26 = vpack.c.bf16 %v299_v18, %v289_v41  ;;  %2689 = vmatprep.subr.bf16.mxu1 %v2688_v19  ;;  %v399_v41 = vld [vmem:[#allocation2 + $0x928] sm:$0xff]  ;;  %v512_v18 = vld [vmem:[#allocation2 + $0xcb0] sm:$0xff]  ;;  %v522_v19 = vld [vmem:[#allocation2 + $0xd00] sm:$0xff] }
  0xef   :  { %2421 = vmatprep.subr.bf16.mxu0 %v2420_v27  ;;  %v288_v27 = vld [vmem:[#allocation2 + $0x5b0] sm:$0xff]  ;;  %v2460_v24 = vpack.c.bf16 %v399_v41, %v389_v15 }
  0xf0   :  { %v2442_v39 = vpack.c.bf16 %v298_v29, %v288_v27  ;;  %v409_v27 = vld [vmem:[#allocation2 + $0x978] sm:$0xff]  ;;  %v2710_v29 = vpack.c.bf16 %v522_v19, %v512_v18  ;;  %v612_v41 = vld [vmem:[#allocation2 + $0xfd0] sm:$0xff]  ;;  %v643_v19 = vld [vmem:[#allocation2 + $0x10c8] sm:$0xff] }
  0xf1   :  { %2691 = vmatpush1.bf16.msra.mxu1 %v2690_v31  ;;  %v2712_v31 = vpack.c.bf16 %v543_v22, %v533_v21  ;;  %v633_v18 = vld [vmem:[#allocation2 + $0x1078] sm:$0xff] }
  0xf2   :  { %2423 = vmatpush1.bf16.msra.mxu0 %v2422_v40  ;;  %v2444_v40 = vpack.c.bf16 %v319_v32, %v309_v30  ;;  %2693 = vmatprep.subr.bf16.mxu1 %v2692_v33  ;;  %v419_v30 = vld [vmem:[#allocation2 + $0x9c8] sm:$0xff]  ;;  %v532_v32 = vld [vmem:[#allocation2 + $0xd50] sm:$0xff]  ;;  %v542_v33 = vld [vmem:[#allocation2 + $0xda0] sm:$0xff] }
  0xf3   :  { %2425 = vmatprep.subr.bf16.mxu0 %v2424_v42  ;;  %v308_v42 = vld [vmem:[#allocation2 + $0x650] sm:$0xff]  ;;  %v2464_v37 = vpack.c.bf16 %v419_v30, %v409_v27  ;;  %v201_v27 = vld [vmem:[#allocation2 + $0x2f8] sm:$0xff] }
  0xf4   :  { %v2446_v52 = vpack.c.bf16 %v318_v43, %v308_v42  ;;  %1215 = vmatmul.mubr.f32.vlgmr.msra.gmra.mrb[2].mxu1 %v3531_v28  ;;  %v111_v42 = vld [vmem:[#allocation2 + $0x28] sm:$0xff]  ;;  %v2714_v43 = vpack.c.bf16 %v542_v33, %v532_v32  ;;  %v632_v30 = vld [vmem:[#allocation2 + $0x1070] sm:$0xff]  ;;  %v653_v32 = vld [vmem:[#allocation2 + $0x1118] sm:$0xff] }
  0xf5   :  { %2695 = vmatpush1.bf16.msra.mxu1 %v2694_v45  ;;  %2254 = vmatprep.mubr.msk.f32.mxu1 %vm720_vm0, %v3524_v20  ;;  %v2716_v45 = vpack.c.bf16 %v563_v35, %v553_v34  ;;  %v663_v33 = vld [vmem:[#allocation2 + $0x1168] sm:$0xff] }
  0xf6   :  { %2427 = vmatpush1.bf16.msra.mxu0 %v2426_v53  ;;  %v2448_v53 = vpack.c.bf16 %v339_v46, %v329_v44  ;;  %2697 = vmatprep.subr.bf16.mxu1 %v2696_v47  ;;  %v121_v44 = vld [vmem:[#allocation2 + $0x78] sm:$0xff]  ;;  %v552_v46 = vld [vmem:[#allocation2 + $0xdf0] sm:$0xff]  ;;  %v562_v47 = vld [vmem:[#allocation2 + $0xe40] sm:$0xff] }
  0xf7   :  { %2429 = vmatprep.subr.bf16.mxu0 %v2428_v54  ;;  %v328_v54 = vld [vmem:[#allocation2 + $0x6f0] sm:$0xff]  ;;  %v2516_v51 = vpack.c.bf16 %v121_v44, %v111_v42  ;;  %v221_v42 = vld [vmem:[#allocation2 + $0x398] sm:$0xff] }
  0xf8   :  { %v2450_v0 = vpack.c.bf16 %v338_v55, %v328_v54  ;;  %v131_v54 = vld [vmem:[#allocation2 + $0xc8] sm:$0xff]  ;;  %v2718_v55 = vpack.c.bf16 %v562_v47, %v552_v46  ;;  %v652_v44 = vld [vmem:[#allocation2 + $0x1110] sm:$0xff] }
  0xf9   :  { %2699 = vmatpush1.bf16.msra.mxu1 %v2698_v57  ;;  %v2720_v57 = vpack.c.bf16 %v583_v49, %v573_v48  ;;  %v1445_v46 = vld [vmem:[#allocation6 + $0x8] sm:$0xff]  ;;  %v1447_v47 = vld [vmem:[#allocation6 + $0x18] sm:$0xff] }
  0xfa   :  { %2431 = vmatpush1.bf16.msra.mxu0 %v2430_v1  ;;  %v2452_v1 = vpack.c.bf16 %v359_v58, %v349_v56  ;;  %2701 = vmatprep.subr.bf16.mxu1 %v2700_v59  ;;  %v141_v56 = vld [vmem:[#allocation2 + $0x118] sm:$0xff]  ;;  %v572_v58 = vld [vmem:[#allocation2 + $0xe90] sm:$0xff]  ;;  %v582_v59 = vld [vmem:[#allocation2 + $0xee0] sm:$0xff] }
  0xfb   :  { %2433 = vmatprep.subr.bf16.mxu0 %v2432_v2  ;;  %v348_v2 = vld [vmem:[#allocation2 + $0x790] sm:$0xff]  ;;  %v2520_v63 = vpack.c.bf16 %v141_v56, %v131_v54  ;;  %v241_v54 = vld [vmem:[#allocation2 + $0x438] sm:$0xff] }
  0xfc   :  { %v2454_v20 = vpack.c.bf16 %v358_v3, %v348_v2  ;;  %v151_v2 = vld [vmem:[#allocation2 + $0x168] sm:$0xff]  ;;  %v2722_v3 = vpack.c.bf16 %v582_v59, %v572_v58  ;;  %v1449_v58 = vld [vmem:[#allocation6 + $0x28] sm:$0xff] }
  0xfd   :  { %2703 = vmatpush1.bf16.msra.mxu1 %v2702_v5  ;;  %v2724_v5 = vpack.c.bf16 %v603_v61, %v593_v60  ;;  %v1444_v56 = vld [vmem:[#allocation6] sm:$0xff]  ;;  %v1451_v59 = vld [vmem:[#allocation6 + $0x38] sm:$0xff] }
  0xfe   :  { %2435 = vmatpush1.bf16.msra.mxu0 %v2434_v13  ;;  %v368_v13 = vld [vmem:[#allocation2 + $0x830] sm:$0xff]  ;;  %2705 = vmatprep.subr.bf16.mxu1 %v2704_v7  ;;  %v602_v7 = vld [vmem:[#allocation2 + $0xf80] sm:$0xff] }
  0xff   :  { %2437 = vmatprep.subr.bf16.mxu0 %v2436_v14  ;;  %v378_v14 = vld [vmem:[#allocation2 + $0x880] sm:$0xff]  ;;  %v2726_v15 = vpack.c.bf16 %v602_v7, %v592_v6  ;;  %v1453_v6 = vld [vmem:[#allocation6 + $0x48] sm:$0xff] }
 0x100   :  { %v2458_v23 = vpack.c.bf16 %v378_v14, %v368_v13  ;;  %v160_v13 = vld [vmem:[#allocation2 + $0x1b0] sm:$0xff]  ;;  %v171_v14 = vld [vmem:[#allocation2 + $0x208] sm:$0xff] }
 0x101   :  { %2707 = vmatpush1.bf16.msra.mxu1 %v2706_v16  ;;  %v181_v16 = vld [vmem:[#allocation2 + $0x258] sm:$0xff]  ;;  %v1455_v7 = vld [vmem:[#allocation6 + $0x58] sm:$0xff] }
 0x102   :  { %2439 = vmatpush1.bf16.msra.mxu0 %v2438_v25  ;;  %v388_v25 = vld [vmem:[#allocation2 + $0x8d0] sm:$0xff]  ;;  %2709 = vmatprep.subr.bf16.mxu1 %v2708_v17  ;;  %v622_v17 = vld [vmem:[#allocation2 + $0x1020] sm:$0xff]  ;;  %v2528_v22 = vpack.c.bf16 %v181_v16, %v171_v14  ;;  %v281_v14 = vld [vmem:[#allocation2 + $0x578] sm:$0xff] }
 0x103   :  { %2441 = vmatprep.subr.bf16.mxu0 %v2440_v26  ;;  %v398_v26 = vld [vmem:[#allocation2 + $0x920] sm:$0xff]  ;;  %v1452_v16 = vld [vmem:[#allocation6 + $0x40] sm:$0xff] }
 0x104   :  { %v2462_v36 = vpack.c.bf16 %v398_v26, %v388_v25  ;;  %v191_v25 = vld [vmem:[#allocation2 + $0x2a8] sm:$0xff]  ;;  %v2730_v26 = vpack.c.bf16 %v622_v17, %v612_v41  ;;  %v1457_v41 = vld [vmem:[#allocation6 + $0x68] sm:$0xff] }
 0x105   :  { %2711 = vmatpush1.bf16.msra.mxu1 %v2710_v29  ;;  %v2732_v29 = vpack.c.bf16 %v643_v19, %v633_v18  ;;  %v2532_v35 = vpack.c.bf16 %v201_v27, %v191_v25  ;;  %v1459_v17 = vld [vmem:[#allocation6 + $0x78] sm:$0xff]  ;;  %v1458_v27 = vld [vmem:[#allocation6 + $0x70] sm:$0xff] }
 0x106   :  { %2443 = vmatpush1.bf16.msra.mxu0 %v2442_v39  ;;  %v408_v39 = vld [vmem:[#allocation2 + $0x970] sm:$0xff]  ;;  %2713 = vmatprep.subr.bf16.mxu1 %v2712_v31  ;;  %v642_v31 = vld [vmem:[#allocation2 + $0x10c0] sm:$0xff]  ;;  %v2864_v25 = vpack.c.bf16 %v1459_v17, %v1457_v41 }
 0x107   :  { %2445 = vmatprep.subr.bf16.mxu0 %v2444_v40  ;;  %v418_v40 = vld [vmem:[#allocation2 + $0x9c0] sm:$0xff] }
 0x108   :  { %v2466_v50 = vpack.c.bf16 %v418_v40, %v408_v39  ;;  %v211_v39 = vld [vmem:[#allocation2 + $0x348] sm:$0xff]  ;;  %v2734_v40 = vpack.c.bf16 %v642_v31, %v632_v30  ;;  %v370_v17 = vld [vmem:[#allocation2 + $0x840] sm:$0xff] }
 0x109   :  { %2715 = vmatpush1.bf16.msra.mxu1 %v2714_v43  ;;  %v2736_v43 = vpack.c.bf16 %v663_v33, %v653_v32  ;;  %v2536_v49 = vpack.c.bf16 %v221_v42, %v211_v39  ;;  %v1463_v30 = vld [vmem:[#allocation6 + $0x98] sm:$0xff]  ;;  %v1462_v42 = vld [vmem:[#allocation6 + $0x90] sm:$0xff] }
 0x10a   :  { %2447 = vmatpush1.bf16.msra.mxu0 %v2446_v52  ;;  %v110_v52 = vld [vmem:[#allocation2 + $0x20] sm:$0xff]  ;;  %2717 = vmatprep.subr.bf16.mxu1 %v2716_v45 }
 0x10b   :  { %2449 = vmatprep.subr.bf16.mxu0 %v2448_v53  ;;  %v120_v53 = vld [vmem:[#allocation2 + $0x70] sm:$0xff]  ;;  %v662_v45 = vld [vmem:[#allocation2 + $0x1160] sm:$0xff] }
 0x10c   :  { %v2518_v62 = vpack.c.bf16 %v120_v53, %v110_v52  ;;  %v231_v52 = vld [vmem:[#allocation2 + $0x3e8] sm:$0xff]  ;;  %v2738_v53 = vpack.c.bf16 %v662_v45, %v652_v44  ;;  %v290_v33 = vld [vmem:[#allocation2 + $0x5c0] sm:$0xff] }
 0x10d   :  { %2719 = vmatpush1.bf16.msra.mxu1 %v2718_v55  ;;  %v2852_v55 = vpack.c.bf16 %v1447_v47, %v1445_v46  ;;  %v2540_v61 = vpack.c.bf16 %v241_v54, %v231_v52  ;;  %v1467_v44 = vld [vmem:[#allocation6 + $0xb8] sm:$0xff]  ;;  %v1466_v54 = vld [vmem:[#allocation6 + $0xb0] sm:$0xff] }
 0x10e   :  { %2451 = vmatpush1.bf16.msra.mxu0 %v2450_v0  ;;  %v130_v0 = vld [vmem:[#allocation2 + $0xc0] sm:$0xff]  ;;  %2721 = vmatprep.subr.bf16.mxu1 %v2720_v57 }
 0x10f   :  { %2453 = vmatprep.subr.bf16.mxu0 %v2452_v1  ;;  %v140_v1 = vld [vmem:[#allocation2 + $0x110] sm:$0xff]  ;;  %v1446_v57 = vld [vmem:[#allocation6 + $0x10] sm:$0xff] }
 0x110   :  { %v2522_v10 = vpack.c.bf16 %v140_v1, %v130_v0  ;;  %v251_v0 = vld [vmem:[#allocation2 + $0x488] sm:$0xff]  ;;  %v2854_v1 = vpack.c.bf16 %v1446_v57, %v1444_v56  ;;  %v310_v47 = vld [vmem:[#allocation2 + $0x660] sm:$0xff] }
 0x111   :  { %2723 = vmatpush1.bf16.msra.mxu1 %v2722_v3  ;;  %v2856_v3 = vpack.c.bf16 %v1451_v59, %v1449_v58  ;;  %v1471_v56 = vld [vmem:[#allocation6 + $0xd8] sm:$0xff] }
 0x112   :  { %2455 = vmatpush1.bf16.msra.mxu0 %v2454_v20  ;;  %v2524_v20 = vpack.c.bf16 %v161_v4, %v151_v2  ;;  %2725 = vmatprep.subr.bf16.mxu1 %v2724_v5  ;;  %v261_v2 = vld [vmem:[#allocation2 + $0x4d8] sm:$0xff]  ;;  %v1448_v4 = vld [vmem:[#allocation6 + $0x20] sm:$0xff]  ;;  %v330_v59 = vld [vmem:[#allocation2 + $0x700] sm:$0xff] }
 0x113   :  { %2457 = vmatprep.subr.bf16.mxu0 %v2456_v12  ;;  %v150_v12 = vld [vmem:[#allocation2 + $0x160] sm:$0xff] }
 0x114   :  { %v2526_v21 = vpack.c.bf16 %v160_v13, %v150_v12  ;;  %v1450_v5 = vld [vmem:[#allocation6 + $0x30] sm:$0xff]  ;;  %v271_v12 = vld [vmem:[#allocation2 + $0x528] sm:$0xff] }
 0x115   :  { %2727 = vmatpush1.bf16.msra.mxu1 %v2726_v15  ;;  %v2858_v13 = vpack.c.bf16 %v1450_v5, %v1448_v4  ;;  %v2860_v15 = vpack.c.bf16 %v1455_v7, %v1453_v6  ;;  %v2548_v19 = vpack.c.bf16 %v281_v14, %v271_v12  ;;  %v1475_v4 = vld [vmem:[#allocation6 + $0xf8] sm:$0xff]  ;;  %v1474_v14 = vld [vmem:[#allocation6 + $0xf0] sm:$0xff] }
 0x116   :  { %2459 = vmatpush1.bf16.msra.mxu0 %v2458_v23  ;;  %v170_v23 = vld [vmem:[#allocation2 + $0x200] sm:$0xff] }
 0x117   :  { %2461 = vmatprep.subr.bf16.mxu0 %v2460_v24  ;;  %v180_v24 = vld [vmem:[#allocation2 + $0x250] sm:$0xff]  ;;  %v350_v7 = vld [vmem:[#allocation2 + $0x7a0] sm:$0xff] }
 0x118   :  { %v2530_v34 = vpack.c.bf16 %v180_v24, %v170_v23  ;;  %v301_v24 = vld [vmem:[#allocation2 + $0x618] sm:$0xff] }
 0x11a   :  { %2463 = vmatpush1.bf16.msra.mxu0 %v2462_v36  ;;  %v190_v36 = vld [vmem:[#allocation2 + $0x2a0] sm:$0xff] }
 0x11b   :  { %2465 = vmatprep.subr.bf16.mxu0 %v2464_v37  ;;  %v200_v37 = vld [vmem:[#allocation2 + $0x2f0] sm:$0xff] }
 0x11c   :  { %v2534_v48 = vpack.c.bf16 %v200_v37, %v190_v36  ;;  %v321_v37 = vld [vmem:[#allocation2 + $0x6b8] sm:$0xff] }
 0x11e   :  { %2467 = vmatpush1.bf16.msra.mxu0 %v2466_v50  ;;  %v210_v50 = vld [vmem:[#allocation2 + $0x340] sm:$0xff] }
 0x11f   :  { %2517 = vmatprep.subr.bf16.mxu0 %v2516_v51  ;;  %v220_v51 = vld [vmem:[#allocation2 + $0x390] sm:$0xff] }
 0x120   :  { %v2538_v60 = vpack.c.bf16 %v220_v51, %v210_v50  ;;  %v341_v51 = vld [vmem:[#allocation2 + $0x758] sm:$0xff] }
 0x121   :  { %931 = vmatmul.mubr.f32.vlgmr.msra.gmra.mrb[2].mxu0 %v3531_v28  ;;  %v2728_v28 = vpack.c.bf16 %v623_v9, %v613_v8  ;;  %v2544_v9 = vpack.c.bf16 %v261_v2, %v251_v0  ;;  %v1470_v2 = vld [vmem:[#allocation6 + $0xd0] sm:$0xff] }
 0x122   :  { %2519 = vmatpush1.bf16.msra.mxu0 %v2518_v62  ;;  %1072 = vmatprep.mubr.f32.mxu0 %v3552_v11  ;;  %v230_v62 = vld [vmem:[#allocation2 + $0x3e0] sm:$0xff] }
 0x123   :  { %2521 = vmatprep.subr.bf16.mxu0 %v2520_v63  ;;  %2729 = vmatprep.subr.bf16.mxu1 %v2728_v28  ;;  %v240_v63 = vld [vmem:[#allocation2 + $0x430] sm:$0xff]  ;;  %v1454_v28 = vld [vmem:[#allocation6 + $0x50] sm:$0xff] }
 0x124   :  { %2731 = vmatpush1.bf16.msra.mxu1 %v2730_v26  ;;  %v2542_v8 = vpack.c.bf16 %v240_v63, %v230_v62  ;;  %v2862_v23 = vpack.c.bf16 %v1454_v28, %v1452_v16  ;;  %v1456_v26 = vld [vmem:[#allocation6 + $0x60] sm:$0xff]  ;;  %v361_v63 = vld [vmem:[#allocation2 + $0x7f8] sm:$0xff]  ;;  %v1479_v16 = vld [vmem:[#allocation6 + $0x118] sm:$0xff] }
 0x125   :  { %2733 = vmatprep.subr.bf16.mxu1 %v2732_v29  ;;  %v1461_v29 = vld [vmem:[#allocation6 + $0x88] sm:$0xff]  ;;  %v2866_v36 = vpack.c.bf16 %v1458_v27, %v1456_v26  ;;  %v1483_v26 = vld [vmem:[#allocation6 + $0x138] sm:$0xff] }
 0x126   :  { %2523 = vmatpush1.bf16.msra.mxu0 %v2522_v10  ;;  %v250_v10 = vld [vmem:[#allocation2 + $0x480] sm:$0xff]  ;;  %v2868_v39 = vpack.c.bf16 %v1463_v30, %v1461_v29 }
 0x127   :  { %2525 = vmatprep.subr.bf16.mxu0 %v2524_v20  ;;  %v260_v20 = vld [vmem:[#allocation2 + $0x4d0] sm:$0xff]  ;;  %v390_v30 = vld [vmem:[#allocation2 + $0x8e0] sm:$0xff] }
 0x128   :  { %2735 = vmatpush1.bf16.msra.mxu1 %v2734_v40  ;;  %v2546_v18 = vpack.c.bf16 %v260_v20, %v250_v10  ;;  %v1460_v40 = vld [vmem:[#allocation6 + $0x80] sm:$0xff]  ;;  %v381_v20 = vld [vmem:[#allocation2 + $0x898] sm:$0xff] }
 0x129   :  { %2737 = vmatprep.subr.bf16.mxu1 %v2736_v43  ;;  %v1465_v43 = vld [vmem:[#allocation6 + $0xa8] sm:$0xff]  ;;  %v2870_v50 = vpack.c.bf16 %v1462_v42, %v1460_v40  ;;  %v1487_v40 = vld [vmem:[#allocation6 + $0x158] sm:$0xff] }
 0x12a   :  { %2527 = vmatpush1.bf16.msra.mxu0 %v2526_v21  ;;  %v270_v21 = vld [vmem:[#allocation2 + $0x520] sm:$0xff]  ;;  %v2872_v52 = vpack.c.bf16 %v1467_v44, %v1465_v43 }
 0x12b   :  { %2529 = vmatprep.subr.bf16.mxu0 %v2528_v22  ;;  %v291_v22 = vld [vmem:[#allocation2 + $0x5c8] sm:$0xff]  ;;  %v410_v44 = vld [vmem:[#allocation2 + $0x980] sm:$0xff] }
 0x12c   :  { %2739 = vmatpush1.bf16.msra.mxu1 %v2738_v53  ;;  %v2552_v32 = vpack.c.bf16 %v301_v24, %v291_v22  ;;  %v1464_v53 = vld [vmem:[#allocation6 + $0xa0] sm:$0xff]  ;;  %v1478_v24 = vld [vmem:[#allocation6 + $0x110] sm:$0xff] }
 0x12d   :  { %2853 = vmatprep.subr.bf16.mxu1 %v2852_v55  ;;  %v1469_v55 = vld [vmem:[#allocation6 + $0xc8] sm:$0xff]  ;;  %v2874_v62 = vpack.c.bf16 %v1466_v54, %v1464_v53  ;;  %v1491_v53 = vld [vmem:[#allocation6 + $0x178] sm:$0xff] }
 0x12e   :  { %2531 = vmatpush1.bf16.msra.mxu0 %v2530_v34  ;;  %v300_v34 = vld [vmem:[#allocation2 + $0x610] sm:$0xff]  ;;  %v2876_v0 = vpack.c.bf16 %v1471_v56, %v1469_v55  ;;  %v430_v56 = vld [vmem:[#allocation2 + $0xa20] sm:$0xff] }
 0x12f   :  { %2533 = vmatprep.subr.bf16.mxu0 %v2532_v35  ;;  %1286 = vmatmul.mubr.f32.vlgmr.msra.gmra.mrb[2].mxu1 %v3539_v38  ;;  %v280_v38 = vld [vmem:[#allocation2 + $0x570] sm:$0xff]  ;;  %v311_v35 = vld [vmem:[#allocation2 + $0x668] sm:$0xff]  ;;  %v2554_v45 = vpack.c.bf16 %v300_v34, %v290_v33  ;;  %v421_v34 = vld [vmem:[#allocation2 + $0x9d8] sm:$0xff] }
 0x130   :  { %2855 = vmatpush1.bf16.msra.mxu1 %v2854_v1  ;;  %v2550_v31 = vpack.c.bf16 %v280_v38, %v270_v21  ;;  %v2556_v46 = vpack.c.bf16 %v321_v37, %v311_v35  ;;  %v1468_v1 = vld [vmem:[#allocation6 + $0xc0] sm:$0xff]  ;;  %v401_v38 = vld [vmem:[#allocation2 + $0x938] sm:$0xff] }
 0x131   :  { %2857 = vmatprep.subr.bf16.mxu1 %v2856_v3  ;;  %v1473_v3 = vld [vmem:[#allocation6 + $0xe8] sm:$0xff]  ;;  %v2878_v10 = vpack.c.bf16 %v1470_v2, %v1468_v1  ;;  %v1482_v37 = vld [vmem:[#allocation6 + $0x130] sm:$0xff]  ;;  %v1495_v1 = vld [vmem:[#allocation6 + $0x198] sm:$0xff] }
 0x132   :  { %2535 = vmatpush1.bf16.msra.mxu0 %v2534_v48  ;;  %v320_v48 = vld [vmem:[#allocation2 + $0x6b0] sm:$0xff]  ;;  %v2880_v12 = vpack.c.bf16 %v1475_v4, %v1473_v3  ;;  %v450_v4 = vld [vmem:[#allocation2 + $0xac0] sm:$0xff] }
 0x133   :  { %2537 = vmatprep.subr.bf16.mxu0 %v2536_v49  ;;  %v331_v49 = vld [vmem:[#allocation2 + $0x708] sm:$0xff]  ;;  %v2558_v57 = vpack.c.bf16 %v320_v48, %v310_v47  ;;  %v441_v48 = vld [vmem:[#allocation2 + $0xa78] sm:$0xff] }
 0x134   :  { %2859 = vmatpush1.bf16.msra.mxu1 %v2858_v13  ;;  %v2560_v58 = vpack.c.bf16 %v341_v51, %v331_v49  ;;  %v1472_v13 = vld [vmem:[#allocation6 + $0xe0] sm:$0xff]  ;;  %v1486_v51 = vld [vmem:[#allocation6 + $0x150] sm:$0xff] }
 0x135   :  { %2861 = vmatprep.subr.bf16.mxu1 %v2860_v15  ;;  %v1477_v15 = vld [vmem:[#allocation6 + $0x108] sm:$0xff]  ;;  %v2882_v21 = vpack.c.bf16 %v1474_v14, %v1472_v13  ;;  %v1499_v14 = vld [vmem:[#allocation6 + $0x1b8] sm:$0xff] }
 0x136   :  { %2539 = vmatpush1.bf16.msra.mxu0 %v2538_v60  ;;  %v340_v60 = vld [vmem:[#allocation2 + $0x750] sm:$0xff]  ;;  %v2884_v22 = vpack.c.bf16 %v1479_v16, %v1477_v15  ;;  %v3565_v16 = vld [vmem:[%s3624_s0 + $0x18] sm:$0xff] }
 0x137   :  { %2541 = vmatprep.subr.bf16.mxu0 %v2540_v61  ;;  %v351_v61 = vld [vmem:[#allocation2 + $0x7a8] sm:$0xff]  ;;  %v2562_v5 = vpack.c.bf16 %v340_v60, %v330_v59  ;;  %v461_v60 = vld [vmem:[#allocation2 + $0xb18] sm:$0xff] }
 0x138   :  { %2863 = vmatpush1.bf16.msra.mxu1 %v2862_v23  ;;  %v2564_v6 = vpack.c.bf16 %v361_v63, %v351_v61  ;;  %v1476_v23 = vld [vmem:[#allocation6 + $0x100] sm:$0xff]  ;;  %v1490_v63 = vld [vmem:[#allocation6 + $0x170] sm:$0xff]  ;;  %v1497_v13 = vld [vmem:[#allocation6 + $0x1a8] sm:$0xff] }
 0x139   :  { %2865 = vmatprep.subr.bf16.mxu1 %v2864_v25  ;;  %v1481_v25 = vld [vmem:[#allocation6 + $0x128] sm:$0xff]  ;;  %v2886_v33 = vpack.c.bf16 %v1478_v24, %v1476_v23  ;;  %v1498_v23 = vld [vmem:[#allocation6 + $0x1b0] sm:$0xff] }
 0x13a   :  { %2543 = vmatpush1.bf16.msra.mxu0 %v2542_v8  ;;  %v360_v8 = vld [vmem:[#allocation2 + $0x7f0] sm:$0xff]  ;;  %v2888_v35 = vpack.c.bf16 %v1483_v26, %v1481_v25  ;;  %v1503_v25 = vld [vmem:[#allocation6 + $0x1d8] sm:$0xff] }
 0x13b   :  { %2545 = vmatprep.subr.bf16.mxu0 %v2544_v9  ;;  %v371_v9 = vld [vmem:[#allocation2 + $0x848] sm:$0xff]  ;;  %v2566_v28 = vpack.c.bf16 %v360_v8, %v350_v7  ;;  %v481_v8 = vld [vmem:[#allocation2 + $0xbb8] sm:$0xff] }
 0x13c   :  { %2867 = vmatpush1.bf16.msra.mxu1 %v2866_v36  ;;  %v2568_v41 = vpack.c.bf16 %v381_v20, %v371_v9  ;;  %v1480_v36 = vld [vmem:[#allocation6 + $0x120] sm:$0xff]  ;;  %v1494_v20 = vld [vmem:[#allocation6 + $0x190] sm:$0xff]  ;;  %v1501_v24 = vld [vmem:[#allocation6 + $0x1c8] sm:$0xff] }
 0x13d   :  { %2869 = vmatprep.subr.bf16.mxu1 %v2868_v39  ;;  %v1485_v39 = vld [vmem:[#allocation6 + $0x148] sm:$0xff]  ;;  %v2890_v47 = vpack.c.bf16 %v1482_v37, %v1480_v36  ;;  %v1502_v36 = vld [vmem:[#allocation6 + $0x1d0] sm:$0xff] }
 0x13e   :  { %2547 = vmatpush1.bf16.msra.mxu0 %v2546_v18  ;;  %v380_v18 = vld [vmem:[#allocation2 + $0x890] sm:$0xff]  ;;  %v2892_v49 = vpack.c.bf16 %v1487_v40, %v1485_v39  ;;  %v1507_v39 = vld [vmem:[#allocation6 + $0x1f8] sm:$0xff] }
 0x13f   :  { %2549 = vmatprep.subr.bf16.mxu0 %v2548_v19  ;;  %v391_v19 = vld [vmem:[#allocation2 + $0x8e8] sm:$0xff]  ;;  %v2570_v27 = vpack.c.bf16 %v380_v18, %v370_v17  ;;  %v480_v17 = vld [vmem:[#allocation2 + $0xbb0] sm:$0xff] }
 0x140   :  { %2871 = vmatpush1.bf16.msra.mxu1 %v2870_v50  ;;  %v2572_v29 = vpack.c.bf16 %v401_v38, %v391_v19  ;;  %v1484_v50 = vld [vmem:[#allocation6 + $0x140] sm:$0xff]  ;;  %v2904_v38 = vpack.c.bf16 %v1499_v14, %v1497_v13  ;;  %v1505_v37 = vld [vmem:[#allocation6 + $0x1e8] sm:$0xff] }
 0x141   :  { %2873 = vmatprep.subr.bf16.mxu1 %v2872_v52  ;;  %v1489_v52 = vld [vmem:[#allocation6 + $0x168] sm:$0xff]  ;;  %v2894_v59 = vpack.c.bf16 %v1486_v51, %v1484_v50  ;;  %v491_v18 = vld [vmem:[#allocation2 + $0xc08] sm:$0xff]  ;;  %v1506_v50 = vld [vmem:[#allocation6 + $0x1f0] sm:$0xff] }
 0x142   :  { %2551 = vmatpush1.bf16.msra.mxu0 %v2550_v31  ;;  %v400_v31 = vld [vmem:[#allocation2 + $0x930] sm:$0xff]  ;;  %v2896_v61 = vpack.c.bf16 %v1491_v53, %v1489_v52  ;;  %v1511_v52 = vld [vmem:[#allocation6 + $0x218] sm:$0xff] }
 0x143   :  { %2553 = vmatprep.subr.bf16.mxu0 %v2552_v32  ;;  %v411_v32 = vld [vmem:[#allocation2 + $0x988] sm:$0xff]  ;;  %v2574_v42 = vpack.c.bf16 %v400_v31, %v390_v30  ;;  %v500_v30 = vld [vmem:[#allocation2 + $0xc50] sm:$0xff] }
 0x144   :  { %2875 = vmatpush1.bf16.msra.mxu1 %v2874_v62  ;;  %v2576_v43 = vpack.c.bf16 %v421_v34, %v411_v32  ;;  %v1488_v62 = vld [vmem:[#allocation6 + $0x160] sm:$0xff]  ;;  %v2908_v34 = vpack.c.bf16 %v1503_v25, %v1501_v24  ;;  %v1509_v51 = vld [vmem:[#allocation6 + $0x208] sm:$0xff] }
 0x145   :  { %2877 = vmatprep.subr.bf16.mxu1 %v2876_v0  ;;  %v1493_v0 = vld [vmem:[#allocation6 + $0x188] sm:$0xff]  ;;  %v2898_v7 = vpack.c.bf16 %v1490_v63, %v1488_v62  ;;  %v511_v31 = vld [vmem:[#allocation2 + $0xca8] sm:$0xff]  ;;  %v550_v63 = vld [vmem:[#allocation2 + $0xde0] sm:$0xff] }
 0x146   :  { %2555 = vmatpush1.bf16.msra.mxu0 %v2554_v45  ;;  %v420_v45 = vld [vmem:[#allocation2 + $0x9d0] sm:$0xff]  ;;  %v2900_v9 = vpack.c.bf16 %v1495_v1, %v1493_v0  ;;  %v571_v1 = vld [vmem:[#allocation2 + $0xe88] sm:$0xff] }
 0x147   :  { %2557 = vmatprep.subr.bf16.mxu0 %v2556_v46  ;;  %v431_v46 = vld [vmem:[#allocation2 + $0xa28] sm:$0xff]  ;;  %v2578_v54 = vpack.c.bf16 %v420_v45, %v410_v44  ;;  %v520_v44 = vld [vmem:[#allocation2 + $0xcf0] sm:$0xff] }
 0x148   :  { %2879 = vmatpush1.bf16.msra.mxu1 %v2878_v10  ;;  %v2580_v55 = vpack.c.bf16 %v441_v48, %v431_v46  ;;  %v1492_v10 = vld [vmem:[#allocation6 + $0x180] sm:$0xff]  ;;  %v2912_v48 = vpack.c.bf16 %v1507_v39, %v1505_v37 }
 0x149   :  { %2881 = vmatprep.subr.bf16.mxu1 %v2880_v12  ;;  %v3559_v12 = vld [vmem:[%s3624_s0] sm:$0xff]  ;;  %v2902_v19 = vpack.c.bf16 %v1494_v20, %v1492_v10  ;;  %v531_v45 = vld [vmem:[#allocation2 + $0xd48] sm:$0xff]  ;;  %v560_v0 = vld [vmem:[#allocation2 + $0xe30] sm:$0xff] }
 0x14a   :  { %2559 = vmatpush1.bf16.msra.mxu0 %v2558_v57  ;;  %v440_v57 = vld [vmem:[#allocation2 + $0xa70] sm:$0xff]  ;;  %v590_v20 = vld [vmem:[#allocation2 + $0xf20] sm:$0xff]  ;;  %v611_v14 = vld [vmem:[#allocation2 + $0xfc8] sm:$0xff] }
 0x14b   :  { %2561 = vmatprep.subr.bf16.mxu0 %v2560_v58  ;;  %v451_v58 = vld [vmem:[#allocation2 + $0xac8] sm:$0xff]  ;;  %v2582_v2 = vpack.c.bf16 %v440_v57, %v430_v56  ;;  %v540_v56 = vld [vmem:[#allocation2 + $0xd90] sm:$0xff] }
 0x14c   :  { %2883 = vmatpush1.bf16.msra.mxu1 %v2882_v21  ;;  %v2584_v3 = vpack.c.bf16 %v461_v60, %v451_v58  ;;  %v501_v21 = vld [vmem:[#allocation2 + $0xc58] sm:$0xff]  ;;  %v551_v58 = vld [vmem:[#allocation2 + $0xde8] sm:$0xff]  ;;  %v2916_v60 = vpack.c.bf16 %v1511_v52, %v1509_v51  ;;  %v600_v13 = vld [vmem:[#allocation2 + $0xf70] sm:$0xff] }
 0x14d   :  { %2885 = vmatprep.subr.bf16.mxu1 %v2884_v22  ;;  %v1496_v22 = vld [vmem:[#allocation6 + $0x1a0] sm:$0xff]  ;;  %v154_v51 = vld [vmem:[#allocation2 + $0x180] sm:$0xff] }
 0x14e   :  { %2563 = vmatpush1.bf16.msra.mxu0 %v2562_v5  ;;  %v460_v5 = vld [vmem:[#allocation2 + $0xb10] sm:$0xff]  ;;  %v2906_v32 = vpack.c.bf16 %v1498_v23, %v1496_v22  ;;  %v630_v23 = vld [vmem:[#allocation2 + $0x1060] sm:$0xff]  ;;  %v651_v25 = vld [vmem:[#allocation2 + $0x1108] sm:$0xff] }
 0x14f   :  { %2565 = vmatprep.subr.bf16.mxu0 %v2564_v6  ;;  %v471_v6 = vld [vmem:[#allocation2 + $0xb68] sm:$0xff]  ;;  %v2586_v15 = vpack.c.bf16 %v460_v5, %v450_v4  ;;  %v570_v5 = vld [vmem:[#allocation2 + $0xe80] sm:$0xff]  ;;  %v640_v24 = vld [vmem:[#allocation2 + $0x10b0] sm:$0xff] }
 0x150   :  { %2887 = vmatpush1.bf16.msra.mxu1 %v2886_v33  ;;  %v521_v33 = vld [vmem:[#allocation2 + $0xcf8] sm:$0xff]  ;;  %v124_v37 = vld [vmem:[#allocation2 + $0x90] sm:$0xff]  ;;  %v135_v39 = vld [vmem:[#allocation2 + $0xe8] sm:$0xff] }
 0x151   :  { %2889 = vmatprep.subr.bf16.mxu1 %v2888_v35  ;;  %v1500_v35 = vld [vmem:[#allocation6 + $0x1c0] sm:$0xff] }
 0x152   :  { %2567 = vmatpush1.bf16.msra.mxu0 %v2566_v28  ;;  %v2588_v28 = vpack.c.bf16 %v481_v8, %v471_v6  ;;  %v2910_v46 = vpack.c.bf16 %v1502_v36, %v1500_v35  ;;  %v580_v6 = vld [vmem:[#allocation2 + $0xed0] sm:$0xff]  ;;  %v601_v8 = vld [vmem:[#allocation2 + $0xf78] sm:$0xff]  ;;  %v114_v36 = vld [vmem:[#allocation2 + $0x40] sm:$0xff] }
 0x153   :  { %2569 = vmatprep.subr.bf16.mxu0 %v2568_v41  ;;  %v470_v41 = vld [vmem:[#allocation2 + $0xb60] sm:$0xff]  ;;  %v164_v52 = vld [vmem:[#allocation2 + $0x1d0] sm:$0xff] }
 0x154   :  { %2891 = vmatpush1.bf16.msra.mxu1 %v2890_v47  ;;  %v2590_v26 = vpack.c.bf16 %v480_v17, %v470_v41  ;;  %v541_v47 = vld [vmem:[#allocation2 + $0xd98] sm:$0xff]  ;;  %v610_v17 = vld [vmem:[#allocation2 + $0xfc0] sm:$0xff] }
 0x155   :  { %2893 = vmatprep.subr.bf16.mxu1 %v2892_v49  ;;  %v1504_v49 = vld [vmem:[#allocation6 + $0x1e0] sm:$0xff] }
 0x156   :  { %2571 = vmatpush1.bf16.msra.mxu0 %v2570_v27  ;;  %v2592_v27 = vpack.c.bf16 %v501_v21, %v491_v18  ;;  %v2914_v57 = vpack.c.bf16 %v1506_v50, %v1504_v49  ;;  %v620_v18 = vld [vmem:[#allocation2 + $0x1010] sm:$0xff]  ;;  %v641_v21 = vld [vmem:[#allocation2 + $0x10b8] sm:$0xff] }
 0x157   :  { %2573 = vmatprep.subr.bf16.mxu0 %v2572_v29  ;;  %v490_v29 = vld [vmem:[#allocation2 + $0xc00] sm:$0xff] }
 0x158   :  { %2895 = vmatpush1.bf16.msra.mxu1 %v2894_v59  ;;  %v2594_v40 = vpack.c.bf16 %v500_v30, %v490_v29  ;;  %v561_v59 = vld [vmem:[#allocation2 + $0xe38] sm:$0xff]  ;;  %v650_v30 = vld [vmem:[#allocation2 + $0x1100] sm:$0xff] }
 0x159   :  { %2897 = vmatprep.subr.bf16.mxu1 %v2896_v61  ;;  %v2604_v62 = vpack.c.bf16 %v561_v59, %v551_v58  ;;  %v184_v58 = vld [vmem:[#allocation2 + $0x270] sm:$0xff]  ;;  %v195_v59 = vld [vmem:[#allocation2 + $0x2c8] sm:$0xff] }
 0x15a   :  { %2575 = vmatpush1.bf16.msra.mxu0 %v2574_v42  ;;  %v2596_v42 = vpack.c.bf16 %v521_v33, %v511_v31  ;;  %v660_v31 = vld [vmem:[#allocation2 + $0x1150] sm:$0xff]  ;;  %v125_v33 = vld [vmem:[#allocation2 + $0x98] sm:$0xff] }
 0x15b   :  { %2577 = vmatprep.subr.bf16.mxu0 %v2576_v43  ;;  %v510_v43 = vld [vmem:[#allocation2 + $0xca0] sm:$0xff] }
 0x15c   :  { %2899 = vmatpush1.bf16.msra.mxu1 %v2898_v7  ;;  %v2598_v53 = vpack.c.bf16 %v520_v44, %v510_v43  ;;  %v591_v7 = vld [vmem:[#allocation2 + $0xf28] sm:$0xff]  ;;  %v134_v44 = vld [vmem:[#allocation2 + $0xe0] sm:$0xff] }
 0x15d   :  { %2901 = vmatprep.subr.bf16.mxu1 %v2900_v9  ;;  %v2610_v9 = vpack.c.bf16 %v580_v6, %v570_v5  ;;  %v2612_v10 = vpack.c.bf16 %v601_v8, %v591_v7  ;;  %v214_v6 = vld [vmem:[#allocation2 + $0x360] sm:$0xff]  ;;  %v224_v7 = vld [vmem:[#allocation2 + $0x3b0] sm:$0xff]  ;;  %v235_v8 = vld [vmem:[#allocation2 + $0x408] sm:$0xff] }
 0x15e   :  { %2579 = vmatpush1.bf16.msra.mxu0 %v2578_v54  ;;  %v2600_v54 = vpack.c.bf16 %v541_v47, %v531_v45  ;;  %v144_v45 = vld [vmem:[#allocation2 + $0x130] sm:$0xff]  ;;  %v165_v47 = vld [vmem:[#allocation2 + $0x1d8] sm:$0xff] }
 0x15f   :  { %2581 = vmatprep.subr.bf16.mxu0 %v2580_v55  ;;  %v530_v55 = vld [vmem:[#allocation2 + $0xd40] sm:$0xff]  ;;  %v2746_v49 = vpack.c.bf16 %v144_v45, %v134_v44 }
 0x160   :  { %2903 = vmatpush1.bf16.msra.mxu1 %v2902_v19  ;;  %v2602_v61 = vpack.c.bf16 %v540_v56, %v530_v55  ;;  %v631_v19 = vld [vmem:[#allocation2 + $0x1068] sm:$0xff]  ;;  %v2750_v55 = vpack.c.bf16 %v164_v52, %v154_v51  ;;  %v345_v51 = vld [vmem:[#allocation2 + $0x778] sm:$0xff] }
 0x161   :  { %1073 = vmatmul.mubr.f32.vlgmr.msra.gmra.mrb[4].mxu0 %v3559_v12  ;;  %2905 = vmatprep.subr.bf16.mxu1 %v2904_v38  ;;  %v2618_v38 = vpack.c.bf16 %v620_v18, %v610_v17  ;;  %v2620_v22 = vpack.c.bf16 %v641_v21, %v631_v19  ;;  %v254_v19 = vld [vmem:[#allocation2 + $0x4a0] sm:$0xff]  ;;  %v264_v21 = vld [vmem:[#allocation2 + $0x4f0] sm:$0xff] }
 0x162   :  { %2583 = vmatpush1.bf16.msra.mxu0 %v2582_v2  ;;  %2253 = vmatprep.mubr.msk.f32.mxu0 %vm720_vm0, %v3565_v16  ;;  %v581_v2 = vld [vmem:[#allocation2 + $0xed8] sm:$0xff] }
 0x163   :  { %2585 = vmatprep.subr.bf16.mxu0 %v2584_v3  ;;  %v2606_v3 = vpack.c.bf16 %v560_v0, %v550_v63  ;;  %v2608_v4 = vpack.c.bf16 %v581_v2, %v571_v1  ;;  %v194_v0 = vld [vmem:[#allocation2 + $0x2c0] sm:$0xff]  ;;  %v204_v1 = vld [vmem:[#allocation2 + $0x310] sm:$0xff]  ;;  %v215_v2 = vld [vmem:[#allocation2 + $0x368] sm:$0xff] }
 0x164   :  { %2907 = vmatpush1.bf16.msra.mxu1 %v2906_v32  ;;  %v115_v32 = vld [vmem:[#allocation2 + $0x48] sm:$0xff] }
 0x165   :  { %2909 = vmatprep.subr.bf16.mxu1 %v2908_v34  ;;  %v2626_v34 = vpack.c.bf16 %v660_v31, %v650_v30  ;;  %v2740_v35 = vpack.c.bf16 %v125_v33, %v115_v32  ;;  %v305_v30 = vld [vmem:[#allocation2 + $0x638] sm:$0xff]  ;;  %v3585_v33 = vld [vmem:[#allocation4] sm:$0xff] }
 0x166   :  { %2587 = vmatpush1.bf16.msra.mxu0 %v2586_v15  ;;  %v621_v15 = vld [vmem:[#allocation2 + $0x1018] sm:$0xff] }
 0x167   :  { %2589 = vmatprep.subr.bf16.mxu0 %v2588_v28  ;;  %v2614_v28 = vpack.c.bf16 %v600_v13, %v590_v20  ;;  %v2616_v41 = vpack.c.bf16 %v621_v15, %v611_v14  ;;  %v234_v13 = vld [vmem:[#allocation2 + $0x400] sm:$0xff]  ;;  %v244_v14 = vld [vmem:[#allocation2 + $0x450] sm:$0xff]  ;;  %v255_v15 = vld [vmem:[#allocation2 + $0x4a8] sm:$0xff] }
 0x168   :  { %2911 = vmatpush1.bf16.msra.mxu1 %v2910_v46  ;;  %v155_v46 = vld [vmem:[#allocation2 + $0x188] sm:$0xff]  ;;  %v2766_v17 = vpack.c.bf16 %v244_v14, %v234_v13  ;;  %v354_v13 = vld [vmem:[#allocation2 + $0x7c0] sm:$0xff]  ;;  %v364_v14 = vld [vmem:[#allocation2 + $0x810] sm:$0xff] }
 0x169   :  { %2913 = vmatprep.subr.bf16.mxu1 %v2912_v48  ;;  %v3572_v48 = vld [vmem:[%s3624_s0 + $0x10] sm:$0xff]  ;;  %v2748_v50 = vpack.c.bf16 %v165_v47, %v155_v46  ;;  %v314_v46 = vld [vmem:[#allocation2 + $0x680] sm:$0xff] }
 0x16a   :  { %2591 = vmatpush1.bf16.msra.mxu0 %v2590_v26  ;;  %v661_v26 = vld [vmem:[#allocation2 + $0x1158] sm:$0xff]  ;;  %v324_v47 = vld [vmem:[#allocation2 + $0x6d0] sm:$0xff] }
 0x16b   :  { %2593 = vmatprep.subr.bf16.mxu0 %v2592_v27  ;;  %v2622_v27 = vpack.c.bf16 %v640_v24, %v630_v23  ;;  %v2624_v29 = vpack.c.bf16 %v661_v26, %v651_v25  ;;  %v2770_v24 = vpack.c.bf16 %v264_v21, %v254_v19  ;;  %v274_v26 = vld [vmem:[#allocation2 + $0x540] sm:$0xff]  ;;  %v2790_v21 = vpack.c.bf16 %v364_v14, %v354_v13 }
 0x16c   :  { %2915 = vmatpush1.bf16.msra.mxu1 %v2914_v57  ;;  %v174_v57 = vld [vmem:[#allocation2 + $0x220] sm:$0xff] }
 0x16d   :  { %2917 = vmatprep.subr.bf16.mxu1 %v2916_v60  ;;  %v205_v60 = vld [vmem:[#allocation2 + $0x318] sm:$0xff] }
 0x16e   :  { %2595 = vmatpush1.bf16.msra.mxu0 %v2594_v40  ;;  %v145_v40 = vld [vmem:[#allocation2 + $0x138] sm:$0xff] }
 0x16f   :  { %2597 = vmatprep.subr.bf16.mxu0 %v2596_v42  ;;  %v2742_v42 = vpack.c.bf16 %v124_v37, %v114_v36  ;;  %v2744_v43 = vpack.c.bf16 %v145_v40, %v135_v39  ;;  %v294_v36 = vld [vmem:[#allocation2 + $0x5e0] sm:$0xff]  ;;  %v304_v37 = vld [vmem:[#allocation2 + $0x630] sm:$0xff]  ;;  %v315_v39 = vld [vmem:[#allocation2 + $0x688] sm:$0xff] }
 0x170   :  { %v325_v40 = vld [vmem:[#allocation2 + $0x6d8] sm:$0xff]  ;;  %v2778_v44 = vpack.c.bf16 %v304_v37, %v294_v36 }
 0x171   :  { %v2780_v45 = vpack.c.bf16 %v325_v40, %v315_v39  ;;  %v1518_v19 = vld [vmem:[#allocation6 + $0x250] sm:$0xff]  ;;  %v1525_v39 = vld [vmem:[#allocation6 + $0x288] sm:$0xff]  ;;  %v1527_v40 = vld [vmem:[#allocation6 + $0x298] sm:$0xff] }
 0x172   :  { %2599 = vmatpush1.bf16.msra.mxu0 %v2598_v53  ;;  %v175_v53 = vld [vmem:[#allocation2 + $0x228] sm:$0xff]  ;;  %v1522_v36 = vld [vmem:[#allocation6 + $0x270] sm:$0xff] }
 0x173   :  { %2601 = vmatprep.subr.bf16.mxu0 %v2600_v54  ;;  %v185_v54 = vld [vmem:[#allocation2 + $0x278] sm:$0xff] }
 0x174   :  { %v2752_v56 = vpack.c.bf16 %v185_v54, %v175_v53  ;;  %v1508_v54 = vld [vmem:[#allocation6 + $0x200] sm:$0xff]  ;;  %v1534_v13 = vld [vmem:[#allocation6 + $0x2d0] sm:$0xff] }
 0x176   :  { %2603 = vmatpush1.bf16.msra.mxu0 %v2602_v61 }
 0x177   :  { %2605 = vmatprep.subr.bf16.mxu0 %v2604_v62  ;;  %v2754_v62 = vpack.c.bf16 %v184_v58, %v174_v57  ;;  %v2782_v57 = vpack.c.bf16 %v324_v47, %v314_v46  ;;  %v1513_v58 = vld [vmem:[#allocation6 + $0x228] sm:$0xff]  ;;  %v415_v46 = vld [vmem:[#allocation2 + $0x9a8] sm:$0xff] }
 0x178   :  { %v425_v47 = vld [vmem:[#allocation2 + $0x9f8] sm:$0xff] }
 0x17a   :  { %2607 = vmatpush1.bf16.msra.mxu0 %v2606_v3  ;;  %v225_v3 = vld [vmem:[#allocation2 + $0x3b8] sm:$0xff] }
 0x17b   :  { %2609 = vmatprep.subr.bf16.mxu0 %v2608_v4  ;;  %v2758_v4 = vpack.c.bf16 %v204_v1, %v194_v0  ;;  %v2760_v5 = vpack.c.bf16 %v225_v3, %v215_v2  ;;  %v355_v2 = vld [vmem:[#allocation2 + $0x7c8] sm:$0xff]  ;;  %v365_v3 = vld [vmem:[#allocation2 + $0x818] sm:$0xff] }
 0x17e   :  { %2611 = vmatpush1.bf16.msra.mxu0 %v2610_v9  ;;  %v245_v9 = vld [vmem:[#allocation2 + $0x458] sm:$0xff] }
 0x17f   :  { %2613 = vmatprep.subr.bf16.mxu0 %v2612_v10  ;;  %v2762_v10 = vpack.c.bf16 %v224_v7, %v214_v6  ;;  %v2764_v20 = vpack.c.bf16 %v245_v9, %v235_v8  ;;  %v1512_v6 = vld [vmem:[#allocation6 + $0x220] sm:$0xff]  ;;  %v1514_v7 = vld [vmem:[#allocation6 + $0x230] sm:$0xff]  ;;  %v1517_v9 = vld [vmem:[#allocation6 + $0x248] sm:$0xff] }
 0x182   :  { %2615 = vmatpush1.bf16.msra.mxu0 %v2614_v28  ;;  %v265_v28 = vld [vmem:[#allocation2 + $0x4f8] sm:$0xff] }
 0x183   :  { %2617 = vmatprep.subr.bf16.mxu0 %v2616_v41  ;;  %v670_v41 = vlaneseq  ;;  %v2768_v18 = vpack.c.bf16 %v265_v28, %v255_v15  ;;  %v2922_v15 = vpack.c.bf16 %v1514_v7, %v1512_v6  ;;  %v375_v28 = vld [vmem:[#allocation2 + $0x868] sm:$0xff]  ;;  %v444_v6 = vld [vmem:[#allocation2 + $0xa90] sm:$0xff] }
 0x185   :  { %v3580_v23 = vshrl.u32 %v670_v41, 7  ;;  %v385_v41 = vld [vmem:[#allocation2 + $0x8b8] sm:$0xff] }
 0x186   :  { %2619 = vmatpush1.bf16.msra.mxu0 %v2618_v38  ;;  %v275_v38 = vld [vmem:[#allocation2 + $0x548] sm:$0xff] }
 0x187   :  { %2621 = vmatprep.subr.bf16.mxu0 %v2620_v22  ;;  %v3576_v61 = vpop.f32.mrb[0].mxu1  ;;  %v285_v22 = vld [vmem:[#allocation2 + $0x598] sm:$0xff]  ;;  %v3583_v31 = vsub.s32 0, %v3580_v23 }
 0x188   :  { %v3578_v63 = vpop.f32.mrb[1].mxu1  ;;  %v2772_v25 = vpack.c.bf16 %v285_v22, %v275_v38  ;;  %v1521_v38 = vld [vmem:[#allocation6 + $0x268] sm:$0xff]  ;;  %v1523_v22 = vld [vmem:[#allocation6 + $0x278] sm:$0xff] }
 0x18a   :  { %2623 = vmatpush1.bf16.msra.mxu0 %v2622_v27  ;;  %v284_v27 = vld [vmem:[#allocation2 + $0x590] sm:$0xff] }
 0x18b   :  { %2625 = vmatprep.subr.bf16.mxu0 %v2624_v29  ;;  %v295_v29 = vld [vmem:[#allocation2 + $0x5e8] sm:$0xff]  ;;  %v2774_v32 = vpack.c.bf16 %v284_v27, %v274_v26  ;;  %v384_v26 = vld [vmem:[#allocation2 + $0x8b0] sm:$0xff] }
 0x18e   :  { %2627 = vmatpush1.bf16.msra.mxu0 %v2626_v34  ;;  %v3588_v34 = vsub.s32 1, %v3580_v23 }
 0x18f   :  { %2741 = vmatprep.subr.bf16.mxu0 %v2740_v35  ;;  %v2776_v35 = vpack.c.bf16 %v305_v30, %v295_v29  ;;  %v395_v29 = vld [vmem:[#allocation2 + $0x908] sm:$0xff]  ;;  %v405_v30 = vld [vmem:[#allocation2 + $0x958] sm:$0xff] }
 0x191   :  { %1144 = vmatmul.mubr.f32.vlgmr.msra.gmra.mrb[4].mxu0 %v3572_v48 }
 0x192   :  { %2743 = vmatpush1.bf16.msra.mxu0 %v2742_v42  ;;  %1356 = vmatprep.mubr.f32.mxu0 %v3552_v11  ;;  %v2756_v11 = vpack.c.bf16 %v205_v60, %v195_v59  ;;  %v673_v42 = vrot.slane %v3585_v33, %v3583_v31  ;;  %v1515_v59 = vld [vmem:[#allocation6 + $0x238] sm:$0xff] }
 0x193   :  { %2745 = vmatprep.subr.bf16.mxu0 %v2744_v43  ;;  %v677_v43 = vrot.slane %v3585_v33, %v3588_v34 }
 0x196   :  { %2747 = vmatpush1.bf16.msra.mxu0 %v2746_v49 }
 0x197   :  { %2749 = vmatprep.subr.bf16.mxu0 %v2748_v50  ;;  %v335_v50 = vld [vmem:[#allocation2 + $0x728] sm:$0xff] }
 0x198   :  { %v2784_v60 = vpack.c.bf16 %v345_v51, %v335_v50  ;;  %v1524_v50 = vld [vmem:[#allocation6 + $0x280] sm:$0xff]  ;;  %v1526_v51 = vld [vmem:[#allocation6 + $0x290] sm:$0xff] }
 0x19a   :  { %2751 = vmatpush1.bf16.msra.mxu0 %v2750_v55  ;;  %v1510_v55 = vld [vmem:[#allocation6 + $0x210] sm:$0xff] }
 0x19b   :  { %2753 = vmatprep.subr.bf16.mxu0 %v2752_v56  ;;  %v2918_v1 = vpack.c.bf16 %v1510_v55, %v1508_v54  ;;  %v1531_v54 = vld [vmem:[#allocation6 + $0x2b8] sm:$0xff]  ;;  %v2800_v55 = vpack.c.bf16 %v425_v47, %v415_v46 }
 0x19c   :  { %v494_v47 = vld [vmem:[#allocation2 + $0xc20] sm:$0xff] }
 0x19e   :  { %2755 = vmatpush1.bf16.msra.mxu0 %v2754_v62  ;;  %v334_v62 = vld [vmem:[#allocation2 + $0x720] sm:$0xff] }
 0x19f   :  { %2757 = vmatprep.subr.bf16.mxu0 %v2756_v11  ;;  %v344_v11 = vld [vmem:[#allocation2 + $0x770] sm:$0xff] }
 0x1a0   :  { %v2786_v8 = vpack.c.bf16 %v344_v11, %v334_v62  ;;  %v1528_v11 = vld [vmem:[#allocation6 + $0x2a0] sm:$0xff] }
 0x1a2   :  { %2759 = vmatpush1.bf16.msra.mxu0 %v2758_v4 }
 0x1a3   :  { %2761 = vmatprep.subr.bf16.mxu0 %v2760_v5  ;;  %v2920_v5 = vpack.c.bf16 %v1515_v59, %v1513_v58  ;;  %v2934_v58 = vpack.c.bf16 %v1526_v51, %v1524_v50  ;;  %v435_v59 = vld [vmem:[#allocation2 + $0xa48] sm:$0xff]  ;;  %v525_v51 = vld [vmem:[#allocation2 + $0xd18] sm:$0xff] }
 0x1a4   :  { %v515_v50 = vld [vmem:[#allocation2 + $0xcc8] sm:$0xff] }
 0x1a6   :  { %2763 = vmatpush1.bf16.msra.mxu0 %v2762_v10  ;;  %v1519_v10 = vld [vmem:[#allocation6 + $0x258] sm:$0xff] }
 0x1a7   :  { %2765 = vmatprep.subr.bf16.mxu0 %v2764_v20  ;;  %v2788_v20 = vpack.c.bf16 %v365_v3, %v355_v2  ;;  %v1533_v2 = vld [vmem:[#allocation6 + $0x2c8] sm:$0xff]  ;;  %v1535_v3 = vld [vmem:[#allocation6 + $0x2d8] sm:$0xff] }
 0x1aa   :  { %2767 = vmatpush1.bf16.msra.mxu0 %v2766_v17  ;;  %v2924_v17 = vpack.c.bf16 %v1519_v10, %v1517_v9  ;;  %v465_v9 = vld [vmem:[#allocation2 + $0xb38] sm:$0xff]  ;;  %v2940_v10 = vpack.c.bf16 %v1535_v3, %v1533_v2  ;;  %v1548_v2 = vld [vmem:[#allocation6 + $0x340] sm:$0xff] }
 0x1ab   :  { %2769 = vmatprep.subr.bf16.mxu0 %v2768_v18  ;;  %v1516_v18 = vld [vmem:[#allocation6 + $0x240] sm:$0xff]  ;;  %v1550_v3 = vld [vmem:[#allocation6 + $0x350] sm:$0xff] }
 0x1ac   :  { %v2926_v27 = vpack.c.bf16 %v1518_v19, %v1516_v18  ;;  %v464_v18 = vld [vmem:[#allocation2 + $0xb30] sm:$0xff] }
 0x1ae   :  { %2771 = vmatpush1.bf16.msra.mxu0 %v2770_v24  ;;  %v2792_v24 = vpack.c.bf16 %v385_v41, %v375_v28  ;;  %v1539_v28 = vld [vmem:[#allocation6 + $0x2f8] sm:$0xff] }
 0x1af   :  { %2773 = vmatprep.subr.bf16.mxu0 %v2772_v25  ;;  %v374_v25 = vld [vmem:[#allocation2 + $0x860] sm:$0xff] }
 0x1b0   :  { %v2794_v37 = vpack.c.bf16 %v384_v26, %v374_v25  ;;  %v1538_v25 = vld [vmem:[#allocation6 + $0x2f0] sm:$0xff] }
 0x1b2   :  { %2775 = vmatpush1.bf16.msra.mxu0 %v2774_v32  ;;  %v2928_v32 = vpack.c.bf16 %v1523_v22, %v1521_v38  ;;  %v485_v38 = vld [vmem:[#allocation2 + $0xbd8] sm:$0xff] }
 0x1b3   :  { %2777 = vmatprep.subr.bf16.mxu0 %v2776_v35  ;;  %v1520_v35 = vld [vmem:[#allocation6 + $0x260] sm:$0xff] }
 0x1b4   :  { %v861_v49 = vpop.f32.mrb[0].mxu0 }
 0x1b5   :  { %v3204_v52 = vadd.f32 %v861_v49, %v673_v42  ;;  %v863_v53 = vpop.f32.mrb[1].mxu0  ;;  %v2796_v42 = vpack.c.bf16 %v405_v30, %v395_v29  ;;  %v2932_v49 = vpack.c.bf16 %v1527_v40, %v1525_v39  ;;  %v1543_v29 = vld [vmem:[#allocation6 + $0x318] sm:$0xff]  ;;  %v505_v39 = vld [vmem:[#allocation2 + $0xc78] sm:$0xff]  ;;  %v1540_v40 = vld [vmem:[#allocation6 + $0x300] sm:$0xff] }
 0x1b6   :  { %v3205_v56 = vadd.f32 %v863_v53, %v677_v43  ;;  %2779 = vmatpush1.bf16.msra.mxu0 %v2778_v44  ;;  %v394_v43 = vld [vmem:[#allocation2 + $0x900] sm:$0xff]  ;;  %v404_v44 = vld [vmem:[#allocation2 + $0x950] sm:$0xff] }
 0x1b7   :  { %2781 = vmatprep.subr.bf16.mxu0 %v2780_v45  ;;  %v1434_v4 = vmax.f32 %v3204_v52, 0.0  ;;  %v2930_v45 = vpack.c.bf16 %v1522_v36, %v1520_v35  ;;  %v2798_v52 = vpack.c.bf16 %v404_v44, %v394_v43  ;;  %v1529_v53 = vld [vmem:[#allocation6 + $0x2a8] sm:$0xff] }
 0x1b8   :  { %v1435_v0 = vmax.f32 %v3205_v56, 0.0  ;;  %v414_v56 = vld [vmem:[#allocation2 + $0x9a0] sm:$0xff]  ;;  %v2936_v62 = vpack.c.bf16 %v1531_v54, %v1529_v53  ;;  %v484_v35 = vld [vmem:[#allocation2 + $0xbd0] sm:$0xff] }
 0x1b9   :  { %v1545_v44 = vld [vmem:[#allocation6 + $0x328] sm:$0xff]  ;;  %v1544_v53 = vld [vmem:[#allocation6 + $0x320] sm:$0xff]  ;;  %v1546_v54 = vld [vmem:[#allocation6 + $0x330] sm:$0xff] }
 0x1ba   :  { %2783 = vmatpush1.bf16.msra.mxu0 %v2782_v57  ;;  %1840 = vmatprep.mubr.f32.mxu1 %v1435_v0  ;;  %v424_v57 = vld [vmem:[#allocation2 + $0x9f0] sm:$0xff]  ;;  %v1530_v0 = vld [vmem:[#allocation6 + $0x2b0] sm:$0xff] }
 0x1bb   :  { %1841 = vmatmul.mubr.f32.vlgmr.msra.gmra.mrb[4].mxu1 %v1434_v4  ;;  %2785 = vmatprep.subr.bf16.mxu0 %v2784_v60  ;;  %v445_v60 = vld [vmem:[#allocation2 + $0xa98] sm:$0xff]  ;;  %v2938_v7 = vpack.c.bf16 %v1530_v0, %v1528_v11  ;;  %v535_v11 = vld [vmem:[#allocation2 + $0xd68] sm:$0xff] }
 0x1bc   :  { %2919 = vmatpush1.bf16.msra.mxu1 %v2918_v1  ;;  %v2802_v1 = vpack.c.bf16 %v424_v57, %v414_v56  ;;  %v2804_v4 = vpack.c.bf16 %v445_v60, %v435_v59  ;;  %v1549_v56 = vld [vmem:[#allocation6 + $0x348] sm:$0xff]  ;;  %v1551_v57 = vld [vmem:[#allocation6 + $0x358] sm:$0xff] }
 0x1bd   :  { %2921 = vmatprep.subr.bf16.mxu1 %v2920_v5  ;;  %v434_v5 = vld [vmem:[#allocation2 + $0xa40] sm:$0xff]  ;;  %v524_v60 = vld [vmem:[#allocation2 + $0xd10] sm:$0xff]  ;;  %v545_v0 = vld [vmem:[#allocation2 + $0xdb8] sm:$0xff] }
 0x1be   :  { %2787 = vmatpush1.bf16.msra.mxu0 %v2786_v8  ;;  %v455_v8 = vld [vmem:[#allocation2 + $0xae8] sm:$0xff]  ;;  %v2806_v14 = vpack.c.bf16 %v444_v6, %v434_v5  ;;  %v514_v59 = vld [vmem:[#allocation2 + $0xcc0] sm:$0xff]  ;;  %v1553_v5 = vld [vmem:[#allocation6 + $0x368] sm:$0xff] }
 0x1bf   :  { %2789 = vmatprep.subr.bf16.mxu0 %v2788_v20  ;;  %v1532_v20 = vld [vmem:[#allocation6 + $0x2c0] sm:$0xff]  ;;  %v2808_v41 = vpack.c.bf16 %v465_v9, %v455_v8  ;;  %v1555_v6 = vld [vmem:[#allocation6 + $0x378] sm:$0xff] }
 0x1c0   :  { %2923 = vmatpush1.bf16.msra.mxu1 %v2922_v15  ;;  %v1537_v15 = vld [vmem:[#allocation6 + $0x2e8] sm:$0xff]  ;;  %v2942_v19 = vpack.c.bf16 %v1534_v13, %v1532_v20  ;;  %v534_v8 = vld [vmem:[#allocation2 + $0xd60] sm:$0xff]  ;;  %v555_v20 = vld [vmem:[#allocation2 + $0xe08] sm:$0xff] }
 0x1c1   :  { %2925 = vmatprep.subr.bf16.mxu1 %v2924_v17  ;;  %v454_v17 = vld [vmem:[#allocation2 + $0xae0] sm:$0xff]  ;;  %v2944_v22 = vpack.c.bf16 %v1539_v28, %v1537_v15  ;;  %v544_v9 = vld [vmem:[#allocation2 + $0xdb0] sm:$0xff]  ;;  %v565_v13 = vld [vmem:[#allocation2 + $0xe58] sm:$0xff] }
 0x1c2   :  { %2791 = vmatpush1.bf16.msra.mxu0 %v2790_v21  ;;  %v475_v21 = vld [vmem:[#allocation2 + $0xb88] sm:$0xff]  ;;  %v2810_v26 = vpack.c.bf16 %v464_v18, %v454_v17  ;;  %v1554_v28 = vld [vmem:[#allocation6 + $0x370] sm:$0xff]  ;;  %v1557_v17 = vld [vmem:[#allocation6 + $0x388] sm:$0xff] }
 0x1c3   :  { %2793 = vmatprep.subr.bf16.mxu0 %v2792_v24  ;;  %v1536_v24 = vld [vmem:[#allocation6 + $0x2e0] sm:$0xff]  ;;  %v2812_v30 = vpack.c.bf16 %v485_v38, %v475_v21  ;;  %v1559_v18 = vld [vmem:[#allocation6 + $0x398] sm:$0xff] }
 0x1c4   :  { %2927 = vmatpush1.bf16.msra.mxu1 %v2926_v27  ;;  %v1541_v27 = vld [vmem:[#allocation6 + $0x308] sm:$0xff]  ;;  %v2946_v36 = vpack.c.bf16 %v1538_v25, %v1536_v24  ;;  %v1552_v15 = vld [vmem:[#allocation6 + $0x360] sm:$0xff]  ;;  %v554_v21 = vld [vmem:[#allocation2 + $0xe00] sm:$0xff] }
 0x1c5   :  { %2929 = vmatprep.subr.bf16.mxu1 %v2928_v32  ;;  %v474_v32 = vld [vmem:[#allocation2 + $0xb80] sm:$0xff]  ;;  %v564_v38 = vld [vmem:[#allocation2 + $0xe50] sm:$0xff]  ;;  %v575_v24 = vld [vmem:[#allocation2 + $0xea8] sm:$0xff] }
 0x1c6   :  { %2795 = vmatpush1.bf16.msra.mxu0 %v2794_v37  ;;  %v495_v37 = vld [vmem:[#allocation2 + $0xc28] sm:$0xff]  ;;  %v2814_v43 = vpack.c.bf16 %v484_v35, %v474_v32  ;;  %v585_v25 = vld [vmem:[#allocation2 + $0xef8] sm:$0xff] }
 0x1c7   :  { %2797 = vmatprep.subr.bf16.mxu0 %v2796_v42  ;;  %v1542_v42 = vld [vmem:[#allocation6 + $0x310] sm:$0xff]  ;;  %v2816_v46 = vpack.c.bf16 %v505_v39, %v495_v37  ;;  %v1561_v32 = vld [vmem:[#allocation6 + $0x3a8] sm:$0xff]  ;;  %v1563_v35 = vld [vmem:[#allocation6 + $0x3b8] sm:$0xff] }
 0x1c8   :  { %2931 = vmatpush1.bf16.msra.mxu1 %v2930_v45  ;;  %v1547_v45 = vld [vmem:[#allocation6 + $0x338] sm:$0xff]  ;;  %v584_v39 = vld [vmem:[#allocation2 + $0xef0] sm:$0xff] }
 0x1c9   :  { %2933 = vmatprep.subr.bf16.mxu1 %v2932_v49  ;;  %v2950_v49 = vpack.c.bf16 %v1542_v42, %v1540_v40  ;;  %v574_v37 = vld [vmem:[#allocation2 + $0xea0] sm:$0xff]  ;;  %v595_v40 = vld [vmem:[#allocation2 + $0xf48] sm:$0xff]  ;;  %v605_v42 = vld [vmem:[#allocation2 + $0xf98] sm:$0xff] }
 0x1ca   :  { %2799 = vmatpush1.bf16.msra.mxu0 %v2798_v52  ;;  %v2952_v52 = vpack.c.bf16 %v1547_v45, %v1545_v44  ;;  %v1560_v44 = vld [vmem:[#allocation6 + $0x3a0] sm:$0xff]  ;;  %v1562_v45 = vld [vmem:[#allocation6 + $0x3b0] sm:$0xff] }
 0x1cb   :  { %2801 = vmatprep.subr.bf16.mxu0 %v2800_v55 }
 0x1cc   :  { %2935 = vmatpush1.bf16.msra.mxu1 %v2934_v58  ;;  %v2820_v58 = vpack.c.bf16 %v525_v51, %v515_v50  ;;  %v594_v50 = vld [vmem:[#allocation2 + $0xf40] sm:$0xff]  ;;  %v604_v51 = vld [vmem:[#allocation2 + $0xf90] sm:$0xff] }
 0x1cd   :  { %2937 = vmatprep.subr.bf16.mxu1 %v2936_v62  ;;  %v2954_v62 = vpack.c.bf16 %v1546_v54, %v1544_v53  ;;  %v615_v53 = vld [vmem:[#allocation2 + $0xfe8] sm:$0xff]  ;;  %v625_v54 = vld [vmem:[#allocation2 + $0x1038] sm:$0xff] }
 0x1ce   :  { %2803 = vmatpush1.bf16.msra.mxu0 %v2802_v1  ;;  %v2956_v1 = vpack.c.bf16 %v1551_v57, %v1549_v56  ;;  %v1564_v57 = vld [vmem:[#allocation6 + $0x3c0] sm:$0xff] }
 0x1cf   :  { %2805 = vmatprep.subr.bf16.mxu0 %v2804_v4  ;;  %v2822_v4 = vpack.c.bf16 %v524_v60, %v514_v59  ;;  %v2838_v59 = vpack.c.bf16 %v604_v51, %v594_v50  ;;  %v684_v60 = vsub.s32 3, %v3580_v23  ;;  %v1580_v50 = vld [vmem:[#allocation6 + $0x440] sm:$0xff]  ;;  %v1582_v51 = vld [vmem:[#allocation6 + $0x450] sm:$0xff] }
 0x1d0   :  { %2939 = vmatpush1.bf16.msra.mxu1 %v2938_v7  ;;  %v2824_v7 = vpack.c.bf16 %v545_v0, %v535_v11  ;;  %v1571_v11 = vld [vmem:[#allocation6 + $0x3f8] sm:$0xff]  ;;  %v2840_v0 = vpack.c.bf16 %v625_v54, %v615_v53  ;;  %v2990_v54 = vpack.c.bf16 %v1582_v51, %v1580_v50 }
 0x1d1   :  { %1357 = vmatmul.mubr.f32.vlgmr.msra.gmra.mrb[6].mxu0 %v3559_v12  ;;  %2941 = vmatprep.subr.bf16.mxu1 %v2940_v10  ;;  %v2948_v12 = vpack.c.bf16 %v1543_v29, %v1541_v27  ;;  %v2958_v10 = vpack.c.bf16 %v1550_v3, %v1548_v2  ;;  %v1556_v27 = vld [vmem:[#allocation6 + $0x380] sm:$0xff]  ;;  %v1558_v29 = vld [vmem:[#allocation6 + $0x390] sm:$0xff]  ;;  %v1587_v53 = vld [vmem:[#allocation6 + $0x478] sm:$0xff] }
 0x1d2   :  { %2807 = vmatpush1.bf16.msra.mxu0 %v2806_v14  ;;  %2255 = vmatprep.mubr.msk.f32.mxu0 %vm720_vm0, %v3565_v16  ;;  %v504_v16 = vld [vmem:[#allocation2 + $0xc70] sm:$0xff]  ;;  %v2960_v14 = vpack.c.bf16 %v1555_v6, %v1553_v5  ;;  %v645_v5 = vld [vmem:[#allocation2 + $0x10d8] sm:$0xff] }
 0x1d3   :  { %2809 = vmatprep.subr.bf16.mxu0 %v2808_v41  ;;  %v2818_v55 = vpack.c.bf16 %v504_v16, %v494_v47  ;;  %v2826_v41 = vpack.c.bf16 %v544_v9, %v534_v8  ;;  %v1565_v47 = vld [vmem:[#allocation6 + $0x3c8] sm:$0xff]  ;;  %v1567_v16 = vld [vmem:[#allocation6 + $0x3d8] sm:$0xff]  ;;  %v1568_v8 = vld [vmem:[#allocation6 + $0x3e0] sm:$0xff] }
 0x1d4   :  { %2943 = vmatpush1.bf16.msra.mxu1 %v2942_v19  ;;  %v2828_v19 = vpack.c.bf16 %v565_v13, %v555_v20  ;;  %v2972_v56 = vpack.c.bf16 %v1567_v16, %v1565_v47  ;;  %v624_v2 = vld [vmem:[#allocation2 + $0x1030] sm:$0xff]  ;;  %v1570_v9 = vld [vmem:[#allocation6 + $0x3f0] sm:$0xff]  ;;  %v1583_v16 = vld [vmem:[#allocation6 + $0x458] sm:$0xff] }
 0x1d5   :  { %2945 = vmatprep.subr.bf16.mxu1 %v2944_v22  ;;  %v2962_v22 = vpack.c.bf16 %v1554_v28, %v1552_v15  ;;  %v1573_v13 = vld [vmem:[#allocation6 + $0x408] sm:$0xff]  ;;  %v634_v28 = vld [vmem:[#allocation2 + $0x1080] sm:$0xff] }
 0x1d6   :  { %2811 = vmatpush1.bf16.msra.mxu0 %v2810_v26  ;;  %v2964_v26 = vpack.c.bf16 %v1559_v18, %v1557_v17  ;;  %v2978_v18 = vpack.c.bf16 %v1570_v9, %v1568_v8  ;;  %v1581_v47 = vld [vmem:[#allocation6 + $0x448] sm:$0xff]  ;;  %v1599_v9 = vld [vmem:[#allocation6 + $0x4d8] sm:$0xff] }
 0x1d7   :  { %2813 = vmatprep.subr.bf16.mxu0 %v2812_v30  ;;  %v2830_v30 = vpack.c.bf16 %v564_v38, %v554_v21  ;;  %v665_v21 = vld [vmem:[#allocation2 + $0x1178] sm:$0xff] }
 0x1d8   :  { %2947 = vmatpush1.bf16.msra.mxu1 %v2946_v36  ;;  %v2832_v36 = vpack.c.bf16 %v585_v25, %v575_v24  ;;  %v1597_v8 = vld [vmem:[#allocation6 + $0x4c8] sm:$0xff] }
 0x1d9   :  { %2949 = vmatprep.subr.bf16.mxu1 %v2948_v12  ;;  %v2966_v12 = vpack.c.bf16 %v1558_v29, %v1556_v27  ;;  %v654_v27 = vld [vmem:[#allocation2 + $0x1120] sm:$0xff] }
 0x1da   :  { %2815 = vmatpush1.bf16.msra.mxu0 %v2814_v43  ;;  %v2968_v43 = vpack.c.bf16 %v1563_v35, %v1561_v32  ;;  %v664_v32 = vld [vmem:[#allocation2 + $0x1170] sm:$0xff] }
 0x1db   :  { %2817 = vmatprep.subr.bf16.mxu0 %v2816_v46  ;;  %v2834_v46 = vpack.c.bf16 %v584_v39, %v574_v37  ;;  %v1572_v35 = vld [vmem:[#allocation6 + $0x400] sm:$0xff]  ;;  %v1577_v39 = vld [vmem:[#allocation6 + $0x428] sm:$0xff] }
 0x1dc   :  { %2951 = vmatpush1.bf16.msra.mxu1 %v2950_v49  ;;  %v2836_v49 = vpack.c.bf16 %v605_v42, %v595_v40 }
 0x1dd   :  { %2953 = vmatprep.subr.bf16.mxu1 %v2952_v52  ;;  %v2970_v52 = vpack.c.bf16 %v1562_v45, %v1560_v44 }
 0x1de   :  { %2819 = vmatpush1.bf16.msra.mxu0 %v2818_v55  ;;  %v680_v55 = vsub.s32 2, %v3580_v23 }
 0x1df   :  { %2821 = vmatprep.subr.bf16.mxu0 %v2820_v58  ;;  %v1566_v58 = vld [vmem:[#allocation6 + $0x3d0] sm:$0xff] }
 0x1e0   :  { %2955 = vmatpush1.bf16.msra.mxu1 %v2954_v62  ;;  %v1569_v62 = vld [vmem:[#allocation6 + $0x3e8] sm:$0xff]  ;;  %v2974_v3 = vpack.c.bf16 %v1566_v58, %v1564_v57  ;;  %v681_v6 = vrot.slane %v3585_v33, %v680_v55  ;;  %v1586_v57 = vld [vmem:[#allocation6 + $0x470] sm:$0xff] }
 0x1e1   :  { %2957 = vmatprep.subr.bf16.mxu1 %v2956_v1  ;;  %v614_v1 = vld [vmem:[#allocation2 + $0xfe0] sm:$0xff]  ;;  %v1589_v58 = vld [vmem:[#allocation6 + $0x488] sm:$0xff] }
 0x1e2   :  { %2823 = vmatpush1.bf16.msra.mxu0 %v2822_v4  ;;  %v635_v4 = vld [vmem:[#allocation2 + $0x1088] sm:$0xff]  ;;  %v2842_v20 = vpack.c.bf16 %v624_v2, %v614_v1  ;;  %v1593_v1 = vld [vmem:[#allocation6 + $0x4a8] sm:$0xff] }
 0x1e3   :  { %2825 = vmatprep.subr.bf16.mxu0 %v2824_v7  ;;  %v2976_v7 = vpack.c.bf16 %v1571_v11, %v1569_v62  ;;  %v2844_v15 = vpack.c.bf16 %v645_v5, %v635_v4  ;;  %v1588_v11 = vld [vmem:[#allocation6 + $0x480] sm:$0xff]  ;;  %v1595_v2 = vld [vmem:[#allocation6 + $0x4b8] sm:$0xff] }
 0x1e4   :  { %2959 = vmatpush1.bf16.msra.mxu1 %v2958_v10  ;;  %v685_v10 = vrot.slane %v3585_v33, %v684_v60  ;;  %v3000_v5 = vpack.c.bf16 %v1595_v2, %v1593_v1  ;;  %v1628_v1 = vld [vmem:[#allocation6 + $0x5c0] sm:$0xff]  ;;  %v1630_v2 = vld [vmem:[#allocation6 + $0x5d0] sm:$0xff] }
 0x1e5   :  { %2961 = vmatprep.subr.bf16.mxu1 %v2960_v14  ;;  %v1575_v14 = vld [vmem:[#allocation6 + $0x418] sm:$0xff] }
 0x1e6   :  { %2827 = vmatpush1.bf16.msra.mxu0 %v2826_v41  ;;  %v644_v41 = vld [vmem:[#allocation2 + $0x10d0] sm:$0xff]  ;;  %v2980_v24 = vpack.c.bf16 %v1575_v14, %v1573_v13  ;;  %v1598_v14 = vld [vmem:[#allocation6 + $0x4d0] sm:$0xff] }
 0x1e7   :  { %2829 = vmatprep.subr.bf16.mxu0 %v2828_v19  ;;  %v655_v19 = vld [vmem:[#allocation2 + $0x1128] sm:$0xff] }
 0x1e8   :  { %2963 = vmatpush1.bf16.msra.mxu1 %v2962_v22  ;;  %v1596_v13 = vld [vmem:[#allocation6 + $0x4c0] sm:$0xff] }
 0x1e9   :  { %2965 = vmatprep.subr.bf16.mxu1 %v2964_v26  ;;  %v2846_v26 = vpack.c.bf16 %v644_v41, %v634_v28  ;;  %v1603_v28 = vld [vmem:[#allocation6 + $0x4f8] sm:$0xff]  ;;  %v3006_v41 = vpack.c.bf16 %v1598_v14, %v1596_v13 }
 0x1ea   :  { %2831 = vmatpush1.bf16.msra.mxu0 %v2830_v30  ;;  %v2848_v30 = vpack.c.bf16 %v665_v21, %v655_v19  ;;  %v1602_v19 = vld [vmem:[#allocation6 + $0x4f0] sm:$0xff]  ;;  %v1605_v21 = vld [vmem:[#allocation6 + $0x508] sm:$0xff] }
 0x1eb   :  { %2833 = vmatprep.subr.bf16.mxu0 %v2832_v36  ;;  %v1574_v36 = vld [vmem:[#allocation6 + $0x410] sm:$0xff] }
 0x1ec   :  { %2967 = vmatpush1.bf16.msra.mxu1 %v2966_v12  ;;  %v1579_v12 = vld [vmem:[#allocation6 + $0x438] sm:$0xff]  ;;  %v2982_v44 = vpack.c.bf16 %v1574_v36, %v1572_v35  ;;  %v1608_v35 = vld [vmem:[#allocation6 + $0x520] sm:$0xff]  ;;  %v1610_v36 = vld [vmem:[#allocation6 + $0x530] sm:$0xff] }
 0x1ed   :  { %2969 = vmatprep.subr.bf16.mxu1 %v2968_v43  ;;  %v2850_v43 = vpack.c.bf16 %v664_v32, %v654_v27  ;;  %v2984_v45 = vpack.c.bf16 %v1579_v12, %v1577_v39  ;;  %v1609_v27 = vld [vmem:[#allocation6 + $0x528] sm:$0xff]  ;;  %v1615_v39 = vld [vmem:[#allocation6 + $0x558] sm:$0xff]  ;;  %v3018_v12 = vpack.c.bf16 %v1610_v36, %v1608_v35 }
 0x1ee   :  { %2835 = vmatpush1.bf16.msra.mxu0 %v2834_v46  ;;  %v1576_v46 = vld [vmem:[#allocation6 + $0x420] sm:$0xff] }
 0x1ef   :  { %2837 = vmatprep.subr.bf16.mxu0 %v2836_v49  ;;  %v2988_v49 = vpack.c.bf16 %v1583_v16, %v1581_v47  ;;  %v1616_v47 = vld [vmem:[#allocation6 + $0x560] sm:$0xff]  ;;  %v1618_v16 = vld [vmem:[#allocation6 + $0x570] sm:$0xff] }
 0x1f0   :  { %2971 = vmatpush1.bf16.msra.mxu1 %v2970_v52  ;;  %v1585_v52 = vld [vmem:[#allocation6 + $0x468] sm:$0xff]  ;;  %v3026_v50 = vpack.c.bf16 %v1618_v16, %v1616_v47 }
 0x1f1   :  { %2973 = vmatprep.subr.bf16.mxu1 %v2972_v56  ;;  %v2992_v55 = vpack.c.bf16 %v1587_v53, %v1585_v52  ;;  %v1584_v56 = vld [vmem:[#allocation6 + $0x460] sm:$0xff]  ;;  %v1622_v53 = vld [vmem:[#allocation6 + $0x590] sm:$0xff] }
 0x1f2   :  { %2839 = vmatpush1.bf16.msra.mxu0 %v2838_v59  ;;  %v1591_v59 = vld [vmem:[#allocation6 + $0x498] sm:$0xff]  ;;  %v2994_v60 = vpack.c.bf16 %v1586_v57, %v1584_v56  ;;  %v1620_v52 = vld [vmem:[#allocation6 + $0x580] sm:$0xff]  ;;  %v2134_v16 = vld [vmem:[#allocation9 + $0x8] sm:$0xff] }
 0x1f3   :  { %2841 = vmatprep.subr.bf16.mxu0 %v2840_v0  ;;  %v2996_v62 = vpack.c.bf16 %v1591_v59, %v1589_v58  ;;  %v1590_v0 = vld [vmem:[#allocation6 + $0x490] sm:$0xff]  ;;  %v3030_v56 = vpack.c.bf16 %v1622_v53, %v1620_v52  ;;  %v1624_v58 = vld [vmem:[#allocation6 + $0x5a0] sm:$0xff] }
 0x1f4   :  { %v932_v17 = vpop.f32.mrb[2].mxu0  ;;  %2975 = vmatpush1.bf16.msra.mxu1 %v2974_v3  ;;  %v1626_v59 = vld [vmem:[#allocation6 + $0x5b0] sm:$0xff] }
 0x1f5   :  { %v933_v38 = vadd.f32 %v932_v17, %v681_v6  ;;  %v934_v22 = vpop.f32.mrb[3].mxu0  ;;  %2977 = vmatprep.subr.bf16.mxu1 %v2976_v7  ;;  %v1592_v6 = vld [vmem:[#allocation6 + $0x4a0] sm:$0xff]  ;;  %v1594_v7 = vld [vmem:[#allocation6 + $0x4b0] sm:$0xff] }
 0x1f6   :  { %v935_v25 = vadd.f32 %v934_v22, %v685_v10  ;;  %2843 = vmatpush1.bf16.msra.mxu0 %v2842_v20  ;;  %v3002_v10 = vpack.c.bf16 %v1594_v7, %v1592_v6  ;;  %v3004_v20 = vpack.c.bf16 %v1599_v9, %v1597_v8  ;;  %v3038_v6 = vpack.c.bf16 %v1630_v2, %v1628_v1  ;;  %v1632_v8 = vld [vmem:[#allocation6 + $0x5e0] sm:$0xff]  ;;  %v1634_v9 = vld [vmem:[#allocation6 + $0x5f0] sm:$0xff] }
 0x1f7   :  { %v1004_v29 = vadd.f32 %v3576_v61, %v933_v38  ;;  %2845 = vmatprep.subr.bf16.mxu0 %v2844_v15  ;;  %v1578_v61 = vld [vmem:[#allocation6 + $0x430] sm:$0xff]  ;;  %v1601_v15 = vld [vmem:[#allocation6 + $0x4e8] sm:$0xff]  ;;  %v1607_v38 = vld [vmem:[#allocation6 + $0x518] sm:$0xff]  ;;  %v3042_v13 = vpack.c.bf16 %v1634_v9, %v1632_v8 }
 0x1f8   :  { %v1006_v37 = vadd.f32 %v3578_v63, %v935_v25  ;;  %2979 = vmatpush1.bf16.msra.mxu1 %v2978_v18  ;;  %v2986_v63 = vpack.c.bf16 %v1578_v61, %v1576_v46  ;;  %v3008_v17 = vpack.c.bf16 %v1603_v28, %v1601_v15  ;;  %v1600_v18 = vld [vmem:[#allocation6 + $0x4e0] sm:$0xff]  ;;  %v688_v15 = vsub.s32 4, %v3580_v23  ;;  %v2135_v53 = vld [vmem:[#allocation9 + $0x10] sm:$0xff]  ;;  %v2138_v1 = vld [vmem:[#allocation9 + $0x28] sm:$0xff] }
 0x1f9   :  { %v1436_v40 = vmax.f32 %v1004_v29, 0.0  ;;  %2981 = vmatprep.subr.bf16.mxu1 %v2980_v24  ;;  %v3010_v22 = vpack.c.bf16 %v1602_v19, %v1600_v18  ;;  %v3012_v24 = vpack.c.bf16 %v1607_v38, %v1605_v21  ;;  %v1604_v25 = vld [vmem:[#allocation6 + $0x500] sm:$0xff]  ;;  %v1611_v29 = vld [vmem:[#allocation6 + $0x538] sm:$0xff]  ;;  %v700_v28 = vsub.s32 7, %v3580_v23 }
 0x1fa   :  { %v1437_v42 = vmax.f32 %v1006_v37, 0.0  ;;  %2847 = vmatpush1.bf16.msra.mxu0 %v2846_v26  ;;  %v1606_v26 = vld [vmem:[#allocation6 + $0x510] sm:$0xff]  ;;  %v3016_v32 = vpack.c.bf16 %v1611_v29, %v1609_v27  ;;  %v1613_v37 = vld [vmem:[#allocation6 + $0x548] sm:$0xff]  ;;  %v1655_v8 = vld [vmem:[#allocation6 + $0x698] sm:$0xff] }
 0x1fb   :  { %2849 = vmatprep.subr.bf16.mxu0 %v2848_v30  ;;  %v3014_v30 = vpack.c.bf16 %v1606_v26, %v1604_v25  ;;  %v701_v18 = vrot.slane %v3585_v33, %v700_v28  ;;  %v1638_v25 = vld [vmem:[#allocation6 + $0x610] sm:$0xff]  ;;  %v1641_v29 = vld [vmem:[#allocation6 + $0x628] sm:$0xff] }
 0x1fc   :  { %1911 = vmatprep.mubr.f32.mxu1 %v1437_v42  ;;  %v1612_v42 = vld [vmem:[#allocation6 + $0x540] sm:$0xff] }
 0x1fd   :  { %1912 = vmatmul.mubr.f32.vlgmr.msra.gmra.mrb[4].mxu1 %v1436_v40  ;;  %v3020_v40 = vpack.c.bf16 %v1615_v39, %v1613_v37  ;;  %v1640_v39 = vld [vmem:[#allocation6 + $0x620] sm:$0xff] }
 0x1fe   :  { %2851 = vmatpush1.bf16.msra.mxu0 %v2850_v43  ;;  %2983 = vmatpush1.bf16.msra.mxu1 %v2982_v44  ;;  %v1614_v43 = vld [vmem:[#allocation6 + $0x550] sm:$0xff]  ;;  %v1617_v44 = vld [vmem:[#allocation6 + $0x568] sm:$0xff] }
 0x1ff   :  { %2985 = vmatprep.subr.bf16.mxu1 %v2984_v45  ;;  %v1619_v45 = vld [vmem:[#allocation6 + $0x578] sm:$0xff]  ;;  %v3022_v46 = vpack.c.bf16 %v1614_v43, %v1612_v42  ;;  %v1645_v42 = vld [vmem:[#allocation6 + $0x648] sm:$0xff]  ;;  %v1644_v43 = vld [vmem:[#allocation6 + $0x640] sm:$0xff] }
 0x200   :  { %v3024_v61 = vpack.c.bf16 %v1619_v45, %v1617_v44  ;;  %v1646_v44 = vld [vmem:[#allocation6 + $0x650] sm:$0xff]  ;;  %v2149_v45 = vld [vmem:[#allocation9 + $0x80] sm:$0xff] }
 0x201   :  { %1428 = vmatmul.mubr.f32.vlgmr.msra.gmra.mrb[6].mxu0 %v3572_v48  ;;  %v2998_v48 = vpack.c.bf16 %v1590_v0, %v1588_v11  ;;  %v3034_v11 = vpack.c.bf16 %v1626_v59, %v1624_v58  ;;  %v2154_v58 = vld [vmem:[#allocation9 + $0xa8] sm:$0xff] }
 0x202   :  { %2987 = vmatpush1.bf16.msra.mxu1 %v2986_v63  ;;  %v3604_v3 = vpop.f32.mrb[2].mxu1  ;;  %v1621_v63 = vld [vmem:[#allocation6 + $0x588] sm:$0xff] }
 0x203   :  { %2989 = vmatprep.subr.bf16.mxu1 %v2988_v49  ;;  %v3606_v4 = vpop.f32.mrb[3].mxu1  ;;  %v1623_v49 = vld [vmem:[#allocation6 + $0x598] sm:$0xff] }
 0x204   :  { %v3028_v51 = vpack.c.bf16 %v1623_v49, %v1621_v63  ;;  %v3213_v26 = vadd.f32 %v3606_v4, %v701_v18  ;;  %v2151_v63 = vld [vmem:[#allocation9 + $0x90] sm:$0xff]  ;;  %v2152_v49 = vld [vmem:[#allocation9 + $0x98] sm:$0xff]  ;;  %v2158_v18 = vld [vmem:[#allocation9 + $0xc8] sm:$0xff] }
 0x205   :  { %v3176_v52 = vpack.c.bf16 %v2152_v49, %v2151_v63 }
 0x206   :  { %2991 = vmatpush1.bf16.msra.mxu1 %v2990_v54  ;;  %v1625_v54 = vld [vmem:[#allocation6 + $0x5a8] sm:$0xff] }
 0x207   :  { %2993 = vmatprep.subr.bf16.mxu1 %v2992_v55  ;;  %v1627_v55 = vld [vmem:[#allocation6 + $0x5b8] sm:$0xff] }
 0x208   :  { %v3032_v57 = vpack.c.bf16 %v1627_v55, %v1625_v54  ;;  %v2136_v54 = vld [vmem:[#allocation9 + $0x18] sm:$0xff]  ;;  %v2153_v55 = vld [vmem:[#allocation9 + $0xa0] sm:$0xff] }
 0x209   :  { %v3178_v59 = vpack.c.bf16 %v2136_v54, %v2135_v53  ;;  %v1669_v53 = vld [vmem:[#allocation6 + $0x708] sm:$0xff]  ;;  %v1671_v54 = vld [vmem:[#allocation6 + $0x718] sm:$0xff] }
 0x20a   :  { %2995 = vmatpush1.bf16.msra.mxu1 %v2994_v60  ;;  %v1629_v60 = vld [vmem:[#allocation6 + $0x5c8] sm:$0xff] }
 0x20b   :  { %2997 = vmatprep.subr.bf16.mxu1 %v2996_v62  ;;  %v1631_v62 = vld [vmem:[#allocation6 + $0x5d8] sm:$0xff] }
 0x20c   :  { %v3036_v0 = vpack.c.bf16 %v1631_v62, %v1629_v60  ;;  %v3054_v60 = vpack.c.bf16 %v1646_v44, %v1644_v43  ;;  %v1648_v62 = vld [vmem:[#allocation6 + $0x660] sm:$0xff] }
 0x20d   :  { %v2144_v43 = vld [vmem:[#allocation9 + $0x58] sm:$0xff] }
 0x20e   :  { %2999 = vmatpush1.bf16.msra.mxu1 %v2998_v48  ;;  %v1633_v48 = vld [vmem:[#allocation6 + $0x5e8] sm:$0xff] }
 0x20f   :  { %3001 = vmatprep.subr.bf16.mxu1 %v3000_v5  ;;  %v1635_v5 = vld [vmem:[#allocation6 + $0x5f8] sm:$0xff] }
 0x210   :  { %v3040_v7 = vpack.c.bf16 %v1635_v5, %v1633_v48  ;;  %v1650_v48 = vld [vmem:[#allocation6 + $0x670] sm:$0xff] }
 0x211   :  { %v2155_v5 = vld [vmem:[#allocation9 + $0xb0] sm:$0xff] }
 0x212   :  { %3003 = vmatpush1.bf16.msra.mxu1 %v3002_v10  ;;  %v1637_v10 = vld [vmem:[#allocation6 + $0x608] sm:$0xff] }
 0x213   :  { %3005 = vmatprep.subr.bf16.mxu1 %v3004_v20  ;;  %v1639_v20 = vld [vmem:[#allocation6 + $0x618] sm:$0xff] }
 0x214   :  { %v3044_v14 = vpack.c.bf16 %v1639_v20, %v1637_v10  ;;  %v3058_v10 = vpack.c.bf16 %v1650_v48, %v1648_v62  ;;  %v1652_v20 = vld [vmem:[#allocation6 + $0x680] sm:$0xff]  ;;  %v1679_v48 = vld [vmem:[#allocation6 + $0x758] sm:$0xff] }
 0x216   :  { %3007 = vmatpush1.bf16.msra.mxu1 %v3006_v41  ;;  %v692_v41 = vsub.s32 5, %v3580_v23 }
 0x217   :  { %3009 = vmatprep.subr.bf16.mxu1 %v3008_v17  ;;  %v689_v17 = vrot.slane %v3585_v33, %v688_v15  ;;  %v2140_v15 = vld [vmem:[#allocation9 + $0x38] sm:$0xff] }
 0x218   :  { %v693_v19 = vrot.slane %v3585_v33, %v692_v41  ;;  %v1647_v33 = vld [vmem:[#allocation6 + $0x658] sm:$0xff]  ;;  %v1654_v41 = vld [vmem:[#allocation6 + $0x690] sm:$0xff] }
 0x21a   :  { %3011 = vmatpush1.bf16.msra.mxu1 %v3010_v22 }
 0x21b   :  { %3013 = vmatprep.subr.bf16.mxu1 %v3012_v24  ;;  %v1636_v24 = vld [vmem:[#allocation6 + $0x600] sm:$0xff] }
 0x21c   :  { %v3046_v35 = vpack.c.bf16 %v1638_v25, %v1636_v24  ;;  %v1656_v24 = vld [vmem:[#allocation6 + $0x6a0] sm:$0xff] }
 0x21e   :  { %3015 = vmatpush1.bf16.msra.mxu1 %v3014_v30  ;;  %v1643_v30 = vld [vmem:[#allocation6 + $0x638] sm:$0xff] }
 0x21f   :  { %3017 = vmatprep.subr.bf16.mxu1 %v3016_v32  ;;  %v3048_v37 = vpack.c.bf16 %v1643_v30, %v1641_v29  ;;  %v1658_v30 = vld [vmem:[#allocation6 + $0x6b0] sm:$0xff] }
 0x222   :  { %3019 = vmatpush1.bf16.msra.mxu1 %v3018_v12  ;;  %v1642_v12 = vld [vmem:[#allocation6 + $0x630] sm:$0xff] }
 0x223   :  { %3021 = vmatprep.subr.bf16.mxu1 %v3020_v40  ;;  %v1441_v40 = vmax.f32 %v3213_v26, 0.0  ;;  %v3050_v4 = vpack.c.bf16 %v1642_v12, %v1640_v39  ;;  %v2141_v26 = vld [vmem:[#allocation9 + $0x40] sm:$0xff]  ;;  %v3066_v12 = vpack.c.bf16 %v1658_v30, %v1656_v24  ;;  %v1695_v30 = vld [vmem:[#allocation6 + $0x7d8] sm:$0xff] }
 0x226   :  { %3023 = vmatpush1.bf16.msra.mxu1 %v3022_v46  ;;  %v2150_v46 = vld [vmem:[#allocation9 + $0x88] sm:$0xff] }
 0x227   :  { %3025 = vmatprep.subr.bf16.mxu1 %v3024_v61  ;;  %v2133_v61 = vld [vmem:[#allocation9] sm:$0xff]  ;;  %v3172_v47 = vpack.c.bf16 %v2150_v46, %v2149_v45  ;;  %v1662_v45 = vld [vmem:[#allocation6 + $0x6d0] sm:$0xff] }
 0x228   :  { %v2161_v46 = vld [vmem:[#allocation9 + $0xe0] sm:$0xff] }
 0x229   :  { %3173 = vmatprep.subr.bf16.mxu0 %v3172_v47  ;;  %v1667_v47 = vld [vmem:[#allocation6 + $0x6f8] sm:$0xff] }
 0x22a   :  { %3027 = vmatpush1.bf16.msra.mxu1 %v3026_v50  ;;  %v3052_v50 = vpack.c.bf16 %v1647_v33, %v1645_v42  ;;  %v2143_v33 = vld [vmem:[#allocation9 + $0x50] sm:$0xff] }
 0x22b   :  { %3029 = vmatprep.subr.bf16.mxu1 %v3028_v51  ;;  %v3174_v51 = vpack.c.bf16 %v2134_v16, %v2133_v61  ;;  %v2162_v61 = vld [vmem:[#allocation9 + $0xe8] sm:$0xff]  ;;  %v3194_v16 = vpack.c.bf16 %v2144_v43, %v2143_v33  ;;  %v3250_v33 = vld [vmem:[#allocation4] sm:$0xff] }
 0x22c   :  { %v3196_v49 = vpack.c.bf16 %v2162_v61, %v2161_v46  ;;  %v1698_v46 = vld [vmem:[#allocation6 + $0x7f0] sm:$0xff]  ;;  %v1701_v61 = vld [vmem:[#allocation6 + $0x808] sm:$0xff] }
 0x22d   :  { %3175 = vmatpush3.bf16.msra.mxu0 %v3174_v51  ;;  %v1664_v51 = vld [vmem:[#allocation6 + $0x6e0] sm:$0xff] }
 0x22e   :  { %3031 = vmatpush1.bf16.msra.mxu1 %v3030_v56  ;;  %v1649_v56 = vld [vmem:[#allocation6 + $0x668] sm:$0xff]  ;;  %3177 = vmatprep.subr.bf16.mxu0 %v3176_v52  ;;  %v1666_v52 = vld [vmem:[#allocation6 + $0x6f0] sm:$0xff] }
 0x22f   :  { %3033 = vmatprep.subr.bf16.mxu1 %v3032_v57  ;;  %v1651_v57 = vld [vmem:[#allocation6 + $0x678] sm:$0xff] }
 0x230   :  { %v3056_v2 = vpack.c.bf16 %v1651_v57, %v1649_v56  ;;  %v3076_v56 = vpack.c.bf16 %v1671_v54, %v1669_v53  ;;  %v1668_v57 = vld [vmem:[#allocation6 + $0x700] sm:$0xff] }
 0x231   :  { %3179 = vmatpush3.bf16.msra.mxu0 %v3178_v59  ;;  %v1673_v59 = vld [vmem:[#allocation6 + $0x728] sm:$0xff] }
 0x232   :  { %3035 = vmatpush1.bf16.msra.mxu1 %v3034_v11  ;;  %v3180_v11 = vpack.c.bf16 %v2154_v58, %v2153_v55  ;;  %v3074_v55 = vpack.c.bf16 %v1666_v52, %v1664_v51  ;;  %v1670_v58 = vld [vmem:[#allocation6 + $0x710] sm:$0xff]  ;;  %v1707_v51 = vld [vmem:[#allocation6 + $0x838] sm:$0xff] }
 0x233   :  { %3037 = vmatprep.subr.bf16.mxu1 %v3036_v0  ;;  %v2137_v0 = vld [vmem:[#allocation9 + $0x20] sm:$0xff]  ;;  %v3078_v62 = vpack.c.bf16 %v1670_v58, %v1668_v57  ;;  %v1711_v58 = vld [vmem:[#allocation6 + $0x858] sm:$0xff] }
 0x234   :  { %v3182_v9 = vpack.c.bf16 %v2138_v1, %v2137_v0  ;;  %3181 = vmatprep.subr.bf16.mxu0 %v3180_v11  ;;  %v1672_v0 = vld [vmem:[#allocation6 + $0x720] sm:$0xff]  ;;  %v1674_v1 = vld [vmem:[#allocation6 + $0x730] sm:$0xff]  ;;  %v1709_v57 = vld [vmem:[#allocation6 + $0x848] sm:$0xff] }
 0x236   :  { %3039 = vmatpush1.bf16.msra.mxu1 %v3038_v6  ;;  %v2156_v6 = vld [vmem:[#allocation9 + $0xb8] sm:$0xff]  ;;  %3183 = vmatpush3.bf16.msra.mxu0 %v3182_v9  ;;  %v1681_v9 = vld [vmem:[#allocation6 + $0x768] sm:$0xff] }
 0x237   :  { %3041 = vmatprep.subr.bf16.mxu1 %v3040_v7  ;;  %v1653_v7 = vld [vmem:[#allocation6 + $0x688] sm:$0xff] }
 0x238   :  { %v3060_v28 = vpack.c.bf16 %v1655_v8, %v1653_v7  ;;  %v1676_v7 = vld [vmem:[#allocation6 + $0x740] sm:$0xff]  ;;  %v1678_v8 = vld [vmem:[#allocation6 + $0x750] sm:$0xff] }
 0x23a   :  { %3043 = vmatpush1.bf16.msra.mxu1 %v3042_v13  ;;  %v3184_v13 = vpack.c.bf16 %v2156_v6, %v2155_v5  ;;  %v3082_v5 = vpack.c.bf16 %v1674_v1, %v1672_v0  ;;  %v1715_v0 = vld [vmem:[#allocation6 + $0x878] sm:$0xff] }
 0x23b   :  { %3045 = vmatprep.subr.bf16.mxu1 %v3044_v14  ;;  %v2139_v14 = vld [vmem:[#allocation9 + $0x30] sm:$0xff] }
 0x23c   :  { %3185 = vmatprep.subr.bf16.mxu0 %v3184_v13 }
 0x264   :  { %v1145_v21 = vpop.f32.mrb[4].mxu0 }
 0x265   :  { %v3210_v38 = vadd.f32 %v1145_v21, %v689_v17  ;;  %v1147_v22 = vpop.f32.mrb[5].mxu0  ;;  %v2157_v17 = vld [vmem:[#allocation9 + $0xc0] sm:$0xff]  ;;  %v1659_v21 = vld [vmem:[#allocation6 + $0x6b8] sm:$0xff] }
 0x266   :  { %v3211_v27 = vadd.f32 %v1147_v22, %v693_v19  ;;  %v1657_v19 = vld [vmem:[#allocation6 + $0x6a8] sm:$0xff]  ;;  %v3062_v22 = vpack.c.bf16 %v1654_v41, %v1652_v20  ;;  %v3188_v25 = vpack.c.bf16 %v2158_v18, %v2157_v17  ;;  %v3086_v20 = vpack.c.bf16 %v1678_v8, %v1676_v7  ;;  %v1687_v41 = vld [vmem:[#allocation6 + $0x798] sm:$0xff] }
 0x267   :  { %v1438_v36 = vmax.f32 %v3210_v38, 0.0  ;;  %v3186_v38 = vpack.c.bf16 %v2140_v15, %v2139_v14  ;;  %v3064_v29 = vpack.c.bf16 %v1659_v21, %v1657_v19  ;;  %v1680_v14 = vld [vmem:[#allocation6 + $0x760] sm:$0xff]  ;;  %v1682_v15 = vld [vmem:[#allocation6 + $0x770] sm:$0xff]  ;;  %v1719_v7 = vld [vmem:[#allocation6 + $0x898] sm:$0xff] }
 0x268   :  { %v1439_v32 = vmax.f32 %v3211_v27, 0.0  ;;  %v2142_v27 = vld [vmem:[#allocation9 + $0x48] sm:$0xff]  ;;  %v3090_v17 = vpack.c.bf16 %v1682_v15, %v1680_v14  ;;  %v1684_v19 = vld [vmem:[#allocation6 + $0x780] sm:$0xff]  ;;  %v1723_v14 = vld [vmem:[#allocation6 + $0x8b8] sm:$0xff] }
 0x269   :  { %3187 = vmatpush3.bf16.msra.mxu0 %v3186_v38  ;;  %v3190_v39 = vpack.c.bf16 %v2142_v27, %v2141_v26  ;;  %v1686_v21 = vld [vmem:[#allocation6 + $0x790] sm:$0xff]  ;;  %v1689_v38 = vld [vmem:[#allocation6 + $0x7a8] sm:$0xff]  ;;  %v1688_v26 = vld [vmem:[#allocation6 + $0x7a0] sm:$0xff] }
 0x26a   :  { %1982 = vmatprep.mubr.f32.mxu1 %v1439_v32  ;;  %v2159_v32 = vld [vmem:[#allocation9 + $0xd0] sm:$0xff]  ;;  %3189 = vmatprep.subr.bf16.mxu0 %v3188_v25  ;;  %v3094_v24 = vpack.c.bf16 %v1686_v21, %v1684_v19 }
 0x26b   :  { %1983 = vmatmul.mubr.f32.vlgmr.msra.gmra.mrb[4].mxu1 %v1438_v36  ;;  %v1661_v36 = vld [vmem:[#allocation6 + $0x6c8] sm:$0xff]  ;;  %v1690_v27 = vld [vmem:[#allocation6 + $0x7b0] sm:$0xff]  ;;  %v1727_v19 = vld [vmem:[#allocation6 + $0x8d8] sm:$0xff] }
 0x26c   :  { %3047 = vmatpush1.bf16.msra.mxu1 %v3046_v35  ;;  %2053 = vmatprep.mubr.f32.mxu1 %v1441_v40  ;;  %v2160_v35 = vld [vmem:[#allocation9 + $0xd8] sm:$0xff] }
 0x26d   :  { %3049 = vmatprep.subr.bf16.mxu1 %v3048_v37  ;;  %v1663_v37 = vld [vmem:[#allocation6 + $0x6d8] sm:$0xff]  ;;  %v1660_v40 = vld [vmem:[#allocation6 + $0x6c0] sm:$0xff]  ;;  %v3192_v42 = vpack.c.bf16 %v2160_v35, %v2159_v32  ;;  %3191 = vmatpush3.bf16.msra.mxu0 %v3190_v39  ;;  %v3098_v32 = vpack.c.bf16 %v1690_v27, %v1688_v26  ;;  %v696_v35 = vsub.s32 6, %v3580_v23  ;;  %v1694_v39 = vld [vmem:[#allocation6 + $0x7d0] sm:$0xff] }
 0x26e   :  { %v3068_v44 = vpack.c.bf16 %v1663_v37, %v1661_v36  ;;  %v3070_v63 = vpack.c.bf16 %v1662_v45, %v1660_v40  ;;  %v1692_v37 = vld [vmem:[#allocation6 + $0x7c0] sm:$0xff]  ;;  %v1699_v40 = vld [vmem:[#allocation6 + $0x7f8] sm:$0xff] }
 0x26f   :  { %3193 = vmatprep.subr.bf16.mxu0 %v3192_v42  ;;  %v3102_v42 = vpack.c.bf16 %v1694_v39, %v1692_v37  ;;  %v697_v43 = vrot.slane %v3250_v33, %v696_v35  ;;  %v1696_v45 = vld [vmem:[#allocation6 + $0x7e0] sm:$0xff]  ;;  %v1731_v26 = vld [vmem:[#allocation6 + $0x8f8] sm:$0xff]  ;;  %v1733_v35 = vld [vmem:[#allocation6 + $0x908] sm:$0xff] }
 0x270   :  { %3051 = vmatpush1.bf16.msra.mxu1 %v3050_v4  ;;  %v1665_v4 = vld [vmem:[#allocation6 + $0x6e8] sm:$0xff]  ;;  %v1739_v33 = vld [vmem:[#allocation6 + $0x938] sm:$0xff] }
 0x271   :  { %3053 = vmatprep.subr.bf16.mxu1 %v3052_v50  ;;  %v3072_v50 = vpack.c.bf16 %v1667_v47, %v1665_v4  ;;  %3195 = vmatpush3.bf16.msra.mxu0 %v3194_v16  ;;  %v1703_v4 = vld [vmem:[#allocation6 + $0x818] sm:$0xff]  ;;  %v3106_v47 = vpack.c.bf16 %v1698_v46, %v1696_v45  ;;  %v3212_v23 = vadd.f32 %v3604_v3, %v697_v43  ;;  %v1736_v45 = vld [vmem:[#allocation6 + $0x920] sm:$0xff]  ;;  %v1738_v46 = vld [vmem:[#allocation6 + $0x930] sm:$0xff] }
 0x272   :  { %3197 = vmatprep.subr.bf16.mxu0 %v3196_v49  ;;  %v3108_v16 = vpack.c.bf16 %v1703_v4, %v1701_v61  ;;  %v1702_v49 = vld [vmem:[#allocation6 + $0x810] sm:$0xff]  ;;  %v3116_v3 = vpack.c.bf16 %v1711_v58, %v1709_v57  ;;  %v1741_v61 = vld [vmem:[#allocation6 + $0x948] sm:$0xff]  ;;  %v1743_v4 = vld [vmem:[#allocation6 + $0x958] sm:$0xff] }
 0x273   :  { %v1440_v53 = vmax.f32 %v3212_v23, 0.0  ;;  %v3148_v23 = vpack.c.bf16 %v1743_v4, %v1741_v61  ;;  %v1749_v57 = vld [vmem:[#allocation6 + $0x988] sm:$0xff]  ;;  %v1751_v58 = vld [vmem:[#allocation6 + $0x998] sm:$0xff] }
 0x274   :  { %3055 = vmatpush1.bf16.msra.mxu1 %v3054_v60  ;;  %v1675_v60 = vld [vmem:[#allocation6 + $0x738] sm:$0xff] }
 0x275   :  { %3057 = vmatprep.subr.bf16.mxu1 %v3056_v2  ;;  %v3080_v11 = vpack.c.bf16 %v1675_v60, %v1673_v59  ;;  %v1677_v2 = vld [vmem:[#allocation6 + $0x748] sm:$0xff]  ;;  %v1708_v60 = vld [vmem:[#allocation6 + $0x840] sm:$0xff] }
 0x276   :  { %v3084_v6 = vpack.c.bf16 %v1679_v48, %v1677_v2  ;;  %v1712_v48 = vld [vmem:[#allocation6 + $0x860] sm:$0xff] }
 0x278   :  { %3059 = vmatpush1.bf16.msra.mxu1 %v3058_v10  ;;  %v1683_v10 = vld [vmem:[#allocation6 + $0x778] sm:$0xff] }
 0x279   :  { %3061 = vmatprep.subr.bf16.mxu1 %v3060_v28  ;;  %v3088_v13 = vpack.c.bf16 %v1683_v10, %v1681_v9  ;;  %v1685_v28 = vld [vmem:[#allocation6 + $0x788] sm:$0xff]  ;;  %v1716_v10 = vld [vmem:[#allocation6 + $0x880] sm:$0xff] }
 0x27a   :  { %v3092_v18 = vpack.c.bf16 %v1687_v41, %v1685_v28  ;;  %v1720_v41 = vld [vmem:[#allocation6 + $0x8a0] sm:$0xff] }
 0x27c   :  { %3063 = vmatpush1.bf16.msra.mxu1 %v3062_v22  ;;  %v1691_v22 = vld [vmem:[#allocation6 + $0x7b8] sm:$0xff] }
 0x27d   :  { %3065 = vmatprep.subr.bf16.mxu1 %v3064_v29  ;;  %v3096_v25 = vpack.c.bf16 %v1691_v22, %v1689_v38  ;;  %v1693_v29 = vld [vmem:[#allocation6 + $0x7c8] sm:$0xff]  ;;  %v1724_v22 = vld [vmem:[#allocation6 + $0x8c0] sm:$0xff] }
 0x27e   :  { %v3100_v36 = vpack.c.bf16 %v1695_v30, %v1693_v29  ;;  %v1728_v30 = vld [vmem:[#allocation6 + $0x8e0] sm:$0xff] }
 0x280   :  { %3067 = vmatpush1.bf16.msra.mxu1 %v3066_v12  ;;  %v1697_v12 = vld [vmem:[#allocation6 + $0x7e8] sm:$0xff] }
 0x281   :  { %3069 = vmatprep.subr.bf16.mxu1 %v3068_v44  ;;  %v3104_v44 = vpack.c.bf16 %v1699_v40, %v1697_v12  ;;  %v1732_v12 = vld [vmem:[#allocation6 + $0x900] sm:$0xff]  ;;  %v1734_v40 = vld [vmem:[#allocation6 + $0x910] sm:$0xff] }
 0x282   :  { %v3142_v43 = vpack.c.bf16 %v1734_v40, %v1732_v12  ;;  %v1764_v40 = vld [vmem:[#allocation7] sm:$0x3] }
 0x284   :  { %3071 = vmatpush1.bf16.msra.mxu1 %v3070_v63  ;;  %v1700_v63 = vld [vmem:[#allocation6 + $0x800] sm:$0xff] }
 0x285   :  { %3073 = vmatprep.subr.bf16.mxu1 %v3072_v50  ;;  %v1705_v50 = vld [vmem:[#allocation6 + $0x828] sm:$0xff]  ;;  %v3110_v52 = vpack.c.bf16 %v1702_v49, %v1700_v63  ;;  %v1742_v63 = vld [vmem:[#allocation6 + $0x950] sm:$0xff] }
 0x286   :  { %v3112_v54 = vpack.c.bf16 %v1707_v51, %v1705_v50  ;;  %v1745_v49 = vld [vmem:[#allocation6 + $0x968] sm:$0xff]  ;;  %v1747_v50 = vld [vmem:[#allocation6 + $0x978] sm:$0xff] }
 0x287   :  { %v667_v51 = vld [vmem:[#allocation4 + $0x8] sm:$0x3] }
 0x288   :  { %3075 = vmatpush1.bf16.msra.mxu1 %v3074_v55  ;;  %v1704_v55 = vld [vmem:[#allocation6 + $0x820] sm:$0xff] }
 0x289   :  { %3077 = vmatprep.subr.bf16.mxu1 %v3076_v56  ;;  %v1706_v56 = vld [vmem:[#allocation6 + $0x830] sm:$0xff] }
 0x28a   :  { %v3114_v59 = vpack.c.bf16 %v1706_v56, %v1704_v55  ;;  %v1746_v55 = vld [vmem:[#allocation6 + $0x970] sm:$0xff]  ;;  %v709_v56 = vrot.slane %v667_v51, %v3588_v34 }
 0x28c   :  { %3079 = vmatpush1.bf16.msra.mxu1 %v3078_v62  ;;  %v1710_v62 = vld [vmem:[#allocation6 + $0x850] sm:$0xff] }
 0x28d   :  { %3081 = vmatprep.subr.bf16.mxu1 %v3080_v11  ;;  %v1713_v11 = vld [vmem:[#allocation6 + $0x868] sm:$0xff]  ;;  %v3118_v1 = vpack.c.bf16 %v1710_v62, %v1708_v60  ;;  %v3156_v62 = vpack.c.bf16 %v1751_v58, %v1749_v57 }
 0x28e   :  { %v3120_v2 = vpack.c.bf16 %v1715_v0, %v1713_v11  ;;  %v1748_v11 = vld [vmem:[#allocation6 + $0x980] sm:$0xff]  ;;  %v1750_v0 = vld [vmem:[#allocation6 + $0x990] sm:$0xff] }
 0x290   :  { %3083 = vmatpush1.bf16.msra.mxu1 %v3082_v5  ;;  %v1714_v5 = vld [vmem:[#allocation6 + $0x870] sm:$0xff] }
 0x291   :  { %3085 = vmatprep.subr.bf16.mxu1 %v3084_v6  ;;  %v1717_v6 = vld [vmem:[#allocation6 + $0x888] sm:$0xff]  ;;  %v3122_v8 = vpack.c.bf16 %v1714_v5, %v1712_v48  ;;  %v1755_v48 = vld [vmem:[#allocation6 + $0x9b8] sm:$0xff] }
 0x292   :  { %v3124_v9 = vpack.c.bf16 %v1719_v7, %v1717_v6  ;;  %v3158_v6 = vpack.c.bf16 %v1750_v0, %v1748_v11 }
 0x294   :  { %3087 = vmatpush1.bf16.msra.mxu1 %v3086_v20  ;;  %v1718_v20 = vld [vmem:[#allocation6 + $0x890] sm:$0xff] }
 0x295   :  { %3089 = vmatprep.subr.bf16.mxu1 %v3088_v13  ;;  %v1721_v13 = vld [vmem:[#allocation6 + $0x8a8] sm:$0xff]  ;;  %v3126_v15 = vpack.c.bf16 %v1718_v20, %v1716_v10  ;;  %v1759_v20 = vld [vmem:[#allocation6 + $0x9d8] sm:$0xff] }
 0x296   :  { %v3128_v28 = vpack.c.bf16 %v1723_v14, %v1721_v13  ;;  %v1757_v10 = vld [vmem:[#allocation6 + $0x9c8] sm:$0xff] }
 0x297   :  { %v3164_v14 = vpack.c.bf16 %v1759_v20, %v1757_v10 }
 0x298   :  { %3091 = vmatpush1.bf16.msra.mxu1 %v3090_v17  ;;  %v1722_v17 = vld [vmem:[#allocation6 + $0x8b0] sm:$0xff] }
 0x299   :  { %3093 = vmatprep.subr.bf16.mxu1 %v3092_v18  ;;  %v1725_v18 = vld [vmem:[#allocation6 + $0x8c8] sm:$0xff]  ;;  %v3130_v21 = vpack.c.bf16 %v1722_v17, %v1720_v41  ;;  %v1763_v17 = vld [vmem:[#allocation6 + $0x9f8] sm:$0xff] }
 0x29a   :  { %v3132_v38 = vpack.c.bf16 %v1727_v19, %v1725_v18  ;;  %v1761_v41 = vld [vmem:[#allocation6 + $0x9e8] sm:$0xff]  ;;  %v705_v19 = vrot.slane %v667_v51, %v3583_v31 }
 0x29c   :  { %3095 = vmatpush1.bf16.msra.mxu1 %v3094_v24  ;;  %v1726_v24 = vld [vmem:[#allocation6 + $0x8d0] sm:$0xff] }
 0x29d   :  { %3097 = vmatprep.subr.bf16.mxu1 %v3096_v25  ;;  %v1729_v25 = vld [vmem:[#allocation6 + $0x8e8] sm:$0xff]  ;;  %v3134_v27 = vpack.c.bf16 %v1726_v24, %v1724_v22  ;;  %v1762_v22 = vld [vmem:[#allocation6 + $0x9f0] sm:$0xff] }
 0x29e   :  { %v3136_v29 = vpack.c.bf16 %v1731_v26, %v1729_v25 }
 0x2a0   :  { %3099 = vmatpush1.bf16.msra.mxu1 %v3098_v32  ;;  %v1730_v32 = vld [vmem:[#allocation6 + $0x8f0] sm:$0xff] }
 0x2a1   :  { %3101 = vmatprep.subr.bf16.mxu1 %v3100_v36  ;;  %v1735_v36 = vld [vmem:[#allocation6 + $0x918] sm:$0xff]  ;;  %v3138_v37 = vpack.c.bf16 %v1730_v32, %v1728_v30 }
 0x2a2   :  { %v3140_v39 = vpack.c.bf16 %v1735_v36, %v1733_v35  ;;  %v2163_v32 = vld [vmem:[#allocation9 + $0xf0] sm:$0xff]  ;;  %v2164_v35 = vld [vmem:[#allocation9 + $0xf8] sm:$0xff] }
 0x2a3   :  { %v3200_v36 = vpack.c.bf16 %v2164_v35, %v2163_v32 }
 0x2a4   :  { %3103 = vmatpush1.bf16.msra.mxu1 %v3102_v42  ;;  %v1737_v42 = vld [vmem:[#allocation6 + $0x928] sm:$0xff] }
 0x2a5   :  { %3105 = vmatprep.subr.bf16.mxu1 %v3104_v44  ;;  %v3144_v44 = vpack.c.bf16 %v1739_v33, %v1737_v42  ;;  %v1769_v42 = vrot.slane %v1764_v40, %v3583_v31  ;;  %v1773_v33 = vrot.slane %v1764_v40, %v3588_v34 }
 0x2a8   :  { %3107 = vmatpush1.bf16.msra.mxu1 %v3106_v47  ;;  %v3146_v47 = vpack.c.bf16 %v1738_v46, %v1736_v45 }
 0x2a9   :  { %3109 = vmatprep.subr.bf16.mxu1 %v3108_v16  ;;  %v1740_v16 = vld [vmem:[#allocation6 + $0x940] sm:$0xff] }
 0x2ab   :  { %2054 = vmatmul.mubr.f32.vlgmr.msra.gmra.mrb[4].mxu1 %v1440_v53  ;;  %v3152_v53 = vpack.c.bf16 %v1747_v50, %v1745_v49 }
 0x2ac   :  { %3111 = vmatpush1.bf16.msra.mxu1 %v3110_v52  ;;  %v3150_v52 = vpack.c.bf16 %v1742_v63, %v1740_v16 }
 0x2ad   :  { %3113 = vmatprep.subr.bf16.mxu1 %v3112_v54  ;;  %v1744_v54 = vld [vmem:[#allocation6 + $0x960] sm:$0xff] }
 0x2b0   :  { %3115 = vmatpush1.bf16.msra.mxu1 %v3114_v59 }
 0x2b1   :  { %3117 = vmatprep.subr.bf16.mxu1 %v3116_v3  ;;  %v3154_v3 = vpack.c.bf16 %v1746_v55, %v1744_v54 }
 0x2b4   :  { %3119 = vmatpush1.bf16.msra.mxu1 %v3118_v1 }
 0x2b5   :  { %3121 = vmatprep.subr.bf16.mxu1 %v3120_v2  ;;  %v1753_v2 = vld [vmem:[#allocation6 + $0x9a8] sm:$0xff] }
 0x2b6   :  { %v3160_v7 = vpack.c.bf16 %v1755_v48, %v1753_v2 }
 0x2b8   :  { %3123 = vmatpush1.bf16.msra.mxu1 %v3122_v8  ;;  %v1752_v8 = vld [vmem:[#allocation6 + $0x9a0] sm:$0xff] }
 0x2b9   :  { %3125 = vmatprep.subr.bf16.mxu1 %v3124_v9  ;;  %v1754_v9 = vld [vmem:[#allocation6 + $0x9b0] sm:$0xff] }
 0x2ba   :  { %v3162_v13 = vpack.c.bf16 %v1754_v9, %v1752_v8 }
 0x2bc   :  { %3127 = vmatpush1.bf16.msra.mxu1 %v3126_v15  ;;  %v1756_v15 = vld [vmem:[#allocation6 + $0x9c0] sm:$0xff] }
 0x2bd   :  { %3129 = vmatprep.subr.bf16.mxu1 %v3128_v28  ;;  %v1758_v28 = vld [vmem:[#allocation6 + $0x9d0] sm:$0xff] }
 0x2be   :  { %v3166_v18 = vpack.c.bf16 %v1758_v28, %v1756_v15 }
 0x2c0   :  { %3131 = vmatpush1.bf16.msra.mxu1 %v3130_v21  ;;  %v3168_v21 = vpack.c.bf16 %v1763_v17, %v1761_v41 }
 0x2c1   :  { %3133 = vmatprep.subr.bf16.mxu1 %v3132_v38  ;;  %v1760_v38 = vld [vmem:[#allocation6 + $0x9e0] sm:$0xff] }
 0x2c2   :  { %v3170_v24 = vpack.c.bf16 %v1762_v22, %v1760_v38 }
 0x2c4   :  { %3135 = vmatpush1.bf16.msra.mxu1 %v3134_v27  ;;  %v2145_v27 = vld [vmem:[#allocation9 + $0x60] sm:$0xff] }
 0x2c5   :  { %3137 = vmatprep.subr.bf16.mxu1 %v3136_v29  ;;  %v2146_v29 = vld [vmem:[#allocation9 + $0x68] sm:$0xff] }
 0x2c6   :  { %v3198_v30 = vpack.c.bf16 %v2146_v29, %v2145_v27 }
 0x2c8   :  { %3139 = vmatpush1.bf16.msra.mxu1 %v3138_v37  ;;  %3199 = vmatpush3.bf16.msra.mxu0 %v3198_v30  ;;  %v2147_v37 = vld [vmem:[#allocation9 + $0x70] sm:$0xff] }
 0x2c9   :  { %3141 = vmatprep.subr.bf16.mxu1 %v3140_v39  ;;  %v2148_v39 = vld [vmem:[#allocation9 + $0x78] sm:$0xff]  ;;  %3201 = vmatprep.subr.bf16.mxu0 %v3200_v36 }
 0x2ca   :  { %v3202_v12 = vpack.c.bf16 %v2148_v39, %v2147_v37 }
 0x2cc   :  { %3143 = vmatpush1.bf16.msra.mxu1 %v3142_v43  ;;  %3203 = vmatpush3.bf16.msra.mxu0 %v3202_v12 }
 0x2cd   :  { %3145 = vmatprep.subr.bf16.mxu1 %v3144_v44 }
 0x2d0   :  { %3147 = vmatpush1.bf16.msra.mxu1 %v3146_v47 }
 0x2d1   :  { %3149 = vmatprep.subr.bf16.mxu1 %v3148_v23  ;;  %v2256_v23 = vld [vmem:[#allocation10] ss:$0 sm:$0xff] }
 0x2d4   :  { %3151 = vmatpush1.bf16.msra.mxu1 %v3150_v52  ;;  %v1429_v59 = vpop.f32.mrb[6].mxu0 }
 0x2d5   :  { %v1431_v60 = vpop.f32.mrb[7].mxu0  ;;  %3153 = vmatprep.subr.bf16.mxu1 %v3152_v53  ;;  %v3214_v25 = vadd.f32 %v1429_v59, %v705_v19 }
 0x2d6   :  { %v3215_v1 = vadd.f32 %v1431_v60, %v709_v56 }
 0x2d7   :  { %v1442_v26 = vmax.f32 %v3214_v25, 0.0 }
 0x2d8   :  { %v1443_v5 = vmax.f32 %v3215_v1, 0.0  ;;  %3155 = vmatpush1.bf16.msra.mxu1 %v3154_v3 }
 0x2d9   :  { %3157 = vmatprep.subr.bf16.mxu1 %v3156_v62 }
 0x2da   :  { %2124 = vmatprep.mubr.f32.mxu1 %v1443_v5 }
 0x2dc   :  { %3159 = vmatpush1.bf16.msra.mxu1 %v3158_v6 }
 0x2dd   :  { %3161 = vmatprep.subr.bf16.mxu1 %v3160_v7 }
 0x2e0   :  { %3163 = vmatpush1.bf16.msra.mxu1 %v3162_v13 }
 0x2e1   :  { %3165 = vmatprep.subr.bf16.mxu1 %v3164_v14 }
 0x2e4   :  { %3167 = vmatpush1.bf16.msra.mxu1 %v3166_v18 }
 0x2e5   :  { %3169 = vmatprep.subr.bf16.mxu1 %v3168_v21 }
 0x2e8   :  { %3171 = vmatpush1.bf16.msra.mxu1 %v3170_v24 }
 0x2eb   :  { %2125 = vmatmul.mubr.f32.vlgmr.msra.gmra.mrb[4].mxu1 %v1442_v26 }
 0x3be   :  { %v2126_v43 = vpop.f32.mrb[4].mxu1 }
 0x3bf   :  { %v3216_v44 = vadd.f32 %v2126_v43, %v1769_v42  ;;  %v2128_v45 = vpop.f32.mrb[5].mxu1 }
 0x3c0   :  { %v3217_v46 = vadd.f32 %v2128_v45, %v1773_v33 }
 0x3c1   :  { %v2131_v4 = vmax.f32 %v3216_v44, 0.0 }
 0x3c2   :  { %v2132_v61 = vmax.f32 %v3217_v46, 0.0 }
 0x3c4   :  { %2236 = vmatprep.mubr.f32.mxu0 %v2132_v61 }
 0x3c5   :  { %2237 = vmatmul.mubr.f32.vlgmr.msra.gmra.mrb[8].mxu0 %v2131_v4 }
 0x498   :  { %v2289_v47 = vpop.f32.mrb[8].mxu0 }
 0x499   :  { %v2290_v16 = vpop.f32.mrb[9].mxu0 }
 0x49a   :  { %v2291_v63 = vadd.f32 %v2290_v16, %v2289_v47 }
 0x49c   :  { %v2239_v49 = vadd.f32 %v2291_v63, %v2256_v23 }
 0x49e   :  { %2242 = vst [vmem:[%s3631_s7] sm:$0xff] %v2239_v49 }
 0x49f   :  { %2247 = vsyncpa [#allocation3], 1 }
 0x4a0   :  { %2248 = vsyncpa [#allocation5], 1 }
 0x4a1   :  { %2249 = vsyncpa [#allocation8], 1 }
 0x4a2   :  { %2250 = vsyncpa [#allocation11], 1 }

</bundles_post_ra>
